<compile_context>
chip_gen: v6e
topology: v6e:2x2x1
jax: 0.10.0
libtpu: 0.0.40
codegen_flags: <defaults>
</compile_context>

<pallas_src>
import jax
import jax.numpy as jnp
import numpy as np
from jax import lax
from jax.experimental import pallas as pl
from jax.experimental.pallas import tpu as pltpu

SEARCH_RADIUS = 12                       # hard-coded default in compute_corr_softmax
P = 2 * SEARCH_RADIUS + 1                # 25
DIV_NUM = 512.0                          # self.div_num
T_SOFT = DIV_NUM ** (-0.5)               # self.T (default)

FEAT_DIM = 64                            # synthetic feature channels (real: 512/1024)
FEAT_HW = 16                             # synthetic feature spatial size (real: 30)


def _corr_softmax_kernel(win_ref, ninv_ref, img_ref, vid_ref, out_ref):
    """One (batch, context-frame) tile of CycleTime.compute_corr_softmax.

    win_ref : (HW, HW) f32 {0,1}  - 1 iff vid pixel p is inside the 25x25 window of q
    ninv_ref: (HW, 1)  f32        - number of out-of-frame (zero-padded) offsets per q
    img_ref : (1, HW, CH) bf16    - img2 features (pre-ReLU)
    vid_ref : (1, 1, HW, CH) bf16 - one context-frame features (pre-ReLU)
    out_ref : (1, 1, HW, HW) f32  - softmax over offsets, in absolute vid coords
    """
    # Upcast to f32 right after load (v5e VPU/EUP have no bf16) + ReLU + L2-normalize.
    img = jnp.maximum(img_ref[0].astype(jnp.float32), 0.0)          # (HW, CH)
    vid = jnp.maximum(vid_ref[0, 0].astype(jnp.float32), 0.0)       # (HW, CH)
    img = img * lax.rsqrt(jnp.maximum(jnp.sum(img * img, axis=-1, keepdims=True), 1e-24))
    vid = vid * lax.rsqrt(jnp.maximum(jnp.sum(vid * vid, axis=-1, keepdims=True), 1e-24))

    # Full pixel-pair correlation on the MXU: G[q, p] = <img[q], vid[p]>.
    g = lax.dot_general(img, vid, (((1,), (1,)), ((), ())),
                        preferred_element_type=jnp.float32)          # (HW, HW)

    win = win_ref[...]                                               # (HW, HW) {0,1}
    # torch divides by 512**-0.5 twice  ==  multiply by 512 once.
    # Logits are >= 0 (ReLU'd normalized vectors), so masking with *win keeps
    # the row max identical to the reference max over the 625 offsets.
    lm = g * DIV_NUM * win                                           # (HW, HW)
    m = jnp.max(lm, axis=-1, keepdims=True)                          # (HW, 1), >= 0
    e = jnp.exp(lm - m) * win                                        # masked exp
    # Zero-padded (out-of-frame) offsets each contribute exp(0 - m) to the denom.
    denom = jnp.sum(e, axis=-1, keepdims=True) + ninv_ref[...] * jnp.exp(-m)
    out_ref[0, 0] = e * pl.reciprocal(denom, approx=True)


def _host_tables(H, W):
    """Grid-constant tables: window mask, padded-offset counts, one-hot shift
    matrices for the offset re-indexing, and the -1.0 validity mask."""
    R = SEARCH_RADIUS
    yq = np.repeat(np.arange(H), W)                                  # (HW,)
    xq = np.tile(np.arange(W), H)                                    # (HW,)
    win = ((np.abs(yq[:, None] - yq[None, :]) <= R) &
           (np.abs(xq[:, None] - xq[None, :]) <= R)).astype(np.float32)     # (HW, HW)
    ninv = (float(P * P) - win.sum(axis=1, keepdims=True)).astype(np.float32)  # (HW, 1)

    d = np.arange(P)[:, None, None] - R
    sv = (np.arange(H)[None, :, None] + d == np.arange(H)[None, None, :]).astype(np.float32)
    sh = (np.arange(W)[None, :, None] + d == np.arange(W)[None, None, :]).astype(np.float32)

    vy = np.arange(H)[None, :] + (np.arange(P)[:, None] - R)
    vx = np.arange(W)[None, :] + (np.arange(P)[:, None] - R)
    vyok = (vy >= 0) & (vy < H)                                      # (P, H)
    vxok = (vx >= 0) & (vx < W)                                      # (P, W)
    valid = vyok[:, None, :, None] & vxok[None, :, None, :]          # (P, P, H, W)
    return win, ninv, sv, sh, valid


def corr_softmax_pallas(img_feat, vid_feat):
    """img_feat: (B, H, W, CH) pre-ReLU features of img2.
       vid_feat: (B, T, H, W, CH) pre-ReLU features of the video clip.
       returns : (B, T, P, P, H, W) float32."""
    B, H, W, CH = img_feat.shape
    T = vid_feat.shape[1]
    HW = H * W
    win, ninv, sv, sh, valid = _host_tables(H, W)

    # bf16 features halve HBM->VMEM DMA; all compute stays f32 inside the kernel.
    img_b = img_feat.reshape(B, HW, CH).astype(jnp.bfloat16)
    vid_b = vid_feat.reshape(B, T, HW, CH).astype(jnp.bfloat16)

    soft = pl.pallas_call(
        _corr_softmax_kernel,
        out_shape=jax.ShapeDtypeStruct((B, T, HW, HW), jnp.float32),
        grid_spec=pltpu.PrefetchScalarGridSpec(
            num_scalar_prefetch=0,
            grid=(B, T),
            in_specs=[
                pl.BlockSpec((HW, HW), lambda b, t: (0, 0)),          # window mask (resident)
                pl.BlockSpec((HW, 1), lambda b, t: (0, 0)),           # ninv (resident)
                pl.BlockSpec((1, HW, CH), lambda b, t: (b, 0, 0)),    # img2 (resident over T)
                pl.BlockSpec((1, 1, HW, CH), lambda b, t: (b, t, 0, 0)),
            ],
            out_specs=pl.BlockSpec((1, 1, HW, HW), lambda b, t: (b, t, 0, 0)),
        ),
        compiler_params=pltpu.CompilerParams(
            dimension_semantics=("parallel", "parallel"),
            vmem_limit_bytes=64 * 1024 * 1024),
    )(jnp.asarray(win), jnp.asarray(ninv), img_b, vid_b)

    # Re-index the softmaxed volume from absolute vid coordinates (y', x') to
    # offset coordinates (dh, dw) with two tiny one-hot einsums (plain XLA,
    # pure data movement).  Invalid offsets select nothing (exact 0) and are
    # then overwritten with -1.0 as in the PyTorch reference.
    soft6 = soft.reshape(B, T, H, W, H, W)
    t1 = jnp.einsum('btyxYX,dyY->btdyxX', soft6, jnp.asarray(sv))
    out = jnp.einsum('btdyxX,wxX->btdwyx', t1, jnp.asarray(sh))
    return jnp.where(jnp.asarray(valid)[None, None], out, jnp.float32(-1.0))


def encode_video(x, proj):
    """Deterministic stand-in for self.encoderVideo (inflated ResNet-18).
    # TODO(synk): encoderVideo is an external pretrained inflated ResNet-18;
    # replaced here by a per-frame pointwise channel projection + spatial
    # average pooling producing a (B, T, h, w, CH) feature map.
    x: (B, T, C, Hi, Wi) -> (B, T, FEAT_HW, FEAT_HW, FEAT_DIM), channels-last."""
    B, T, C, Hi, Wi = x.shape
    feat = jnp.einsum('btchw,cf->btfhw', x, proj)                    # (B,T,F,Hi,Wi)
    s = Hi // FEAT_HW
    feat = feat.reshape(B, T, FEAT_DIM, FEAT_HW, s, FEAT_HW, s).mean(axis=(4, 6))
    return jnp.transpose(feat, (0, 1, 3, 4, 2))                      # channels-last


def cycletime_forward(ximg1, img2, proj):
    """CycleTime.forward with pretrained=True (afterconv1 skipped)."""
    feat1 = encode_video(ximg1, proj)            # r50_feat1 (pre-ReLU)
    feat2 = encode_video(img2, proj)[:, 0]       # img_feat2 (single frame, pre-ReLU)
    # ReLU + F.normalize + compute_corr_softmax are fused inside the Pallas kernel.
    return corr_softmax_pallas(feat2, feat1)     # (B, T, P, P, h, w)


def reference_corr(img_feat, vid_feat):
    """Pure NumPy reference of the hot path (same math as the torch code)."""
    B, H, W, CH = img_feat.shape
    T = vid_feat.shape[1]
    R = SEARCH_RADIUS

    def norm(v):
        v = np.maximum(v.astype(np.float32), 0.0)
        n = np.sqrt(np.sum(v * v, axis=-1, keepdims=True))
        return v / np.maximum(n, 1e-12)

    f1 = norm(img_feat)                                              # patch_feat1
    f2 = norm(vid_feat)                                              # r50_feat2
    f2p = np.pad(f2, ((0, 0), (0, 0), (R, R), (R, R), (0, 0)))
    corr = np.zeros((B, T, P, P, H, W), np.float32)
    for dh in range(P):
        for dw in range(P):
            winv = f2p[:, :, dh:dh + H, dw:dw + W, :]
            corr[:, :, dh, dw] = np.sum(winv * f1[:, None], axis=-1)
    logits = ((corr / T_SOFT) / T_SOFT).reshape(B, T, P * P, H, W)
    m = logits.max(axis=2, keepdims=True)
    e = np.exp(logits - m)
    soft = (e / e.sum(axis=2, keepdims=True)).reshape(B, T, P, P, H, W)
    dh_i = (np.arange(P) - R)[:, None, None, None]
    dw_i = (np.arange(P) - R)[None, :, None, None]
    yy = np.arange(H)[None, None, :, None]
    xx = np.arange(W)[None, None, None, :]
    invalid = ((yy + dh_i < 0) | (yy + dh_i >= H) |
               (xx + dw_i < 0) | (xx + dw_i >= W))
    return np.where(invalid[None, None], np.float32(-1.0), soft).astype(np.float32)


if __name__ == "__main__":
    key = jax.random.PRNGKey(0)
    k1, k2, k3 = jax.random.split(key, 3)

    B, T_CLIP, C, HI, WI = 2, 4, 3, 64, 64
    ximg1 = jax.random.normal(k1, (B, T_CLIP, C, HI, WI), jnp.float32)
    img2 = jax.random.normal(k2, (B, 1, C, HI, WI), jnp.float32)
    proj = jax.random.normal(k3, (C, FEAT_DIM), jnp.float32) * 0.1   # encoder stand-in weights

    out = cycletime_forward(ximg1, img2, proj)
    out = jax.block_until_ready(out)
    assert out.shape == (B, T_CLIP, P, P, FEAT_HW, FEAT_HW), out.shape

    # Correctness check of the Pallas hot path against a NumPy reference.  The
    # kernel consumes bf16 features, so feed the reference the identical
    # bf16-rounded values (the in-kernel math itself is f32).
    feat1 = encode_video(ximg1, proj)
    feat2 = encode_video(img2, proj)[:, 0]
    f1 = np.asarray(feat1.astype(jnp.bfloat16).astype(jnp.float32))
    f2 = np.asarray(feat2.astype(jnp.bfloat16).astype(jnp.float32))
    ref = reference_corr(f2, f1)
    np.testing.assert_allclose(np.asarray(out), ref, rtol=5e-3, atol=2e-3)

    print("KERNEL_OK")
</pallas_src>

<mosaic_0001>
module attributes {stable_mosaic.version = 11 : i64} {
  func.func @_corr_softmax_kernel(%arg0: i32, %arg1: i32, %arg2: memref<256x256xf32, #tpu.memory_space<vmem>>, %arg3: memref<256x1xf32, #tpu.memory_space<vmem>>, %arg4: memref<1x256x64xbf16, #tpu.memory_space<vmem>>, %arg5: memref<1x1x256x64xbf16, #tpu.memory_space<vmem>>, %arg6: memref<1x1x256x256xf32, #tpu.memory_space<vmem>>) attributes {dimension_semantics = [#tpu.dimension_semantics<parallel>, #tpu.dimension_semantics<parallel>], iteration_bounds = array<i64: 2, 4>, scalar_prefetch = 0 : i64, scratch_operands = 0 : i64, tpu.core_type = #tpu.core_type<tc>, window_params = [{pipeline_mode = #tpu.pipeline_mode<synchronous>, transform_indices = @transform_0, window_bounds = array<i64: 256, 256>}, {pipeline_mode = #tpu.pipeline_mode<synchronous>, transform_indices = @transform_1, window_bounds = array<i64: 256, 1>}, {transform_indices = @transform_2, window_bounds = array<i64: 1, 256, 64>}, {transform_indices = @transform_3, window_bounds = array<i64: 1, 1, 256, 64>}, {transform_indices = @transform_4, window_bounds = array<i64: 1, 1, 256, 256>}]} {
    %c0 = arith.constant 0 : index
    %c0_0 = arith.constant 0 : index
    %c0_1 = arith.constant 0 : index
    %0 = vector.load %arg4[%c0, %c0_0, %c0_1] : memref<1x256x64xbf16, #tpu.memory_space<vmem>>, vector<1x256x64xbf16>
    %1 = vector.shape_cast %0 : vector<1x256x64xbf16> to vector<256x64xbf16>
    %2 = arith.extf %1 : vector<256x64xbf16> to vector<256x64xf32>
    %cst = arith.constant 0.000000e+00 : f32
    %3 = vector.broadcast %cst : f32 to vector<256x64xf32>
    %4 = arith.maximumf %2, %3 : vector<256x64xf32>
    %c0_2 = arith.constant 0 : index
    %c0_3 = arith.constant 0 : index
    %c0_4 = arith.constant 0 : index
    %c0_5 = arith.constant 0 : index
    %5 = vector.load %arg5[%c0_2, %c0_3, %c0_4, %c0_5] : memref<1x1x256x64xbf16, #tpu.memory_space<vmem>>, vector<1x1x256x64xbf16>
    %6 = vector.shape_cast %5 : vector<1x1x256x64xbf16> to vector<256x64xbf16>
    %7 = arith.extf %6 : vector<256x64xbf16> to vector<256x64xf32>
    %cst_6 = arith.constant 0.000000e+00 : f32
    %8 = vector.broadcast %cst_6 : f32 to vector<256x64xf32>
    %9 = arith.maximumf %7, %8 : vector<256x64xf32>
    %10 = arith.mulf %4, %4 : vector<256x64xf32>
    %cst_7 = arith.constant dense<0.000000e+00> : vector<256xf32>
    %11 = vector.multi_reduction <add>, %10, %cst_7 [1] : vector<256x64xf32> to vector<256xf32>
    %12 = vector.shape_cast %11 : vector<256xf32> to vector<256x1xf32>
    %cst_8 = arith.constant 1.000000e-24 : f32
    %13 = vector.broadcast %cst_8 : f32 to vector<256x1xf32>
    %14 = arith.maximumf %12, %13 : vector<256x1xf32>
    %15 = math.rsqrt %14 : vector<256x1xf32>
    %16 = vector.broadcast %15 : vector<256x1xf32> to vector<256x64xf32>
    %17 = arith.mulf %4, %16 : vector<256x64xf32>
    %18 = arith.mulf %9, %9 : vector<256x64xf32>
    %cst_9 = arith.constant dense<0.000000e+00> : vector<256xf32>
    %19 = vector.multi_reduction <add>, %18, %cst_9 [1] : vector<256x64xf32> to vector<256xf32>
    %20 = vector.shape_cast %19 : vector<256xf32> to vector<256x1xf32>
    %cst_10 = arith.constant 1.000000e-24 : f32
    %21 = vector.broadcast %cst_10 : f32 to vector<256x1xf32>
    %22 = arith.maximumf %20, %21 : vector<256x1xf32>
    %23 = math.rsqrt %22 : vector<256x1xf32>
    %24 = vector.broadcast %23 : vector<256x1xf32> to vector<256x64xf32>
    %25 = arith.mulf %9, %24 : vector<256x64xf32>
    %cst_11 = arith.constant dense<0.000000e+00> : vector<256x256xf32>
    %26 = tpu.matmul %17, %25, %cst_11 {dimension_numbers = #tpu.dot_dimension_numbers<[1], [1], [0], [0], [0, 0, 1, 0], [], []>} : vector<256x64xf32>, vector<256x64xf32>, vector<256x256xf32> -> vector<256x256xf32>
    %c0_12 = arith.constant 0 : index
    %c0_13 = arith.constant 0 : index
    %27 = vector.load %arg2[%c0_12, %c0_13] : memref<256x256xf32, #tpu.memory_space<vmem>>, vector<256x256xf32>
    %cst_14 = arith.constant 5.120000e+02 : f32
    %28 = vector.broadcast %cst_14 : f32 to vector<256x256xf32>
    %29 = arith.mulf %26, %28 : vector<256x256xf32>
    %30 = arith.mulf %29, %27 : vector<256x256xf32>
    %cst_15 = arith.constant dense<0xFF800000> : vector<256xf32>
    %31 = vector.multi_reduction <maximumf>, %30, %cst_15 [1] : vector<256x256xf32> to vector<256xf32>
    %32 = vector.shape_cast %31 : vector<256xf32> to vector<256x1xf32>
    %33 = vector.broadcast %32 : vector<256x1xf32> to vector<256x256xf32>
    %34 = arith.subf %30, %33 : vector<256x256xf32>
    %35 = math.exp %34 : vector<256x256xf32>
    %36 = arith.mulf %35, %27 : vector<256x256xf32>
    %cst_16 = arith.constant dense<0.000000e+00> : vector<256xf32>
    %37 = vector.multi_reduction <add>, %36, %cst_16 [1] : vector<256x256xf32> to vector<256xf32>
    %38 = vector.shape_cast %37 : vector<256xf32> to vector<256x1xf32>
    %c0_17 = arith.constant 0 : index
    %c0_18 = arith.constant 0 : index
    %39 = vector.load %arg3[%c0_17, %c0_18] : memref<256x1xf32, #tpu.memory_space<vmem>>, vector<256x1xf32>
    %cst_19 = arith.constant 0.000000e+00 : f32
    %40 = vector.broadcast %cst_19 : f32 to vector<256x1xf32>
    %41 = arith.subf %40, %32 : vector<256x1xf32>
    %42 = math.exp %41 : vector<256x1xf32>
    %43 = arith.mulf %39, %42 : vector<256x1xf32>
    %44 = arith.addf %38, %43 : vector<256x1xf32>
    %45 = tpu.reciprocal %44 {approx = true} : vector<256x1xf32> -> vector<256x1xf32>
    %46 = vector.broadcast %45 : vector<256x1xf32> to vector<256x256xf32>
    %47 = arith.mulf %36, %46 : vector<256x256xf32>
    %c0_20 = arith.constant 0 : index
    %c0_21 = arith.constant 0 : index
    %c0_22 = arith.constant 0 : index
    %c0_23 = arith.constant 0 : index
    %48 = vector.load %arg6[%c0_20, %c0_21, %c0_22, %c0_23] : memref<1x1x256x256xf32, #tpu.memory_space<vmem>>, vector<1x1x256x256xf32>
    %49 = vector.shape_cast %48 : vector<1x1x256x256xf32> to vector<256x256xf32>
    %50 = vector.shape_cast %47 : vector<256x256xf32> to vector<1x1x256x256xf32>
    tpu.vector_store %arg6[%c0_20, %c0_21, %c0_22, %c0_23], %50 {strides = array<i32>} : memref<1x1x256x256xf32, #tpu.memory_space<vmem>>, vector<1x1x256x256xf32>,
    return
  }
  func.func @transform_0(%arg0: i32, %arg1: i32) -> (i32, i32) {
    %c0_i32 = arith.constant 0 : i32
    %c0_i32_0 = arith.constant 0 : i32
    %c0_i32_1 = arith.constant 0 : i32
    return %c0_i32, %c0_i32_0 : i32, i32
  }
  func.func @transform_1(%arg0: i32, %arg1: i32) -> (i32, i32) {
    %c0_i32 = arith.constant 0 : i32
    %c0_i32_0 = arith.constant 0 : i32
    %c0_i32_1 = arith.constant 0 : i32
    return %c0_i32, %c0_i32_0 : i32, i32
  }
  func.func @transform_2(%arg0: i32, %arg1: i32) -> (i32, i32, i32) {
    %c0_i32 = arith.constant 0 : i32
    %c0_i32_0 = arith.constant 0 : i32
    %c0_i32_1 = arith.constant 0 : i32
    return %arg0, %c0_i32, %c0_i32_0 : i32, i32, i32
  }
  func.func @transform_3(%arg0: i32, %arg1: i32) -> (i32, i32, i32, i32) {
    %c0_i32 = arith.constant 0 : i32
    %c0_i32_0 = arith.constant 0 : i32
    %c0_i32_1 = arith.constant 0 : i32
    return %arg0, %arg1, %c0_i32, %c0_i32_0 : i32, i32, i32, i32
  }
  func.func @transform_4(%arg0: i32, %arg1: i32) -> (i32, i32, i32, i32) {
    %c0_i32 = arith.constant 0 : i32
    %c0_i32_0 = arith.constant 0 : i32
    %c0_i32_1 = arith.constant 0 : i32
    return %arg0, %arg1, %c0_i32, %c0_i32_0 : i32, i32, i32, i32
  }
}

</mosaic_0001>

<bundles_post_ra>
// kernel: tpu_custom_call.1
= control target key start
LH: loop header
LB: loop body
LE: loop exit
PB: predicated region body
PF: predicated region fallthrough
CT: control target
= control target key end

     0   :  { %9 = vsyncpa [#allocation3], 0  ;;  %s5446_s0 = inlined_call_operand.hbm [shape: f32[256,256], index: 0, kind: input, shape index: {}]   ;;  %s5447_s1 = inlined_call_operand.vmem [shape: f32[256,1], index: 1, kind: input, shape index: {}]   ;;  %s5448_s2 = inlined_call_operand.vmem [shape: bf16[2,256,64], index: 2, kind: input, shape index: {}]   ;;  %s5449_s3 = inlined_call_operand.vmem [shape: bf16[2,4,256,64], index: 3, kind: input, shape index: {}]   ;;  %s5450_s4 = inlined_call_operand.hbm [shape: f32[2,4,256,256], index: 4, kind: output, shape index: {}]  }
   0x1   :  { %10 = vsyncpa [#allocation4], 0 }
   0x2   :  { %12 = vsyncpa [#allocation4 + $0x1], 0  ;;  %s3625_s15 = smov 0   ;;  %s3627_s16 = smov 0  }
   0x3   :  { %s3629_s17 = smov 0   ;;  %s3631_s18 = smov 0  }
   0x4   :  { %s3633_s19 = smov 0   ;;  %s3635_s20 = smov 0  }
   0x5   :  { %s3637_s21 = smov 0   ;;  %s3639_s22 = smov 0  }
   0x6 LB: > { %s2626_s23 = sadd.s32 4294967295, %s3591_s22   ;;  %s2627_s24 = sadd.s32 4294967294, %s3591_s22   ;;  %s3591_s22 = sphi %s3639_s22, %s18_s22   ;;  %s3587_s21 = sphi %s3637_s21, %s5870_s21   ;;  %s3583_s20 = sphi %s3635_s20, %s5869_s20   ;;  %s3579_s19 = sphi %s3633_s19, %s5868_s19   ;;  %s3575_s18 = sphi %s3631_s18, %s5867_s18   ;;  %s3571_s17 = sphi %s3629_s17, %s5866_s17   ;;  %s3567_s16 = sphi %s3627_s16, %s5865_s16   ;;  %s3563_s15 = sphi %s3625_s15, %s5864_s15  }
   0x7   : > { %s27_s25 = sadd.s32 1, %s3583_s20  ;;  %s30_s26 = sadd.s32 1, %s3587_s21 }
   0x8   : > { %p28_p0 = scmp.ge.s32.totalorder %s27_s25, 4  ;;  %s135_s27 = sadd.s32 1, %s3571_s17 }
   0x9   : > { %p145_p1 = scmp.ne.s32.totalorder %s3571_s17, %s3567_s16  ;;  %p146_p2 = scmp.eq.s32.totalorder %s2626_s23, 7 }
   0xa   : > { %s5872_s25 = smov (%p28_p0, %s27_s25), 0  ;;  %s5874_s26 = smov (!%p28_p0, %s30_s26), %s3587_s21 }
   0xb   : > { %s131_s28 = ssub.s32 %s3583_s20, %s5872_s25  ;;  %p3677_p3 = por %p146_p2, %p145_p1 }
   0xc   : > { %p32_p4 = scmp.ge.s32.totalorder %s5874_s26, 2  ;;  %p151_p5 = scmp.ne.s32.totalorder %s3567_s16, %s3563_s15 }
   0xd   : > { %p152_p6 = scmp.eq.s32.totalorder %s2627_s24, 7  ;;  %p2628_p7 = scmp.ge.s32.totalorder %s3591_s22, 1 }
   0xe   : > { %s5876_s26 = smov (%p32_p4, %s5874_s26), 0  ;;  %p159_p9 = scmp.lt.s32.totalorder %s3591_s22, 9 }
   0xf   : > { %p3686_p8 = por %p152_p6, %p151_p5  ;;  %s130_s5 = ssub.s32 %s3587_s21, %s5876_s26 }
  0x10   : > { %s132_s6 = sor.u32 %s131_s28, %s130_s5  ;;  %p3693_p10 = pnand %p2628_p7, %p159_p9 }
  0x11   : > { %p133_p11 = scmp.eq.s32.totalorder %s132_s6, 0  ;;  %p3697_p12 = scmp.eq.s32.totalorder %s2626_s23, 0 }
  0x12   : > { %p3002_p13 = pneg %p3693_p10  ;;  %s3593_s10 = smov [#allocation2]  }
  0x13   : > { %s3704_s9 = scalar_select %p133_p11, %s3571_s17, %s135_s27  }
  0x14   : > { %s171_s11 = sshll.u32 %s3593_s10, 4  ;;  %p3708_p0 = pnand %p3697_p12, %p3002_p13  ;;  %s172_s11 = int_to_ptr.vmem [resolvable:$true] %s171_s11 }
  0x15   : > { %s3480_s13 = scalar_lea.vmem %s172_s11, 8192  ;;  %p3488_p6 = scmp.lt.s32.totalorder %s172_s11, %s172_s11 }
  0x16   : > { %p3471_p1 = pneg %p3708_p0  ;;  %p3481_p2 = scmp.ne.s32.totalorder %s172_s11, %s3480_s13 }
  0x17   : > { %p3489_p7 = scmp.lt.s32.totalorder %s3480_s13, %s3480_s13 }
  0x18   : > { %p3483_p4 = pnand %p3481_p2, %p3471_p1 }
  0x19   : > { %p3490_p9 = por %p3489_p7, %p3488_p6 }
  0x1a   : > { %p3484_p5 = pneg %p3483_p4 }
  0x1c   : > { %p3491_p11 = pnand %p3490_p9, %p3484_p5 }
  0x1e   : > { %3494 = shalt.err (!%p3491_p11)
}
  0x1f   : > { %s3594_s14 = smov 256   ;;  %s3595_s23 = smov 16  }
  0x20   : > { %3005 = dma.hbm_to_vmem [thread:$0]  (!%p3708_p0), %s5446_s0, 8192, %s172_s11, [#allocation3], %s3594_s14, %s3594_s14, %s3595_s23  }
  0x21   : > { %210 = sbr.rel (%p3693_p10) target bundleno = 1014 (0x3f6), region = 36 }
  0x26   : > { %3554 = dma.done.wait (%p3697_p12), [#allocation3], 8192  }
  0x27   : > { %3556 = vsyncadd (%p3697_p12), [#allocation3], 4294959104  ;;  %p245_p13 = scmp.lt.s32.totalorder %s3579_s19, 1  ;;  %p252_p1 = scmp.lt.s32.totalorder %s3575_s18, 3  ;;  %vm483_vm0 = vcmask 523264  }
  0x28   : > { %s3597_s14 = smov [#allocation5]  }
  0x29   : > { %s3728_s28 = scalar_select %p245_p13, %s3579_s19, 1 }
  0x2a   : > { %s253_s5 = scalar_select %p252_p1, %s3575_s18, 3 }
  0x2b   : > { %s2709_s6 = sshll.u32 %s3728_s28, 7  ;;  %s3499_s23 = sshll.u32 %s3597_s14, 4  ;;  %s3500_s23 = int_to_ptr.vmem [resolvable:$false] %s3499_s23 }
  0x2c   : > { %s2636_s7 = sshll.u32 %s253_s5, 5  ;;  %s3892_s24 = scalar_lea.vmem %s5448_s2, %s2709_s6 }
  0x2d   : > { %s256_s10 = sadd.s32 %s2709_s6, %s2636_s7  ;;  %s2704_s5 = sshll.u32 %s3575_s18, 6 }
  0x2e   : > { %s2638_s11 = sshll.u32 %s256_s10, 2  ;;  %s2705_s6 = sshll.u32 %s3579_s19, 8 }
  0x2f   : > { %s3737_s8 = scalar_lea.vmem %s5449_s3, %s2638_s11  ;;  %s2514_s7 = sadd.s32 %s2705_s6, %s2704_s5 }
  0x30   : > { %v2867_v0 = vld [vmem:[%s3737_s8 + $0x78] sm:$0xff]   ;;  %v2866_v2 = vld [vmem:[%s3737_s8 + $0x70] sm:$0xff]   ;;  %v2865_v22 = vld [vmem:[%s3737_s8 + $0x68] sm:$0xff]   ;;  %s2706_s18 = sshll.u32 %s2514_s7, 7 }
  0x31   : > { %v2859_v1 = vld [vmem:[%s3737_s8 + $0x38] sm:$0xff]   ;;  %v2837_v3 = vunpack.c.h.bf16 %v2867_v0  ;;  %v2836_v4 = vunpack.c.l.bf16 %v2867_v0  ;;  %v2858_v7 = vld [vmem:[%s3737_s8 + $0x30] sm:$0xff]   ;;  %v2833_v8 = vunpack.c.h.bf16 %v2866_v2  ;;  %v2832_v16 = vunpack.c.l.bf16 %v2866_v2  ;;  %v2857_v23 = vld [vmem:[%s3737_s8 + $0x28] sm:$0xff]   ;;  %s5389_s12 = scalar_lea.hbm %s5450_s4, %s2706_s18 }
  0x32   : > { %v2805_v5 = vunpack.c.h.bf16 %v2859_v1  ;;  %v2804_v6 = vunpack.c.l.bf16 %v2859_v1  ;;  %v2801_v9 = vunpack.c.h.bf16 %v2858_v7  ;;  %v2800_v17 = vunpack.c.l.bf16 %v2858_v7  ;;  %v2864_v42 = vld [vmem:[%s3737_s8 + $0x60] sm:$0xff]   ;;  %v2863_v60 = vld [vmem:[%s3737_s8 + $0x58] sm:$0xff]  }
  0x33   : > { %v3743_v10 = vmax.f32 %v2837_v3, 0.0  ;;  %v3745_v11 = vmax.f32 %v2836_v4, 0.0  ;;  %v3751_v14 = vmax.f32 %v2833_v8, 0.0  ;;  %v3771_v28 = vmax.f32 %v2832_v16, 0.0  ;;  %v2856_v43 = vld [vmem:[%s3737_s8 + $0x20] sm:$0xff]   ;;  %v2855_v61 = vld [vmem:[%s3737_s8 + $0x18] sm:$0xff]  }
  0x34   : > { %v3747_v12 = vmax.f32 %v2805_v5, 0.0  ;;  %v3749_v13 = vmax.f32 %v2804_v6, 0.0  ;;  %v3753_v15 = vmax.f32 %v2801_v9, 0.0  ;;  %v3773_v29 = vmax.f32 %v2800_v17, 0.0 }
  0x35   : > { %v707_v18 = vmul.f32 %v3743_v10, %v3743_v10  ;;  %v706_v19 = vmul.f32 %v3745_v11, %v3745_v11  ;;  %v705_v26 = vmul.f32 %v3751_v14, %v3751_v14  ;;  %v2829_v32 = vunpack.c.h.bf16 %v2865_v22 }
  0x36   : > { %v691_v20 = vmul.f32 %v3747_v12, %v3747_v12  ;;  %v690_v21 = vmul.f32 %v3749_v13, %v3749_v13  ;;  %v689_v27 = vmul.f32 %v3753_v15, %v3753_v15  ;;  %v2797_v33 = vunpack.c.h.bf16 %v2857_v23 }
  0x37   : > { %v801_v24 = vsel %vm483_vm0, %v707_v18, 0.0  ;;  %v798_v25 = vsel %vm483_vm0, %v706_v19, 0.0  ;;  %v795_v34 = vsel %vm483_vm0, %v705_v26, 0.0  ;;  %v704_v36 = vmul.f32 %v3771_v28, %v3771_v28 }
  0x38   : > { %802 = vadd.xlane.f32.xlu0 %v801_v24  ;;  %799 = vadd.xlane.f32.xlu1 %v798_v25  ;;  %v753_v30 = vsel %vm483_vm0, %v691_v20, 0.0  ;;  %v750_v31 = vsel %vm483_vm0, %v690_v21, 0.0  ;;  %v747_v35 = vsel %vm483_vm0, %v689_v27, 0.0  ;;  %v688_v37 = vmul.f32 %v3773_v29, %v3773_v29  ;;  %v2862_v20 = vld [vmem:[%s3737_s8 + $0x50] sm:$0xff]  }
  0x39   : > { %v3783_v38 = vmax.f32 %v2829_v32, 0.0  ;;  %v3785_v39 = vmax.f32 %v2797_v33, 0.0  ;;  %v2828_v40 = vunpack.c.l.bf16 %v2865_v22  ;;  %v2796_v41 = vunpack.c.l.bf16 %v2857_v23  ;;  %v2854_v21 = vld [vmem:[%s3737_s8 + $0x10] sm:$0xff]  }
  0x3a   : > { %v792_v44 = vsel %vm483_vm0, %v704_v36, 0.0  ;;  %v744_v45 = vsel %vm483_vm0, %v688_v37, 0.0  ;;  %v2825_v46 = vunpack.c.h.bf16 %v2864_v42  ;;  %v2793_v47 = vunpack.c.h.bf16 %v2856_v43 }
  0x3b   : > { %v703_v48 = vmul.f32 %v3783_v38, %v3783_v38  ;;  %v687_v49 = vmul.f32 %v3785_v39, %v3785_v39  ;;  %v3795_v50 = vmax.f32 %v2828_v40, 0.0  ;;  %v3797_v51 = vmax.f32 %v2796_v41, 0.0 }
  0x3c   : > { %754 = vadd.xlane.f32.xlu0 %v753_v30  ;;  %751 = vadd.xlane.f32.xlu1 %v750_v31  ;;  %v3799_v52 = vmax.f32 %v2825_v46, 0.0  ;;  %v3801_v53 = vmax.f32 %v2793_v47, 0.0  ;;  %v2824_v54 = vunpack.c.l.bf16 %v2864_v42  ;;  %v2792_v55 = vunpack.c.l.bf16 %v2856_v43  ;;  %v2861_v42 = vld [vmem:[%s3737_s8 + $0x48] sm:$0xff]  }
  0x3d   : > { %v789_v56 = vsel %vm483_vm0, %v703_v48, 0.0  ;;  %v741_v57 = vsel %vm483_vm0, %v687_v49, 0.0  ;;  %v702_v58 = vmul.f32 %v3795_v50, %v3795_v50  ;;  %v686_v59 = vmul.f32 %v3797_v51, %v3797_v51  ;;  %v2853_v43 = vld [vmem:[%s3737_s8 + $0x8] sm:$0xff]  }
  0x3e   : > { %v701_v62 = vmul.f32 %v3799_v52, %v3799_v52  ;;  %v685_v63 = vmul.f32 %v3801_v53, %v3801_v53  ;;  %v3815_v0 = vmax.f32 %v2824_v54, 0.0  ;;  %v3817_v1 = vmax.f32 %v2792_v55, 0.0 }
  0x3f   : > { %v786_v2 = vsel %vm483_vm0, %v702_v58, 0.0  ;;  %v738_v3 = vsel %vm483_vm0, %v686_v59, 0.0  ;;  %v2821_v4 = vunpack.c.h.bf16 %v2863_v60  ;;  %v2789_v5 = vunpack.c.h.bf16 %v2855_v61 }
  0x40   : > { %796 = vadd.xlane.f32.xlu0 %v795_v34  ;;  %748 = vadd.xlane.f32.xlu1 %v747_v35  ;;  %v783_v6 = vsel %vm483_vm0, %v701_v62, 0.0  ;;  %v735_v7 = vsel %vm483_vm0, %v685_v63, 0.0  ;;  %v700_v8 = vmul.f32 %v3815_v0, %v3815_v0  ;;  %v684_v9 = vmul.f32 %v3817_v1, %v3817_v1 }
  0x41   : > { %v3827_v16 = vmax.f32 %v2821_v4, 0.0  ;;  %v3829_v17 = vmax.f32 %v2789_v5, 0.0  ;;  %v2820_v18 = vunpack.c.l.bf16 %v2863_v60  ;;  %v2788_v19 = vunpack.c.l.bf16 %v2855_v61 }
  0x42   : > { %v780_v22 = vsel %vm483_vm0, %v700_v8, 0.0  ;;  %v732_v23 = vsel %vm483_vm0, %v684_v9, 0.0  ;;  %v2817_v24 = vunpack.c.h.bf16 %v2862_v20  ;;  %v2785_v25 = vunpack.c.h.bf16 %v2854_v21 }
  0x43   : > { %v699_v26 = vmul.f32 %v3827_v16, %v3827_v16  ;;  %v683_v27 = vmul.f32 %v3829_v17, %v3829_v17  ;;  %v3839_v30 = vmax.f32 %v2820_v18, 0.0  ;;  %v3841_v31 = vmax.f32 %v2788_v19, 0.0 }
  0x44   : > { %793 = vadd.xlane.f32.xlu0 %v792_v44  ;;  %745 = vadd.xlane.f32.xlu1 %v744_v45  ;;  %v3843_v32 = vmax.f32 %v2817_v24, 0.0  ;;  %v3845_v33 = vmax.f32 %v2785_v25, 0.0  ;;  %v2816_v34 = vunpack.c.l.bf16 %v2862_v20  ;;  %v2784_v35 = vunpack.c.l.bf16 %v2854_v21 }
  0x45   : > { %v777_v36 = vsel %vm483_vm0, %v699_v26, 0.0  ;;  %v729_v37 = vsel %vm483_vm0, %v683_v27, 0.0  ;;  %v698_v40 = vmul.f32 %v3839_v30, %v3839_v30  ;;  %v682_v41 = vmul.f32 %v3841_v31, %v3841_v31 }
  0x46   : > { %v697_v44 = vmul.f32 %v3843_v32, %v3843_v32  ;;  %v681_v45 = vmul.f32 %v3845_v33, %v3845_v33  ;;  %v3859_v46 = vmax.f32 %v2816_v34, 0.0  ;;  %v3861_v47 = vmax.f32 %v2784_v35, 0.0  ;;  %v2711_v34 = vld [vmem:[%s3892_s24] sm:$0xff]  }
  0x47   : > { %v774_v48 = vsel %vm483_vm0, %v698_v40, 0.0  ;;  %v726_v49 = vsel %vm483_vm0, %v682_v41, 0.0  ;;  %v2813_v54 = vunpack.c.h.bf16 %v2861_v42  ;;  %v2781_v55 = vunpack.c.h.bf16 %v2853_v43  ;;  %v2845_v35 = vld [vmem:[%s3892_s24 + $0x40] sm:$0xff]  }
  0x48   : > { %790 = vadd.xlane.f32.xlu0 %v789_v56  ;;  %742 = vadd.xlane.f32.xlu1 %v741_v57  ;;  %v771_v56 = vsel %vm483_vm0, %v697_v44, 0.0  ;;  %v723_v57 = vsel %vm483_vm0, %v681_v45, 0.0  ;;  %v696_v58 = vmul.f32 %v3859_v46, %v3859_v46  ;;  %v680_v59 = vmul.f32 %v3861_v47, %v3861_v47 }
  0x49   : > { %v3871_v60 = vmax.f32 %v2813_v54, 0.0  ;;  %v3873_v61 = vmax.f32 %v2781_v55, 0.0  ;;  %v2812_v62 = vunpack.c.l.bf16 %v2861_v42  ;;  %v2780_v63 = vunpack.c.l.bf16 %v2853_v43 }
  0x4a   : > { %v768_v4 = vsel %vm483_vm0, %v696_v58, 0.0  ;;  %v720_v5 = vsel %vm483_vm0, %v680_v59, 0.0  ;;  %v2712_v40 = vunpack.c.l.bf16 %v2711_v34  ;;  %v2744_v41 = vunpack.c.l.bf16 %v2845_v35 }
  0x4b   : > { %v695_v8 = vmul.f32 %v3871_v60, %v3871_v60  ;;  %v679_v9 = vmul.f32 %v3873_v61, %v3873_v61  ;;  %v3883_v18 = vmax.f32 %v2812_v62, 0.0  ;;  %v3885_v19 = vmax.f32 %v2780_v63, 0.0  ;;  %v2838_v62 = vld [vmem:[%s3892_s24 + $0x8] sm:$0xff]  }
  0x4c   : > { %787 = vadd.xlane.f32.xlu0 %v786_v2  ;;  %739 = vadd.xlane.f32.xlu1 %v738_v3  ;;  %v2860_v2 = vld [vmem:[%s3737_s8 + $0x40] sm:$0xff]   ;;  %v2713_v54 = vunpack.c.h.bf16 %v2711_v34  ;;  %v2745_v55 = vunpack.c.h.bf16 %v2845_v35  ;;  %v3922_v58 = vmax.f32 %v2712_v40, 0.0  ;;  %v3924_v59 = vmax.f32 %v2744_v41, 0.0  ;;  %v2846_v63 = vld [vmem:[%s3892_s24 + $0x48] sm:$0xff]   ;;  %v2839_v40 = vld [vmem:[%s3892_s24 + $0x10] sm:$0xff]  }
  0x4d   : > { %v2775_v3 = vld [vmem:[%s3737_s8] sm:$0xff]   ;;  %v765_v24 = vsel %vm483_vm0, %v695_v8, 0.0  ;;  %v717_v25 = vsel %vm483_vm0, %v679_v9, 0.0  ;;  %v694_v26 = vmul.f32 %v3883_v18, %v3883_v18  ;;  %v678_v27 = vmul.f32 %v3885_v19, %v3885_v19  ;;  %v2847_v41 = vld [vmem:[%s3892_s24 + $0x50] sm:$0xff]  }
  0x4e   : > { %v3934_v8 = vmax.f32 %v2713_v54, 0.0  ;;  %v3936_v9 = vmax.f32 %v2745_v55, 0.0  ;;  %v2720_v54 = vunpack.c.l.bf16 %v2839_v40  ;;  %v2752_v55 = vunpack.c.l.bf16 %v2847_v41 }
  0x4f   : > { %v762_v42 = vsel %vm483_vm0, %v694_v26, 0.0  ;;  %v714_v43 = vsel %vm483_vm0, %v678_v27, 0.0 }
  0x50   : > { %784 = vadd.xlane.f32.xlu0 %v783_v6  ;;  %736 = vadd.xlane.f32.xlu1 %v735_v7  ;;  %v2809_v6 = vunpack.c.h.bf16 %v2860_v2  ;;  %v2777_v7 = vunpack.c.h.bf16 %v2775_v3  ;;  %v452_v34 = vmul.f32 %v3934_v8, %v3934_v8  ;;  %v468_v35 = vmul.f32 %v3936_v9, %v3936_v9 }
  0x52   : > { %v3894_v20 = vmax.f32 %v2809_v6, 0.0  ;;  %v3896_v21 = vmax.f32 %v2777_v7, 0.0  ;;  %v451_v6 = vmul.f32 %v3922_v58, %v3922_v58  ;;  %v467_v7 = vmul.f32 %v3924_v59, %v3924_v59 }
  0x54   : > { %781 = vadd.xlane.f32.xlu0 %v780_v22  ;;  %733 = vadd.xlane.f32.xlu1 %v732_v23  ;;  %v2808_v22 = vunpack.c.l.bf16 %v2860_v2  ;;  %v2776_v23 = vunpack.c.l.bf16 %v2775_v3  ;;  %v693_v44 = vmul.f32 %v3894_v20, %v3894_v20  ;;  %v677_v45 = vmul.f32 %v3896_v21, %v3896_v21 }
  0x55   : > { %v484_v26 = vsel %vm483_vm0, %v451_v6, 0.0  ;;  %v532_v27 = vsel %vm483_vm0, %v467_v7, 0.0  ;;  %v2840_v6 = vld [vmem:[%s3892_s24 + $0x18] sm:$0xff]  }
  0x56   : > { %v2848_v7 = vld [vmem:[%s3892_s24 + $0x58] sm:$0xff]  }
  0x58   : > { %778 = vadd.xlane.f32.xlu0 %v777_v36  ;;  %730 = vadd.xlane.f32.xlu1 %v729_v37  ;;  %v3906_v36 = vmax.f32 %v2808_v22, 0.0  ;;  %v3908_v37 = vmax.f32 %v2776_v23, 0.0 }
  0x5c   : > { %775 = vadd.xlane.f32.xlu0 %v774_v48  ;;  %727 = vadd.xlane.f32.xlu1 %v726_v49  ;;  %v692_v48 = vmul.f32 %v3906_v36, %v3906_v36  ;;  %v676_v49 = vmul.f32 %v3908_v37, %v3908_v37 }
  0x5e   : > { %v756_v2 = vsel %vm483_vm0, %v692_v48, 0.0  ;;  %v708_v3 = vsel %vm483_vm0, %v676_v49, 0.0  ;;  %v487_v48 = vsel %vm483_vm0, %v452_v34, 0.0  ;;  %v535_v49 = vsel %vm483_vm0, %v468_v35, 0.0 }
  0x60   : > { %772 = vadd.xlane.f32.xlu0 %v771_v56  ;;  %724 = vadd.xlane.f32.xlu1 %v723_v57  ;;  %v759_v56 = vsel %vm483_vm0, %v693_v44, 0.0  ;;  %v711_v57 = vsel %vm483_vm0, %v677_v45, 0.0 }
  0x64   : > { %769 = vadd.xlane.f32.xlu0 %v768_v4  ;;  %721 = vadd.xlane.f32.xlu1 %v720_v5  ;;  %v2716_v4 = vunpack.c.l.bf16 %v2838_v62  ;;  %v2748_v5 = vunpack.c.l.bf16 %v2846_v63 }
  0x66   : > { %v3938_v22 = vmax.f32 %v2716_v4, 0.0  ;;  %v3940_v23 = vmax.f32 %v2748_v5, 0.0  ;;  %v2721_v4 = vunpack.c.h.bf16 %v2839_v40  ;;  %v2753_v5 = vunpack.c.h.bf16 %v2847_v41 }
  0x68   : > { %766 = vadd.xlane.f32.xlu0 %v765_v24  ;;  %718 = vadd.xlane.f32.xlu1 %v717_v25  ;;  %v2717_v24 = vunpack.c.h.bf16 %v2838_v62  ;;  %v2749_v25 = vunpack.c.h.bf16 %v2846_v63  ;;  %v3978_v40 = vmax.f32 %v2721_v4, 0.0  ;;  %v3980_v41 = vmax.f32 %v2753_v5, 0.0 }
  0x6a   : > { %v3954_v44 = vmax.f32 %v2717_v24, 0.0  ;;  %v3956_v45 = vmax.f32 %v2749_v25, 0.0 }
  0x6c   : > { %763 = vadd.xlane.f32.xlu0 %v762_v42  ;;  %715 = vadd.xlane.f32.xlu1 %v714_v43  ;;  %v453_v42 = vmul.f32 %v3938_v22, %v3938_v22  ;;  %v469_v43 = vmul.f32 %v3940_v23, %v3940_v23  ;;  %v454_v62 = vmul.f32 %v3954_v44, %v3954_v44 }
  0x6d   : > { %v470_v63 = vmul.f32 %v3956_v45, %v3956_v45 }
  0x6e   : > { %v493_v24 = vsel %vm483_vm0, %v454_v62, 0.0  ;;  %v2841_v62 = vld [vmem:[%s3892_s24 + $0x20] sm:$0xff]  }
  0x6f   : > { %v541_v25 = vsel %vm483_vm0, %v470_v63, 0.0  ;;  %v2849_v63 = vld [vmem:[%s3892_s24 + $0x60] sm:$0xff]  }
  0x70   : > { %760 = vadd.xlane.f32.xlu0 %v759_v56  ;;  %712 = vadd.xlane.f32.xlu1 %v711_v57  ;;  %v490_v56 = vsel %vm483_vm0, %v453_v42, 0.0  ;;  %v538_v57 = vsel %vm483_vm0, %v469_v43, 0.0 }
  0x74   : > { %757 = vadd.xlane.f32.xlu0 %v756_v2  ;;  %709 = vadd.xlane.f32.xlu1 %v708_v3  ;;  %v3966_v2 = vmax.f32 %v2720_v54, 0.0  ;;  %v3968_v3 = vmax.f32 %v2752_v55, 0.0 }
  0x76   : > { %v455_v34 = vmul.f32 %v3966_v2, %v3966_v2  ;;  %v471_v35 = vmul.f32 %v3968_v3, %v3968_v3 }
  0x78   : > { %485 = vadd.xlane.f32.xlu0 %v484_v26  ;;  %533 = vadd.xlane.f32.xlu1 %v532_v27  ;;  %v2724_v26 = vunpack.c.l.bf16 %v2840_v6  ;;  %v2756_v27 = vunpack.c.l.bf16 %v2848_v7  ;;  %v496_v54 = vsel %vm483_vm0, %v455_v34, 0.0  ;;  %v544_v55 = vsel %vm483_vm0, %v471_v35, 0.0 }
  0x7a   : > { %v3982_v42 = vmax.f32 %v2724_v26, 0.0  ;;  %v3984_v43 = vmax.f32 %v2756_v27, 0.0  ;;  %v2728_v26 = vunpack.c.l.bf16 %v2841_v62  ;;  %v2760_v27 = vunpack.c.l.bf16 %v2849_v63 }
  0x7c   : > { %488 = vadd.xlane.f32.xlu0 %v487_v48  ;;  %536 = vadd.xlane.f32.xlu1 %v535_v49  ;;  %5592 = vst [vmem:[#allocation8_spill] sm:$0xff] %v3982_v42  ;;  %5593 = vst [vmem:[#allocation9_spill] sm:$0xff] %v3984_v43  ;;  %v2725_v48 = vunpack.c.h.bf16 %v2840_v6  ;;  %v2757_v49 = vunpack.c.h.bf16 %v2848_v7  ;;  %v457_v4 = vmul.f32 %v3982_v42, %v3982_v42  ;;  %v2850_v42 = vld [vmem:[%s3892_s24 + $0x68] sm:$0xff]  }
  0x7d   : > { %v473_v5 = vmul.f32 %v3984_v43, %v3984_v43  ;;  %v2842_v43 = vld [vmem:[%s3892_s24 + $0x28] sm:$0xff]  }
  0x7e   : > { %v3998_v6 = vmax.f32 %v2725_v48, 0.0  ;;  %v4000_v7 = vmax.f32 %v2757_v49, 0.0  ;;  %v502_v34 = vsel %vm483_vm0, %v457_v4, 0.0 }
  0x7f   : > { %v550_v35 = vsel %vm483_vm0, %v473_v5, 0.0 }
  0x80   : > { %491 = vadd.xlane.f32.xlu0 %v490_v56  ;;  %539 = vadd.xlane.f32.xlu1 %v538_v57  ;;  %v456_v56 = vmul.f32 %v3978_v40, %v3978_v40  ;;  %v472_v57 = vmul.f32 %v3980_v41, %v3980_v41  ;;  %5594 = vst [vmem:[#allocation10_spill] sm:$0xff] %v3998_v6  ;;  %5595 = vst [vmem:[#allocation11_spill] sm:$0xff] %v4000_v7 }
  0x81   : > { %v458_v48 = vmul.f32 %v3998_v6, %v3998_v6  ;;  %v474_v49 = vmul.f32 %v4000_v7, %v4000_v7 }
  0x83   : > { %v505_v4 = vsel %vm483_vm0, %v458_v48, 0.0  ;;  %v553_v5 = vsel %vm483_vm0, %v474_v49, 0.0  ;;  %v2733_v48 = vunpack.c.h.bf16 %v2842_v43  ;;  %v2765_v49 = vunpack.c.h.bf16 %v2850_v42 }
  0x84   : > { %494 = vadd.xlane.f32.xlu0 %v493_v24  ;;  %542 = vadd.xlane.f32.xlu1 %v541_v25  ;;  %v499_v24 = vsel %vm483_vm0, %v456_v56, 0.0  ;;  %v547_v25 = vsel %vm483_vm0, %v472_v57, 0.0  ;;  %v2729_v56 = vunpack.c.h.bf16 %v2841_v62  ;;  %v2761_v57 = vunpack.c.h.bf16 %v2849_v63 }
  0x86   : > { %v4022_v62 = vmax.f32 %v2729_v56, 0.0  ;;  %v4024_v63 = vmax.f32 %v2761_v57, 0.0  ;;  %v2843_v57 = vld [vmem:[%s3892_s24 + $0x30] sm:$0xff]  }
  0x88   : > { %497 = vadd.xlane.f32.xlu0 %v496_v54  ;;  %545 = vadd.xlane.f32.xlu1 %v544_v55  ;;  %v4010_v54 = vmax.f32 %v2728_v26, 0.0  ;;  %v4012_v55 = vmax.f32 %v2760_v27, 0.0  ;;  %5598 = vst [vmem:[#allocation14_spill] sm:$0xff] %v4022_v62  ;;  %5599 = vst [vmem:[#allocation15_spill] sm:$0xff] %v4024_v63  ;;  %v476_v56 = vmul.f32 %v4024_v63, %v4024_v63  ;;  %v2844_v63 = vld [vmem:[%s3892_s24 + $0x38] sm:$0xff]  }
  0x8a   : > { %5596 = vst [vmem:[#allocation12_spill] sm:$0xff] %v4010_v54  ;;  %5597 = vst [vmem:[#allocation13_spill] sm:$0xff] %v4012_v55  ;;  %v459_v26 = vmul.f32 %v4010_v54, %v4010_v54  ;;  %v475_v27 = vmul.f32 %v4012_v55, %v4012_v55  ;;  %v460_v54 = vmul.f32 %v4022_v62, %v4022_v62  ;;  %v2851_v55 = vld [vmem:[%s3892_s24 + $0x70] sm:$0xff]   ;;  %v2852_v62 = vld [vmem:[%s3892_s24 + $0x78] sm:$0xff]   ;;  %s242_s24 = sand.u32 1, %s3567_s16  }
  0x8b   : > { %s2633_s27 = sshll.u32 %s242_s24, 9  ;;  %s5395_s13 = scalar_lea.sflag [#allocation4], %s242_s24 }
  0x8c   : > { %500 = vadd.xlane.f32.xlu0 %v499_v24  ;;  %548 = vadd.xlane.f32.xlu1 %v547_v25  ;;  %v2732_v24 = vunpack.c.l.bf16 %v2842_v43  ;;  %v2764_v25 = vunpack.c.l.bf16 %v2850_v42  ;;  %v508_v7 = vsel %vm483_vm0, %v459_v26, 0.0  ;;  %v556_v6 = vsel %vm483_vm0, %v475_v27, 0.0  ;;  %s5255_s28 = scalar_lea.vmem [#allocation5], %s2633_s27  ;;  %s3501_s27 = scalar_lea.vmem %s3500_s23, 16384 }
  0x8d   : > { %v4042_v43 = vmax.f32 %v2733_v48, 0.0  ;;  %v2736_v26 = vunpack.c.l.bf16 %v2843_v57  ;;  %v2768_v27 = vunpack.c.l.bf16 %v2851_v55  ;;  %s2517_s10 = sshll.u32 %s5255_s28, 4  ;;  %s5382_s10 = int_to_ptr.vmem [resolvable:$true] %s2517_s10 }
  0x8e   : > { %s3495_s8 = scalar_lea.vmem %s5382_s10, 8192  ;;  %p3502_p2 = scmp.lt.s32.totalorder %s5382_s10, %s3500_s23 }
  0x8f   : > { %5602 = vst [vmem:[#allocation18_spill] sm:$0xff] %v4042_v43  ;;  %v462_v48 = vmul.f32 %v4042_v43, %v4042_v43  ;;  %p3496_p10 = scmp.ne.s32.totalorder %s5382_s10, %s3495_s8  ;;  %p3503_p4 = scmp.lt.s32.totalorder %s3501_s27, %s3495_s8 }
  0x90   : > { %503 = vadd.xlane.f32.xlu0 %v502_v34  ;;  %551 = vadd.xlane.f32.xlu1 %v550_v35  ;;  %v4026_v34 = vmax.f32 %v2732_v24, 0.0  ;;  %v4028_v35 = vmax.f32 %v2764_v25, 0.0  ;;  %v511_v24 = vsel %vm483_vm0, %v460_v54, 0.0  ;;  %v559_v25 = vsel %vm483_vm0, %v476_v56, 0.0 }
  0x91   : > { %v2737_v54 = vunpack.c.h.bf16 %v2843_v57  ;;  %v2769_v56 = vunpack.c.h.bf16 %v2851_v55  ;;  %p3497_p12 = pnand %p3496_p10, %p3677_p3  ;;  %p3504_p5 = por %p3503_p4, %p3502_p2 }
  0x92   : > { %5600 = vst [vmem:[#allocation16_spill] sm:$0xff] %v4026_v34  ;;  %5601 = vst [vmem:[#allocation17_spill] sm:$0xff] %v4028_v35  ;;  %v477_v42 = vmul.f32 %v4028_v35, %v4028_v35  ;;  %v4054_v35 = vmax.f32 %v2736_v26, 0.0 }
  0x93   : > { %v4068_v57 = vmax.f32 %v2769_v56, 0.0  ;;  %p3498_p0 = pneg %p3497_p12 }
  0x94   : > { %506 = vadd.xlane.f32.xlu0 %v505_v4  ;;  %554 = vadd.xlane.f32.xlu1 %v553_v5  ;;  %v461_v4 = vmul.f32 %v4026_v34, %v4026_v34  ;;  %v4044_v5 = vmax.f32 %v2765_v49, 0.0  ;;  %5604 = vst [vmem:[#allocation20_spill] sm:$0xff] %v4054_v35  ;;  %v4056_v34 = vmax.f32 %v2768_v27, 0.0  ;;  %v463_v43 = vmul.f32 %v4054_v35, %v4054_v35 }
  0x95   : > { %v4066_v27 = vmax.f32 %v2737_v54, 0.0  ;;  %v480_v54 = vmul.f32 %v4068_v57, %v4068_v57  ;;  %p3505_p6 = pnand %p3504_p5, %p3498_p0 }
  0x96   : > { %5603 = vst [vmem:[#allocation19_spill] sm:$0xff] %v4044_v5  ;;  %v478_v49 = vmul.f32 %v4044_v5, %v4044_v5  ;;  %v479_v26 = vmul.f32 %v4056_v34, %v4056_v34 }
  0x97   : > { %v464_v35 = vmul.f32 %v4066_v27, %v4066_v27 }
  0x98   : > { %509 = vadd.xlane.f32.xlu0 %v508_v7  ;;  %557 = vadd.xlane.f32.xlu1 %v556_v6  ;;  %v514_v6 = vsel %vm483_vm0, %v461_v4, 0.0  ;;  %v562_v7 = vsel %vm483_vm0, %v477_v42, 0.0  ;;  %v517_v4 = vsel %vm483_vm0, %v462_v48, 0.0  ;;  %v565_v42 = vsel %vm483_vm0, %v478_v49, 0.0 }
  0x99   : > { %v2773_v48 = vunpack.c.h.bf16 %v2852_v62  ;;  %v520_v49 = vsel %vm483_vm0, %v463_v43, 0.0  ;;  %v568_v5 = vsel %vm483_vm0, %v479_v26, 0.0 }
  0x9c   : > { %512 = vadd.xlane.f32.xlu0 %v511_v24  ;;  %560 = vadd.xlane.f32.xlu1 %v559_v25  ;;  %v2740_v24 = vunpack.c.l.bf16 %v2844_v63  ;;  %v2772_v25 = vunpack.c.l.bf16 %v2852_v62  ;;  %v571_v62 = vsel %vm483_vm0, %v480_v54, 0.0 }
  0x9e   : > { %v4070_v55 = vmax.f32 %v2740_v24, 0.0 }
  0xa0   : > { %515 = vadd.xlane.f32.xlu0 %v514_v6  ;;  %563 = vadd.xlane.f32.xlu1 %v562_v7  ;;  %v4072_v6 = vmax.f32 %v2772_v25, 0.0  ;;  %v2741_v7 = vunpack.c.h.bf16 %v2844_v63  ;;  %v465_v56 = vmul.f32 %v4070_v55, %v4070_v55  ;;  %v523_v63 = vsel %vm483_vm0, %v464_v35, 0.0 }
  0xa2   : > { %5605 = vst [vmem:[#allocation21_spill] sm:$0xff] %v4072_v6  ;;  %v481_v43 = vmul.f32 %v4072_v6, %v4072_v6  ;;  %v526_v24 = vsel %vm483_vm0, %v465_v56, 0.0 }
  0xa4   : > { %518 = vadd.xlane.f32.xlu0 %v517_v4  ;;  %566 = vadd.xlane.f32.xlu1 %v565_v42  ;;  %v4082_v4 = vmax.f32 %v2741_v7, 0.0  ;;  %v4088_v42 = vmax.f32 %v2773_v48, 0.0 }
  0xa6   : > { %5606 = vst [vmem:[#allocation22_spill] sm:$0xff] %v4082_v4  ;;  %5607 = vst [vmem:[#allocation23_spill] sm:$0xff] %v4088_v42  ;;  %v466_v25 = vmul.f32 %v4082_v4, %v4082_v4  ;;  %v482_v26 = vmul.f32 %v4088_v42, %v4088_v42 }
  0xa8   : > { %521 = vadd.xlane.f32.xlu0 %v520_v49  ;;  %569 = vadd.xlane.f32.xlu1 %v568_v5  ;;  %v574_v5 = vsel %vm483_vm0, %v481_v43, 0.0  ;;  %v529_v35 = vsel %vm483_vm0, %v466_v25, 0.0  ;;  %v577_v7 = vsel %vm483_vm0, %v482_v26, 0.0 }
  0xac   : > { %524 = vadd.xlane.f32.xlu0 %v523_v63  ;;  %572 = vadd.xlane.f32.xlu1 %v571_v62 }
  0xb0   : > { %527 = vadd.xlane.f32.xlu0 %v526_v24  ;;  %575 = vadd.xlane.f32.xlu1 %v574_v5 }
  0xb4   : > { %530 = vadd.xlane.f32.xlu0 %v529_v35  ;;  %578 = vadd.xlane.f32.xlu1 %v577_v7 }
  0xc1   : > { %v803_v48 = vpop.xlane.xlu0 %802  ;;  %v800_v49 = vpop.xlane.xlu1 %799 }
  0xc2   : > { %v835_v54 = vmax.f32 %v803_v48, 1e-24  ;;  %v834_v56 = vmax.f32 %v800_v49, 1e-24 }
  0xc4   : > { %3085 = vrsqrt.f32 %v835_v54 }
  0xc5   : > { %3087 = vrsqrt.f32 %v834_v56  ;;  %v755_v63 = vpop.xlane.xlu0 %754  ;;  %v752_v62 = vpop.xlane.xlu1 %751 }
  0xc6   : > { %v819_v43 = vmax.f32 %v755_v63, 1e-24  ;;  %v818_v4 = vmax.f32 %v752_v62, 1e-24 }
  0xc8   : > { %3089 = vrsqrt.f32 %v819_v43 }
  0xc9   : > { %3091 = vrsqrt.f32 %v818_v4  ;;  %v797_v24 = vpop.xlane.xlu0 %796  ;;  %v749_v5 = vpop.xlane.xlu1 %748 }
  0xca   : > { %v833_v42 = vmax.f32 %v797_v24, 1e-24  ;;  %v817_v25 = vmax.f32 %v749_v5, 1e-24 }
  0xcc   : > { %3093 = vrsqrt.f32 %v833_v42 }
  0xcd   : > { %3095 = vrsqrt.f32 %v817_v25  ;;  %v794_v26 = vpop.xlane.xlu0 %793  ;;  %v746_v35 = vpop.xlane.xlu1 %745 }
  0xce   : > { %v832_v7 = vmax.f32 %v794_v26, 1e-24  ;;  %v816_v6 = vmax.f32 %v746_v35, 1e-24 }
  0xd0   : > { %3097 = vrsqrt.f32 %v832_v7 }
  0xd1   : > { %v3086_v48 = vpop.eup %3085  ;;  %3099 = vrsqrt.f32 %v816_v6  ;;  %v791_v49 = vpop.xlane.xlu0 %790 }
  0xd2   : > { %v743_v54 = vpop.xlane.xlu1 %742  ;;  %v3088_v56 = vpop.eup %3087  ;;  %v831_v63 = vmax.f32 %v791_v49, 1e-24  ;;  %v899_v62 = vmul.f32 %v3086_v48, %v3743_v10 }
  0xd3   : > { %v815_v4 = vmax.f32 %v743_v54, 1e-24  ;;  %v898_v5 = vmul.f32 %v3088_v56, %v3745_v11 }
  0xd4   : > { %3101 = vrsqrt.f32 %v831_v63  ;;  %2868 = vmatprep.subr.msk.mxu0 %vm483_vm0, %v899_v62  ;;  %2964 = vmatprep.subr.msk.mxu1 %vm483_vm0, %v899_v62 }
  0xd5   : > { %v3090_v42 = vpop.eup %3089  ;;  %3103 = vrsqrt.f32 %v815_v4  ;;  %v788_v43 = vpop.xlane.xlu0 %787 }
  0xd6   : > { %v740_v24 = vpop.xlane.xlu1 %739  ;;  %v3092_v25 = vpop.eup %3091  ;;  %v830_v6 = vmax.f32 %v788_v43, 1e-24  ;;  %v883_v26 = vmul.f32 %v3090_v42, %v3747_v12 }
  0xd7   : > { %v814_v35 = vmax.f32 %v740_v24, 1e-24  ;;  %v882_v10 = vmul.f32 %v3092_v25, %v3749_v13 }
  0xd8   : > { %3105 = vrsqrt.f32 %v830_v6  ;;  %2869 = vmatpush3.xpose.msk.msra.mxu0 %vm483_vm0, %v883_v26  ;;  %2980 = vmatpush3.xpose.msk.msra.mxu1 %vm483_vm0, %v883_v26 }
  0xd9   : > { %v3094_v7 = vpop.eup %3093  ;;  %3107 = vrsqrt.f32 %v814_v35  ;;  %2870 = vmatprep.subr.msk.mxu0 %vm483_vm0, %v898_v5  ;;  %2965 = vmatprep.subr.msk.mxu1 %vm483_vm0, %v898_v5  ;;  %v785_v48 = vpop.xlane.xlu0 %784 }
  0xda   : > { %v737_v11 = vpop.xlane.xlu1 %736  ;;  %v3096_v49 = vpop.eup %3095  ;;  %v829_v54 = vmax.f32 %v785_v48, 1e-24  ;;  %v897_v12 = vmul.f32 %v3094_v7, %v3751_v14 }
  0xdb   : > { %v813_v56 = vmax.f32 %v737_v11, 1e-24  ;;  %v881_v13 = vmul.f32 %v3096_v49, %v3753_v15 }
  0xdc   : > { %3109 = vrsqrt.f32 %v829_v54  ;;  %2871 = vmatpush3.xpose.msk.msra.mxu0 %vm483_vm0, %v882_v10  ;;  %2981 = vmatpush3.xpose.msk.msra.mxu1 %vm483_vm0, %v882_v10 }
  0xdd   : > { %v3098_v63 = vpop.eup %3097  ;;  %3111 = vrsqrt.f32 %v813_v56  ;;  %2872 = vmatprep.subr.msk.mxu0 %vm483_vm0, %v897_v12  ;;  %2966 = vmatprep.subr.msk.mxu1 %vm483_vm0, %v897_v12  ;;  %v782_v62 = vpop.xlane.xlu0 %781 }
  0xde   : > { %v734_v4 = vpop.xlane.xlu1 %733  ;;  %v3100_v42 = vpop.eup %3099  ;;  %v828_v43 = vmax.f32 %v782_v62, 1e-24  ;;  %v896_v14 = vmul.f32 %v3098_v63, %v3771_v28 }
  0xdf   : > { %v812_v24 = vmax.f32 %v734_v4, 1e-24  ;;  %v880_v15 = vmul.f32 %v3100_v42, %v3773_v29 }
  0xe0   : > { %3113 = vrsqrt.f32 %v828_v43  ;;  %2873 = vmatpush3.xpose.msk.msra.mxu0 %vm483_vm0, %v881_v13  ;;  %2982 = vmatpush3.xpose.msk.msra.mxu1 %vm483_vm0, %v881_v13 }
  0xe1   : > { %v3102_v5 = vpop.eup %3101  ;;  %3115 = vrsqrt.f32 %v812_v24  ;;  %2874 = vmatprep.subr.msk.mxu0 %vm483_vm0, %v896_v14  ;;  %2967 = vmatprep.subr.msk.mxu1 %vm483_vm0, %v896_v14  ;;  %v779_v25 = vpop.xlane.xlu0 %778 }
  0xe2   : > { %v731_v6 = vpop.xlane.xlu1 %730  ;;  %v3104_v26 = vpop.eup %3103  ;;  %v827_v35 = vmax.f32 %v779_v25, 1e-24  ;;  %v895_v28 = vmul.f32 %v3102_v5, %v3783_v38 }
  0xe3   : > { %v811_v10 = vmax.f32 %v731_v6, 1e-24  ;;  %v879_v29 = vmul.f32 %v3104_v26, %v3785_v39 }
  0xe4   : > { %3117 = vrsqrt.f32 %v827_v35  ;;  %2875 = vmatpush3.xpose.msk.msra.mxu0 %vm483_vm0, %v880_v15  ;;  %2983 = vmatpush3.xpose.msk.msra.mxu1 %vm483_vm0, %v880_v15 }
  0xe5   : > { %v3106_v7 = vpop.eup %3105  ;;  %3119 = vrsqrt.f32 %v811_v10  ;;  %2876 = vmatprep.subr.msk.mxu0 %vm483_vm0, %v895_v28  ;;  %2968 = vmatprep.subr.msk.mxu1 %vm483_vm0, %v895_v28  ;;  %v776_v48 = vpop.xlane.xlu0 %775 }
  0xe6   : > { %v728_v11 = vpop.xlane.xlu1 %727  ;;  %v3108_v49 = vpop.eup %3107  ;;  %v826_v54 = vmax.f32 %v776_v48, 1e-24  ;;  %v894_v38 = vmul.f32 %v3106_v7, %v3795_v50 }
  0xe7   : > { %v810_v56 = vmax.f32 %v728_v11, 1e-24  ;;  %v878_v39 = vmul.f32 %v3108_v49, %v3797_v51 }
  0xe8   : > { %3121 = vrsqrt.f32 %v826_v54  ;;  %2877 = vmatpush3.xpose.msk.msra.mxu0 %vm483_vm0, %v879_v29  ;;  %2984 = vmatpush3.xpose.msk.msra.mxu1 %vm483_vm0, %v879_v29 }
  0xe9   : > { %v3110_v12 = vpop.eup %3109  ;;  %3123 = vrsqrt.f32 %v810_v56  ;;  %2878 = vmatprep.subr.msk.mxu0 %vm483_vm0, %v894_v38  ;;  %2969 = vmatprep.subr.msk.mxu1 %vm483_vm0, %v894_v38  ;;  %v773_v13 = vpop.xlane.xlu0 %772 }
  0xea   : > { %v725_v63 = vpop.xlane.xlu1 %724  ;;  %v3112_v62 = vpop.eup %3111  ;;  %v825_v4 = vmax.f32 %v773_v13, 1e-24  ;;  %v893_v50 = vmul.f32 %v3110_v12, %v3799_v52 }
  0xeb   : > { %v809_v42 = vmax.f32 %v725_v63, 1e-24  ;;  %v877_v51 = vmul.f32 %v3112_v62, %v3801_v53 }
  0xec   : > { %3125 = vrsqrt.f32 %v825_v4  ;;  %2879 = vmatpush3.xpose.msk.msra.mxu0 %vm483_vm0, %v878_v39  ;;  %2985 = vmatpush3.xpose.msk.msra.mxu1 %vm483_vm0, %v878_v39 }
  0xed   : > { %v3114_v43 = vpop.eup %3113  ;;  %3127 = vrsqrt.f32 %v809_v42  ;;  %2880 = vmatprep.subr.msk.mxu0 %vm483_vm0, %v893_v50  ;;  %2970 = vmatprep.subr.msk.mxu1 %vm483_vm0, %v893_v50  ;;  %v770_v24 = vpop.xlane.xlu0 %769 }
  0xee   : > { %v722_v14 = vpop.xlane.xlu1 %721  ;;  %v3116_v15 = vpop.eup %3115  ;;  %v824_v5 = vmax.f32 %v770_v24, 1e-24  ;;  %v892_v52 = vmul.f32 %v3114_v43, %v3815_v0 }
  0xef   : > { %v808_v25 = vmax.f32 %v722_v14, 1e-24  ;;  %v876_v53 = vmul.f32 %v3116_v15, %v3817_v1 }
  0xf0   : > { %3129 = vrsqrt.f32 %v824_v5  ;;  %2881 = vmatpush3.xpose.msk.msra.mxu0 %vm483_vm0, %v877_v51  ;;  %2986 = vmatpush3.xpose.msk.msra.mxu1 %vm483_vm0, %v877_v51 }
  0xf1   : > { %v3118_v6 = vpop.eup %3117  ;;  %3131 = vrsqrt.f32 %v808_v25  ;;  %2882 = vmatprep.subr.msk.mxu0 %vm483_vm0, %v892_v52  ;;  %2971 = vmatprep.subr.msk.mxu1 %vm483_vm0, %v892_v52  ;;  %v767_v26 = vpop.xlane.xlu0 %766 }
  0xf2   : > { %v719_v35 = vpop.xlane.xlu1 %718  ;;  %v3120_v10 = vpop.eup %3119  ;;  %v823_v28 = vmax.f32 %v767_v26, 1e-24  ;;  %v891_v0 = vmul.f32 %v3118_v6, %v3827_v16 }
  0xf3   : > { %v807_v29 = vmax.f32 %v719_v35, 1e-24  ;;  %v875_v1 = vmul.f32 %v3120_v10, %v3829_v17 }
  0xf4   : > { %3133 = vrsqrt.f32 %v823_v28  ;;  %2883 = vmatpush3.xpose.msk.msra.mxu0 %vm483_vm0, %v876_v53  ;;  %2987 = vmatpush3.xpose.msk.msra.mxu1 %vm483_vm0, %v876_v53 }
  0xf5   : > { %v3122_v7 = vpop.eup %3121  ;;  %3135 = vrsqrt.f32 %v807_v29  ;;  %2884 = vmatprep.subr.msk.mxu0 %vm483_vm0, %v891_v0  ;;  %2972 = vmatprep.subr.msk.mxu1 %vm483_vm0, %v891_v0  ;;  %v764_v48 = vpop.xlane.xlu0 %763 }
  0xf6   : > { %v716_v11 = vpop.xlane.xlu1 %715  ;;  %v3124_v49 = vpop.eup %3123  ;;  %v822_v54 = vmax.f32 %v764_v48, 1e-24  ;;  %v890_v16 = vmul.f32 %v3122_v7, %v3839_v30 }
  0xf7   : > { %v806_v56 = vmax.f32 %v716_v11, 1e-24  ;;  %v874_v17 = vmul.f32 %v3124_v49, %v3841_v31 }
  0xf8   : > { %3137 = vrsqrt.f32 %v822_v54  ;;  %2885 = vmatpush3.xpose.msk.msra.mxu0 %vm483_vm0, %v875_v1  ;;  %2988 = vmatpush3.xpose.msk.msra.mxu1 %vm483_vm0, %v875_v1 }
  0xf9   : > { %v3126_v38 = vpop.eup %3125  ;;  %3139 = vrsqrt.f32 %v806_v56  ;;  %2886 = vmatprep.subr.msk.mxu0 %vm483_vm0, %v890_v16  ;;  %2973 = vmatprep.subr.msk.mxu1 %vm483_vm0, %v890_v16  ;;  %v761_v39 = vpop.xlane.xlu0 %760 }
  0xfa   : > { %v713_v12 = vpop.xlane.xlu1 %712  ;;  %v3128_v13 = vpop.eup %3127  ;;  %v821_v63 = vmax.f32 %v761_v39, 1e-24  ;;  %v889_v30 = vmul.f32 %v3126_v38, %v3843_v32 }
  0xfb   : > { %v805_v62 = vmax.f32 %v713_v12, 1e-24  ;;  %v873_v31 = vmul.f32 %v3128_v13, %v3845_v33 }
  0xfc   : > { %3141 = vrsqrt.f32 %v821_v63  ;;  %2887 = vmatpush3.xpose.msk.msra.mxu0 %vm483_vm0, %v874_v17  ;;  %2989 = vmatpush3.xpose.msk.msra.mxu1 %vm483_vm0, %v874_v17 }
  0xfd   : > { %v3130_v4 = vpop.eup %3129  ;;  %3143 = vrsqrt.f32 %v805_v62  ;;  %2888 = vmatprep.subr.msk.mxu0 %vm483_vm0, %v889_v30  ;;  %2974 = vmatprep.subr.msk.mxu1 %vm483_vm0, %v889_v30  ;;  %v758_v42 = vpop.xlane.xlu0 %757 }
  0xfe   : > { %v710_v50 = vpop.xlane.xlu1 %709  ;;  %v3132_v51 = vpop.eup %3131  ;;  %v820_v43 = vmax.f32 %v758_v42, 1e-24  ;;  %v888_v32 = vmul.f32 %v3130_v4, %v3859_v46 }
  0xff   : > { %v804_v24 = vmax.f32 %v710_v50, 1e-24  ;;  %v872_v33 = vmul.f32 %v3132_v51, %v3861_v47 }
 0x100   : > { %3145 = vrsqrt.f32 %v820_v43  ;;  %2889 = vmatpush3.xpose.msk.msra.mxu0 %vm483_vm0, %v873_v31  ;;  %2990 = vmatpush3.xpose.msk.msra.mxu1 %vm483_vm0, %v873_v31 }
 0x101   : > { %v3134_v14 = vpop.eup %3133  ;;  %3147 = vrsqrt.f32 %v804_v24  ;;  %2890 = vmatprep.subr.msk.mxu0 %vm483_vm0, %v888_v32  ;;  %2975 = vmatprep.subr.msk.mxu1 %vm483_vm0, %v888_v32  ;;  %v486_v15 = vpop.xlane.xlu0 %485 }
 0x102   : > { %v534_v5 = vpop.xlane.xlu1 %533  ;;  %v3136_v25 = vpop.eup %3135  ;;  %v580_v52 = vmax.f32 %v486_v15, 1e-24  ;;  %v887_v46 = vmul.f32 %v3134_v14, %v3871_v60 }
 0x103   : > { %v596_v53 = vmax.f32 %v534_v5, 1e-24  ;;  %v871_v47 = vmul.f32 %v3136_v25, %v3873_v61 }
 0x104   : > { %3149 = vrsqrt.f32 %v580_v52  ;;  %2891 = vmatpush3.xpose.msk.msra.mxu0 %vm483_vm0, %v872_v33  ;;  %2991 = vmatpush3.xpose.msk.msra.mxu1 %vm483_vm0, %v872_v33 }
 0x105   : > { %v3138_v6 = vpop.eup %3137  ;;  %3151 = vrsqrt.f32 %v596_v53  ;;  %2892 = vmatprep.subr.msk.mxu0 %vm483_vm0, %v887_v46  ;;  %2976 = vmatprep.subr.msk.mxu1 %vm483_vm0, %v887_v46  ;;  %v489_v26 = vpop.xlane.xlu0 %488 }
 0x106   : > { %v537_v35 = vpop.xlane.xlu1 %536  ;;  %v3140_v10 = vpop.eup %3139  ;;  %v581_v28 = vmax.f32 %v489_v26, 1e-24  ;;  %v886_v29 = vmul.f32 %v3138_v6, %v3883_v18 }
 0x107   : > { %v597_v60 = vmax.f32 %v537_v35, 1e-24  ;;  %v870_v61 = vmul.f32 %v3140_v10, %v3885_v19 }
 0x108   : > { %3153 = vrsqrt.f32 %v581_v28  ;;  %2893 = vmatpush3.xpose.msk.msra.mxu0 %vm483_vm0, %v871_v47  ;;  %2992 = vmatpush3.xpose.msk.msra.mxu1 %vm483_vm0, %v871_v47 }
 0x109   : > { %v3142_v0 = vpop.eup %3141  ;;  %2894 = vmatprep.subr.msk.mxu0 %vm483_vm0, %v886_v29  ;;  %2977 = vmatprep.subr.msk.mxu1 %vm483_vm0, %v886_v29  ;;  %3155 = vrsqrt.f32 %v597_v60  ;;  %v492_v1 = vpop.xlane.xlu0 %491 }
 0x10a   : > { %v540_v7 = vpop.xlane.xlu1 %539  ;;  %v3144_v48 = vpop.eup %3143  ;;  %v582_v11 = vmax.f32 %v492_v1, 1e-24  ;;  %v885_v18 = vmul.f32 %v3142_v0, %v3894_v20 }
 0x10b   : > { %v598_v49 = vmax.f32 %v540_v7, 1e-24  ;;  %v869_v19 = vmul.f32 %v3144_v48, %v3896_v21 }
 0x10c   : > { %3157 = vrsqrt.f32 %v582_v11  ;;  %2895 = vmatpush3.xpose.msk.msra.mxu0 %vm483_vm0, %v870_v61  ;;  %2993 = vmatpush3.xpose.msk.msra.mxu1 %vm483_vm0, %v870_v61 }
 0x10d   : > { %v3146_v54 = vpop.eup %3145  ;;  %2896 = vmatprep.subr.msk.mxu0 %vm483_vm0, %v885_v18  ;;  %2978 = vmatprep.subr.msk.mxu1 %vm483_vm0, %v885_v18  ;;  %3159 = vrsqrt.f32 %v598_v49  ;;  %v495_v56 = vpop.xlane.xlu0 %494 }
 0x10e   : > { %v543_v16 = vpop.xlane.xlu1 %542  ;;  %v3148_v17 = vpop.eup %3147  ;;  %v583_v38 = vmax.f32 %v495_v56, 1e-24  ;;  %v884_v20 = vmul.f32 %v3146_v54, %v3906_v36 }
 0x10f   : > { %v599_v39 = vmax.f32 %v543_v16, 1e-24  ;;  %v868_v21 = vmul.f32 %v3148_v17, %v3908_v37  ;;  %v5608_v17 = vld [vmem:[#allocation8_spill] sm:$0xff] }
 0x110   : > { %3161 = vrsqrt.f32 %v583_v38  ;;  %2897 = vmatpush3.xpose.msk.msra.mxu0 %vm483_vm0, %v869_v19  ;;  %2994 = vmatpush3.xpose.msk.msra.mxu1 %vm483_vm0, %v869_v19 }
 0x111   : > { %v3150_v12 = vpop.eup %3149  ;;  %2898 = vmatprep.subr.msk.mxu0 %vm483_vm0, %v884_v20  ;;  %2979 = vmatprep.subr.msk.mxu1 %vm483_vm0, %v884_v20  ;;  %3163 = vrsqrt.f32 %v599_v39  ;;  %v498_v13 = vpop.xlane.xlu0 %497  ;;  %v5609_v20 = vld [vmem:[#allocation9_spill] sm:$0xff] }
 0x112   : > { %v546_v63 = vpop.xlane.xlu1 %545  ;;  %v3152_v62 = vpop.eup %3151  ;;  %v584_v30 = vmax.f32 %v498_v13, 1e-24  ;;  %v644_v36 = vmul.f32 %v3150_v12, %v3922_v58 }
 0x113   : > { %v600_v31 = vmax.f32 %v546_v63, 1e-24  ;;  %v660_v4 = vmul.f32 %v3152_v62, %v3924_v59  ;;  %v5610_v62 = vld [vmem:[#allocation10_spill] sm:$0xff] }
 0x114   : > { %3165 = vrsqrt.f32 %v584_v30  ;;  %2899 = vmatpush3.xpose.msk.msra.mxu0 %vm483_vm0, %v868_v21  ;;  %2995 = vmatpush3.xpose.msk.msra.mxu1 %vm483_vm0, %v868_v21 }
 0x115   : > { %v3154_v37 = vpop.eup %3153  ;;  %2900 = vmatprep.mubr.msk.f32.mxu0 %vm483_vm0, %v644_v36  ;;  %2932 = vmatprep.mubr.msk.f32.mxu1 %vm483_vm0, %v660_v4  ;;  %3167 = vrsqrt.f32 %v600_v31  ;;  %v501_v42 = vpop.xlane.xlu0 %500  ;;  %v5611_v31 = vld [vmem:[#allocation11_spill] sm:$0xff] }
 0x116   : > { %v549_v50 = vpop.xlane.xlu1 %548  ;;  %v3156_v51 = vpop.eup %3155  ;;  %v585_v43 = vmax.f32 %v501_v42, 1e-24  ;;  %v645_v58 = vmul.f32 %v3154_v37, %v3934_v8 }
 0x117   : > { %v601_v24 = vmax.f32 %v549_v50, 1e-24  ;;  %2901 = vmatmul.mubr.msk.f32.vlgmr.msra.gmra.mxu0 %vm483_vm0, %v644_v36  ;;  %2933 = vmatmul.mubr.msk.f32.vlgmr.msra.gmra.mxu1 %vm483_vm0, %v660_v4  ;;  %v661_v59 = vmul.f32 %v3156_v51, %v3936_v9 }
 0x118   : > { %3169 = vrsqrt.f32 %v585_v43  ;;  %2902 = vmatprep.mubr.msk.f32.mxu0 %vm483_vm0, %v645_v58 }
 0x119   : > { %v3158_v32 = vpop.eup %3157  ;;  %3171 = vrsqrt.f32 %v601_v24  ;;  %v504_v33 = vpop.xlane.xlu0 %503  ;;  %2934 = vmatprep.mubr.msk.f32.mxu1 %vm483_vm0, %v661_v59 }
 0x11a   : > { %v552_v14 = vpop.xlane.xlu1 %551  ;;  %v3160_v15 = vpop.eup %3159  ;;  %v586_v5 = vmax.f32 %v504_v33, 1e-24  ;;  %v646_v8 = vmul.f32 %v3158_v32, %v3938_v22  ;;  %v5613_v32 = vld [vmem:[#allocation13_spill] sm:$0xff] }
 0x11b   : > { %v602_v25 = vmax.f32 %v552_v14, 1e-24  ;;  %2903 = vmatmul.mubr.msk.f32.gmra.mxu0 %vm483_vm0, %v645_v58  ;;  %2935 = vmatmul.mubr.msk.f32.gmra.mxu1 %vm483_vm0, %v661_v59  ;;  %v662_v9 = vmul.f32 %v3160_v15, %v3940_v23  ;;  %v5612_v58 = vld [vmem:[#allocation12_spill] sm:$0xff] }
 0x11c   : > { %3173 = vrsqrt.f32 %v586_v5  ;;  %2904 = vmatprep.mubr.msk.f32.mxu0 %vm483_vm0, %v646_v8 }
 0x11d   : > { %v3162_v52 = vpop.eup %3161  ;;  %3175 = vrsqrt.f32 %v602_v25  ;;  %v507_v53 = vpop.xlane.xlu0 %506  ;;  %2936 = vmatprep.mubr.msk.f32.mxu1 %vm483_vm0, %v662_v9 }
 0x11e   : > { %v555_v46 = vpop.xlane.xlu1 %554  ;;  %v3164_v47 = vpop.eup %3163  ;;  %v587_v6 = vmax.f32 %v507_v53, 1e-24  ;;  %v647_v22 = vmul.f32 %v3162_v52, %v3954_v44 }
 0x11f   : > { %v603_v26 = vmax.f32 %v555_v46, 1e-24  ;;  %2905 = vmatmul.mubr.msk.f32.gmra.mxu0 %vm483_vm0, %v646_v8  ;;  %2937 = vmatmul.mubr.msk.f32.gmra.mxu1 %vm483_vm0, %v662_v9  ;;  %v663_v23 = vmul.f32 %v3164_v47, %v3956_v45  ;;  %v5614_v9 = vld [vmem:[#allocation14_spill] sm:$0xff]  ;;  %v5615_v46 = vld [vmem:[#allocation15_spill] sm:$0xff] }
 0x120   : > { %3177 = vrsqrt.f32 %v587_v6  ;;  %2906 = vmatprep.mubr.msk.f32.mxu0 %vm483_vm0, %v647_v22 }
 0x121   : > { %v3166_v35 = vpop.eup %3165  ;;  %3179 = vrsqrt.f32 %v603_v26  ;;  %v510_v10 = vpop.xlane.xlu0 %509  ;;  %2938 = vmatprep.mubr.msk.f32.mxu1 %vm483_vm0, %v663_v23 }
 0x122   : > { %v558_v28 = vpop.xlane.xlu1 %557  ;;  %v3168_v29 = vpop.eup %3167  ;;  %v588_v60 = vmax.f32 %v510_v10, 1e-24  ;;  %v648_v44 = vmul.f32 %v3166_v35, %v3966_v2  ;;  %v5616_v10 = vld [vmem:[#allocation16_spill] sm:$0xff] }
 0x123   : > { %v604_v61 = vmax.f32 %v558_v28, 1e-24  ;;  %2907 = vmatmul.mubr.msk.f32.gmra.mxu0 %vm483_vm0, %v647_v22  ;;  %2939 = vmatmul.mubr.msk.f32.gmra.mxu1 %vm483_vm0, %v663_v23  ;;  %v664_v45 = vmul.f32 %v3168_v29, %v3968_v3 }
 0x124   : > { %3181 = vrsqrt.f32 %v588_v60  ;;  %2908 = vmatprep.mubr.msk.f32.mxu0 %vm483_vm0, %v648_v44  ;;  %v5617_v60 = vld [vmem:[#allocation17_spill] sm:$0xff] }
 0x125   : > { %v3170_v0 = vpop.eup %3169  ;;  %3183 = vrsqrt.f32 %v604_v61  ;;  %v513_v1 = vpop.xlane.xlu0 %512  ;;  %2940 = vmatprep.mubr.msk.f32.mxu1 %vm483_vm0, %v664_v45 }
 0x126   : > { %v561_v7 = vpop.xlane.xlu1 %560  ;;  %v3172_v48 = vpop.eup %3171  ;;  %v589_v11 = vmax.f32 %v513_v1, 1e-24  ;;  %v649_v2 = vmul.f32 %v3170_v0, %v3978_v40 }
 0x127   : > { %v605_v18 = vmax.f32 %v561_v7, 1e-24  ;;  %2909 = vmatmul.mubr.msk.f32.gmra.mxu0 %vm483_vm0, %v648_v44  ;;  %2941 = vmatmul.mubr.msk.f32.gmra.mxu1 %vm483_vm0, %v664_v45  ;;  %v665_v3 = vmul.f32 %v3172_v48, %v3980_v41  ;;  %v5618_v48 = vld [vmem:[#allocation18_spill] sm:$0xff] }
 0x128   : > { %3185 = vrsqrt.f32 %v589_v11  ;;  %2910 = vmatprep.mubr.msk.f32.mxu0 %vm483_vm0, %v649_v2 }
 0x129   : > { %v3174_v49 = vpop.eup %3173  ;;  %3187 = vrsqrt.f32 %v605_v18  ;;  %v516_v19 = vpop.xlane.xlu0 %515  ;;  %2942 = vmatprep.mubr.msk.f32.mxu1 %vm483_vm0, %v665_v3  ;;  %v5619_v18 = vld [vmem:[#allocation19_spill] sm:$0xff] }
 0x12a   : > { %v564_v54 = vpop.xlane.xlu1 %563  ;;  %v3176_v56 = vpop.eup %3175  ;;  %v590_v16 = vmax.f32 %v516_v19, 1e-24  ;;  %v650_v40 = vmul.f32 %v3174_v49, %v5608_v17 }
 0x12b   : > { %v606_v38 = vmax.f32 %v564_v54, 1e-24  ;;  %2911 = vmatmul.mubr.msk.f32.gmra.mxu0 %vm483_vm0, %v649_v2  ;;  %2943 = vmatmul.mubr.msk.f32.gmra.mxu1 %vm483_vm0, %v665_v3  ;;  %v666_v41 = vmul.f32 %v3176_v56, %v5609_v20  ;;  %v5620_v54 = vld [vmem:[#allocation20_spill] sm:$0xff] }
 0x12c   : > { %3189 = vrsqrt.f32 %v590_v16  ;;  %2912 = vmatprep.mubr.msk.f32.mxu0 %vm483_vm0, %v650_v40 }
 0x12d   : > { %v3178_v39 = vpop.eup %3177  ;;  %3191 = vrsqrt.f32 %v606_v38  ;;  %v519_v21 = vpop.xlane.xlu0 %518  ;;  %2944 = vmatprep.mubr.msk.f32.mxu1 %vm483_vm0, %v666_v41 }
 0x12e   : > { %v567_v12 = vpop.xlane.xlu1 %566  ;;  %v3180_v13 = vpop.eup %3179  ;;  %v591_v63 = vmax.f32 %v519_v21, 1e-24  ;;  %v651_v30 = vmul.f32 %v3178_v39, %v5610_v62  ;;  %v5621_v21 = vld [vmem:[#allocation21_spill] sm:$0xff]  ;;  %v5623_v62 = vld [vmem:[#allocation23_spill] sm:$0xff] }
 0x12f   : > { %v607_v36 = vmax.f32 %v567_v12, 1e-24  ;;  %2913 = vmatmul.mubr.msk.f32.gmra.mxu0 %vm483_vm0, %v650_v40  ;;  %2945 = vmatmul.mubr.msk.f32.gmra.mxu1 %vm483_vm0, %v666_v41  ;;  %v667_v4 = vmul.f32 %v3180_v13, %v5611_v31  ;;  %v5622_v13 = vld [vmem:[#allocation22_spill] sm:$0xff] }
 0x130   : > { %3193 = vrsqrt.f32 %v591_v63  ;;  %2914 = vmatprep.mubr.msk.f32.mxu0 %vm483_vm0, %v651_v30 }
 0x131   : > { %v3182_v37 = vpop.eup %3181  ;;  %3195 = vrsqrt.f32 %v607_v36  ;;  %v522_v42 = vpop.xlane.xlu0 %521  ;;  %2946 = vmatprep.mubr.msk.f32.mxu1 %vm483_vm0, %v667_v4 }
 0x132   : > { %v570_v50 = vpop.xlane.xlu1 %569  ;;  %v3184_v51 = vpop.eup %3183  ;;  %v592_v43 = vmax.f32 %v522_v42, 1e-24  ;;  %v652_v24 = vmul.f32 %v3182_v37, %v5612_v58 }
 0x133   : > { %v608_v59 = vmax.f32 %v570_v50, 1e-24  ;;  %2915 = vmatmul.mubr.msk.f32.gmra.mxu0 %vm483_vm0, %v651_v30  ;;  %2947 = vmatmul.mubr.msk.f32.gmra.mxu1 %vm483_vm0, %v667_v4  ;;  %v668_v33 = vmul.f32 %v3184_v51, %v5613_v32  ;;  %v4290_v4 = vld [vmem:[#allocation2] sm:$0xff]  ;;  %v4292_v50 = vld [vmem:[#allocation2 + $0x8] sm:$0xff] }
 0x134   : > { %3197 = vrsqrt.f32 %v592_v43  ;;  %2916 = vmatprep.mubr.msk.f32.mxu0 %vm483_vm0, %v652_v24  ;;  %v4294_v43 = vld [vmem:[#allocation2 + $0x100] sm:$0xff] }
 0x135   : > { %v3186_v14 = vpop.eup %3185  ;;  %3199 = vrsqrt.f32 %v608_v59  ;;  %v525_v15 = vpop.xlane.xlu0 %524  ;;  %2948 = vmatprep.mubr.msk.f32.mxu1 %vm483_vm0, %v668_v33  ;;  %v4296_v59 = vld [vmem:[#allocation2 + $0x108] sm:$0xff] }
 0x136   : > { %v573_v5 = vpop.xlane.xlu1 %572  ;;  %v3188_v8 = vpop.eup %3187  ;;  %v593_v25 = vmax.f32 %v525_v15, 1e-24  ;;  %v653_v52 = vmul.f32 %v3186_v14, %v5614_v9 }
 0x137   : > { %v609_v53 = vmax.f32 %v573_v5, 1e-24  ;;  %2917 = vmatmul.mubr.msk.f32.gmra.mxu0 %vm483_vm0, %v652_v24  ;;  %2949 = vmatmul.mubr.msk.f32.gmra.mxu1 %vm483_vm0, %v668_v33  ;;  %v669_v47 = vmul.f32 %v3188_v8, %v5615_v46  ;;  %v4298_v33 = vld [vmem:[#allocation2 + $0x10] sm:$0xff] }
 0x138   : > { %3201 = vrsqrt.f32 %v593_v25  ;;  %2918 = vmatprep.mubr.msk.f32.mxu0 %vm483_vm0, %v653_v52  ;;  %v4311_v46 = vld [vmem:[#allocation2 + $0x110] sm:$0xff] }
 0x139   : > { %v3190_v6 = vpop.eup %3189  ;;  %3203 = vrsqrt.f32 %v609_v53  ;;  %v528_v22 = vpop.xlane.xlu0 %527  ;;  %2950 = vmatprep.mubr.msk.f32.mxu1 %vm483_vm0, %v669_v47  ;;  %v4309_v53 = vld [vmem:[#allocation2 + $0x18] sm:$0xff] }
 0x13a   : > { %v576_v26 = vpop.xlane.xlu1 %575  ;;  %v3192_v23 = vpop.eup %3191  ;;  %v594_v35 = vmax.f32 %v528_v22, 1e-24  ;;  %v654_v28 = vmul.f32 %v3190_v6, %v5616_v10 }
 0x13b   : > { %v610_v29 = vmax.f32 %v576_v26, 1e-24  ;;  %2919 = vmatmul.mubr.msk.f32.gmra.mxu0 %vm483_vm0, %v653_v52  ;;  %2951 = vmatmul.mubr.msk.f32.gmra.mxu1 %vm483_vm0, %v669_v47  ;;  %v670_v44 = vmul.f32 %v3192_v23, %v5617_v60 }
 0x13c   : > { %3205 = vrsqrt.f32 %v594_v35  ;;  %2920 = vmatprep.mubr.msk.f32.mxu0 %vm483_vm0, %v654_v28  ;;  %v4321_v35 = vld [vmem:[#allocation2 + $0x118] sm:$0xff] }
 0x13d   : > { %v3194_v61 = vpop.eup %3193  ;;  %3207 = vrsqrt.f32 %v610_v29  ;;  %v531_v45 = vpop.xlane.xlu0 %530  ;;  %2952 = vmatprep.mubr.msk.f32.mxu1 %vm483_vm0, %v670_v44 }
 0x13e   : > { %v579_v0 = vpop.xlane.xlu1 %578  ;;  %v3196_v1 = vpop.eup %3195  ;;  %v595_v7 = vmax.f32 %v531_v45, 1e-24  ;;  %v655_v11 = vmul.f32 %v3194_v61, %v5618_v48  ;;  %v4333_v48 = vld [vmem:[#allocation2 + $0x28] sm:$0xff] }
 0x13f   : > { %v611_v2 = vmax.f32 %v579_v0, 1e-24  ;;  %2921 = vmatmul.mubr.msk.f32.gmra.mxu0 %vm483_vm0, %v654_v28  ;;  %2953 = vmatmul.mubr.msk.f32.gmra.mxu1 %vm483_vm0, %v670_v44  ;;  %v671_v3 = vmul.f32 %v3196_v1, %v5619_v18  ;;  %v4323_v28 = vld [vmem:[#allocation2 + $0x20] sm:$0xff] }
 0x140   : > { %3209 = vrsqrt.f32 %v595_v7  ;;  %2922 = vmatprep.mubr.msk.f32.mxu0 %vm483_vm0, %v655_v11  ;;  %v4331_v0 = vld [vmem:[#allocation2 + $0x120] sm:$0xff] }
 0x141   : > { %v3198_v49 = vpop.eup %3197  ;;  %3211 = vrsqrt.f32 %v611_v2  ;;  %2954 = vmatprep.mubr.msk.f32.mxu1 %vm483_vm0, %v671_v3  ;;  %5624 = vst [vmem:[#allocation8_spill] sm:$0xff] %v4331_v0 }
 0x142   : > { %v3200_v19 = vpop.eup %3199  ;;  %v656_v56 = vmul.f32 %v3198_v49, %v5620_v54  ;;  %v4345_v54 = vld [vmem:[#allocation2 + $0x128] sm:$0xff] }
 0x143   : > { %2923 = vmatmul.mubr.msk.f32.gmra.mxu0 %vm483_vm0, %v655_v11  ;;  %2955 = vmatmul.mubr.msk.f32.gmra.mxu1 %vm483_vm0, %v671_v3  ;;  %v672_v16 = vmul.f32 %v3200_v19, %v4056_v34  ;;  %5625 = vst [vmem:[#allocation9_spill] sm:$0xff] %v4345_v54 }
 0x144   : > { %2924 = vmatprep.mubr.msk.f32.mxu0 %vm483_vm0, %v656_v56 }
 0x145   : > { %v3202_v17 = vpop.eup %3201  ;;  %2956 = vmatprep.mubr.msk.f32.mxu1 %vm483_vm0, %v672_v16 }
 0x146   : > { %v3204_v40 = vpop.eup %3203  ;;  %v657_v38 = vmul.f32 %v3202_v17, %v4066_v27 }
 0x147   : > { %2925 = vmatmul.mubr.msk.f32.gmra.mxu0 %vm483_vm0, %v656_v56  ;;  %2957 = vmatmul.mubr.msk.f32.gmra.mxu1 %vm483_vm0, %v672_v16  ;;  %v673_v20 = vmul.f32 %v3204_v40, %v4068_v57  ;;  %v4347_v16 = vld [vmem:[#allocation2 + $0x30] sm:$0xff] }
 0x148   : > { %2926 = vmatprep.mubr.msk.f32.mxu0 %vm483_vm0, %v657_v38 }
 0x149   : > { %v3206_v41 = vpop.eup %3205  ;;  %2958 = vmatprep.mubr.msk.f32.mxu1 %vm483_vm0, %v673_v20 }
 0x14a   : > { %v3208_v34 = vpop.eup %3207  ;;  %v658_v39 = vmul.f32 %v3206_v41, %v4070_v55 }
 0x14b   : > { %2927 = vmatmul.mubr.msk.f32.gmra.mxu0 %vm483_vm0, %v657_v38  ;;  %2959 = vmatmul.mubr.msk.f32.gmra.mxu1 %vm483_vm0, %v673_v20  ;;  %v674_v27 = vmul.f32 %v3208_v34, %v5621_v21  ;;  %v4355_v34 = vld [vmem:[#allocation2 + $0x130] sm:$0xff] }
 0x14c   : > { %2928 = vmatprep.mubr.msk.f32.mxu0 %vm483_vm0, %v658_v39  ;;  %5626 = vst [vmem:[#allocation10_spill] sm:$0xff] %v4355_v34 }
 0x14d   : > { %v3210_v12 = vpop.eup %3209  ;;  %2960 = vmatprep.mubr.msk.f32.mxu1 %vm483_vm0, %v674_v27 }
 0x14e   : > { %v3212_v57 = vpop.eup %3211  ;;  %v659_v63 = vmul.f32 %v3210_v12, %v5622_v13  ;;  %v4359_v12 = vld [vmem:[#allocation2 + $0x38] sm:$0xff] }
 0x14f   : > { %2929 = vmatmul.mubr.msk.f32.gmra.mxu0 %vm483_vm0, %v658_v39  ;;  %2961 = vmatmul.mubr.msk.f32.gmra.mxu1 %vm483_vm0, %v674_v27  ;;  %v675_v55 = vmul.f32 %v3212_v57, %v5623_v62  ;;  %5627 = vst [vmem:[#allocation11_spill] sm:$0xff] %v4359_v12 }
 0x150   : > { %2930 = vmatprep.mubr.msk.f32.mxu0 %vm483_vm0, %v659_v63 }
 0x151   : > { %2962 = vmatprep.mubr.msk.f32.mxu1 %vm483_vm0, %v675_v55 }
 0x153   : > { %2931 = vmatmul.mubr.msk.f32.gmra.mxu0 %vm483_vm0, %v659_v63  ;;  %2963 = vmatmul.mubr.msk.f32.gmra.mxu1 %vm483_vm0, %v675_v55 }
 0x1d7   : > { %v1158_v30 = vpop.f32.mrf.mxu0  ;;  %v1254_v36 = vpop.f32.mrf.mxu1 }
 0x1d8   : > { %v1413_v31 = vmul.f32 512.0, %v1158_v30  ;;  %v1445_v37 = vmul.f32 512.0, %v1254_v36  ;;  %v4369_v30 = vld [vmem:[#allocation2 + $0x138] sm:$0xff] }
 0x1d9   : > { %v1160_v42 = vpop.f32.mrf.mxu0  ;;  %v1256_v51 = vpop.f32.mrf.mxu1  ;;  %5628 = vst [vmem:[#allocation12_spill] sm:$0xff] %v4369_v30 }
 0x1da   : > { %v1414_v58 = vmul.f32 512.0, %v1160_v42  ;;  %v1446_v24 = vmul.f32 512.0, %v1256_v51  ;;  %v4301_v15 = vmul.f32 %v1413_v31, %v4290_v4  ;;  %v4307_v9 = vmul.f32 %v1445_v37, %v4294_v43  ;;  %v4371_v31 = vld [vmem:[#allocation2 + $0x40] sm:$0xff] }
 0x1db   : > { %v1164_v32 = vpop.f32.mrf.mxu0  ;;  %v1260_v14 = vpop.f32.mrf.mxu1  ;;  %5629 = vst [vmem:[#allocation13_spill] sm:$0xff] %v4371_v31 }
 0x1dc   : > { %v4304_v5 = vmul.f32 %v1414_v58, %v4292_v50  ;;  %v1415_v8 = vmul.f32 512.0, %v1164_v32  ;;  %v1447_v25 = vmul.f32 512.0, %v1260_v14  ;;  %v4314_v6 = vmul.f32 %v1446_v24, %v4296_v59  ;;  %v4379_v32 = vld [vmem:[#allocation2 + $0x140] sm:$0xff] }
 0x1dd   : > { %v1166_v52 = vpop.f32.mrf.mxu0  ;;  %v1262_v47 = vpop.f32.mrf.mxu1  ;;  %5630 = vst [vmem:[#allocation14_spill] sm:$0xff] %v4379_v32 }
 0x1de   : > { %v4317_v22 = vmul.f32 %v1415_v8, %v4298_v33  ;;  %v1416_v26 = vmul.f32 512.0, %v1166_v52  ;;  %v1541_v23 = vmax.f32 %v4301_v15, %v4304_v5  ;;  %v1448_v29 = vmul.f32 512.0, %v1262_v47  ;;  %v4383_v52 = vld [vmem:[#allocation2 + $0x48] sm:$0xff] }
 0x1df   : > { %v1170_v10 = vpop.f32.mrf.mxu0  ;;  %v1266_v60 = vpop.f32.mrf.mxu1  ;;  %v4329_v45 = vmul.f32 %v1447_v25, %v4311_v46  ;;  %v1589_v49 = vmax.f32 %v4307_v9, %v4314_v6  ;;  %5631 = vst [vmem:[#allocation15_spill] sm:$0xff] %v4383_v52 }
 0x1e0   : > { %v4326_v44 = vmul.f32 %v1416_v26, %v4309_v53  ;;  %v1417_v61 = vmul.f32 512.0, %v1170_v10  ;;  %1542 = vmax.xlane.f32.xlu0 %v1541_v23  ;;  %v1449_v1 = vmul.f32 512.0, %v1266_v60  ;;  %v4336_v11 = vmul.f32 %v1448_v29, %v4321_v35  ;;  %v4393_v60 = vld [vmem:[#allocation2 + $0x148] sm:$0xff] }
 0x1e1   : > { %v1172_v7 = vpop.f32.mrf.mxu0  ;;  %v1268_v2 = vpop.f32.mrf.mxu1  ;;  %5632 = vst [vmem:[#allocation16_spill] sm:$0xff] %v4393_v60 }
 0x1e2   : > { %v4339_v18 = vmul.f32 %v1417_v61, %v4323_v28  ;;  %v1418_v3 = vmul.f32 512.0, %v1172_v7  ;;  %v1544_v19 = vmax.f32 %v4317_v22, %v4326_v44  ;;  %v4350_v17 = vmul.f32 %v1449_v1, %v4331_v0  ;;  %v4395_v1 = vld [vmem:[#allocation2 + $0x50] sm:$0xff] }
 0x1e3   : > { %v1176_v56 = vpop.f32.mrf.mxu0  ;;  %v1450_v40 = vmul.f32 512.0, %v1268_v2  ;;  %v1272_v38 = vpop.f32.mrf.mxu1  ;;  %v1592_v21 = vmax.f32 %v4329_v45, %v4336_v11  ;;  %5633 = vst [vmem:[#allocation17_spill] sm:$0xff] %v4395_v1 }
 0x1e4   : > { %v4353_v20 = vmul.f32 %v1418_v3, %v4333_v48  ;;  %v1419_v41 = vmul.f32 512.0, %v1176_v56  ;;  %1590 = vmax.xlane.f32.xlu0 %v1589_v49  ;;  %1545 = vmax.xlane.f32.xlu1 %v1544_v19  ;;  %v1451_v39 = vmul.f32 512.0, %v1272_v38  ;;  %v4403_v56 = vld [vmem:[#allocation2 + $0x150] sm:$0xff] }
 0x1e5   : > { %v1178_v27 = vpop.f32.mrf.mxu0  ;;  %v4362_v57 = vmul.f32 %v1450_v40, %v4345_v54  ;;  %v1274_v13 = vpop.f32.mrf.mxu1  ;;  %5634 = vst [vmem:[#allocation18_spill] sm:$0xff] %v4403_v56 }
 0x1e6   : > { %v4365_v63 = vmul.f32 %v1419_v41, %v4347_v16  ;;  %v1420_v62 = vmul.f32 512.0, %v1178_v27  ;;  %v1547_v55 = vmax.f32 %v4339_v18, %v4353_v20  ;;  %v4374_v37 = vmul.f32 %v1451_v39, %v4355_v34  ;;  %v4407_v39 = vld [vmem:[#allocation2 + $0x58] sm:$0xff] }
 0x1e7   : > { %v1182_v36 = vpop.f32.mrf.mxu0  ;;  %v1452_v42 = vmul.f32 512.0, %v1274_v13  ;;  %v1278_v51 = vpop.f32.mrf.mxu1  ;;  %v1595_v8 = vmax.f32 %v4350_v17, %v4362_v57  ;;  %5635 = vst [vmem:[#allocation19_spill] sm:$0xff] %v4407_v39 }
 0x1e8   : > { %v4377_v58 = vmul.f32 %v1420_v62, %v4359_v12  ;;  %v1421_v24 = vmul.f32 512.0, %v1182_v36  ;;  %1593 = vmax.xlane.f32.xlu1 %v1592_v21  ;;  %1548 = vmax.xlane.f32.xlu0 %v1547_v55  ;;  %v1453_v14 = vmul.f32 512.0, %v1278_v51  ;;  %v4417_v36 = vld [vmem:[#allocation2 + $0x158] sm:$0xff]  ;;  %v4419_v51 = vld [vmem:[#allocation2 + $0x60] sm:$0xff] }
 0x1e9   : > { %v1184_v25 = vpop.f32.mrf.mxu0  ;;  %v4386_v47 = vmul.f32 %v1452_v42, %v4369_v30  ;;  %v1280_v26 = vpop.f32.mrf.mxu1  ;;  %5636 = vst [vmem:[#allocation20_spill] sm:$0xff] %v4417_v36  ;;  %5637 = vst [vmem:[#allocation21_spill] sm:$0xff] %v4419_v51  ;;  %v4479_v30 = vld [vmem:[#allocation2 + $0x88] sm:$0xff]  ;;  %v4503_v12 = vld [vmem:[#allocation2 + $0x98] sm:$0xff] }
 0x1ea   : > { %v4389_v23 = vmul.f32 %v1421_v24, %v4371_v31  ;;  %v1422_v10 = vmul.f32 512.0, %v1184_v25  ;;  %v1550_v29 = vmax.f32 %v4365_v63, %v4377_v58  ;;  %v4398_v7 = vmul.f32 %v1453_v14, %v4379_v32  ;;  %5648 = vst [vmem:[#allocation32_spill] sm:$0xff] %v4479_v30  ;;  %5656 = vst [vmem:[#allocation40_spill] sm:$0xff] %v4503_v12 }
 0x1eb   : > { %v1188_v61 = vpop.f32.mrf.mxu0  ;;  %v1454_v2 = vmul.f32 512.0, %v1280_v26  ;;  %v1284_v3 = vpop.f32.mrf.mxu1  ;;  %v1598_v38 = vmax.f32 %v4374_v37, %v4386_v47 }
 0x1ec   : > { %v4401_v49 = vmul.f32 %v1422_v10, %v4383_v52  ;;  %v1423_v19 = vmul.f32 512.0, %v1188_v61  ;;  %1596 = vmax.xlane.f32.xlu0 %v1595_v8  ;;  %1551 = vmax.xlane.f32.xlu1 %v1550_v29  ;;  %v1455_v40 = vmul.f32 512.0, %v1284_v3  ;;  %v4427_v10 = vld [vmem:[#allocation2 + $0x160] sm:$0xff]  ;;  %v4431_v3 = vld [vmem:[#allocation2 + $0x68] sm:$0xff] }
 0x1ed   : > { %v1190_v41 = vpop.f32.mrf.mxu0  ;;  %v4410_v21 = vmul.f32 %v1454_v2, %v4393_v60  ;;  %v1286_v27 = vpop.f32.mrf.mxu1  ;;  %5638 = vst [vmem:[#allocation22_spill] sm:$0xff] %v4427_v10  ;;  %5639 = vst [vmem:[#allocation23_spill] sm:$0xff] %v4431_v3 }
 0x1ee   : > { %v4413_v13 = vmul.f32 %v1423_v19, %v4395_v1  ;;  %v1424_v62 = vmul.f32 512.0, %v1190_v41  ;;  %v1553_v55 = vmax.f32 %v4389_v23, %v4401_v49  ;;  %v4422_v24 = vmul.f32 %v1455_v40, %v4403_v56 }
 0x1ef   : > { %v1194_v42 = vpop.f32.mrf.mxu0  ;;  %v1456_v14 = vmul.f32 512.0, %v1286_v27  ;;  %v1290_v8 = vpop.f32.mrf.mxu1  ;;  %v1601_v61 = vmax.f32 %v4398_v7, %v4410_v21 }
 0x1f0   : > { %v4425_v25 = vmul.f32 %v1424_v62, %v4407_v39  ;;  %v1425_v26 = vmul.f32 512.0, %v1194_v42  ;;  %1599 = vmax.xlane.f32.xlu1 %v1598_v38  ;;  %1554 = vmax.xlane.f32.xlu0 %v1553_v55  ;;  %v1457_v29 = vmul.f32 512.0, %v1290_v8  ;;  %v4441_v62 = vld [vmem:[#allocation2 + $0x168] sm:$0xff]  ;;  %v4443_v42 = vld [vmem:[#allocation2 + $0x70] sm:$0xff]  ;;  %v4455_v39 = vld [vmem:[#allocation2 + $0x78] sm:$0xff] }
 0x1f1   : > { %v1196_v2 = vpop.f32.mrf.mxu0  ;;  %v4434_v19 = vmul.f32 %v1456_v14, %v4417_v36  ;;  %v1292_v40 = vpop.f32.mrf.mxu1  ;;  %5640 = vst [vmem:[#allocation24_spill] sm:$0xff] %v4441_v62  ;;  %5641 = vst [vmem:[#allocation25_spill] sm:$0xff] %v4443_v42 }
 0x1f2   : > { %v4437_v41 = vmul.f32 %v1425_v26, %v4419_v51  ;;  %v1426_v27 = vmul.f32 512.0, %v1196_v2  ;;  %v1556_v38 = vmax.f32 %v4413_v13, %v4425_v25  ;;  %v4446_v8 = vmul.f32 %v1457_v29, %v4427_v10  ;;  %v4451_v26 = vld [vmem:[#allocation2 + $0x170] sm:$0xff]  ;;  %5643 = vst [vmem:[#allocation27_spill] sm:$0xff] %v4455_v39 }
 0x1f3   : > { %v1200_v55 = vpop.f32.mrf.mxu0  ;;  %v1458_v56 = vmul.f32 512.0, %v1292_v40  ;;  %v1296_v60 = vpop.f32.mrf.mxu1  ;;  %5642 = vst [vmem:[#allocation26_spill] sm:$0xff] %v4451_v26  ;;  %v1604_v51 = vmax.f32 %v4422_v24, %v4434_v19 }
 0x1f4   : > { %v4449_v14 = vmul.f32 %v1426_v27, %v4431_v3  ;;  %v1427_v36 = vmul.f32 512.0, %v1200_v55  ;;  %1602 = vmax.xlane.f32.xlu0 %v1601_v61  ;;  %1557 = vmax.xlane.f32.xlu1 %v1556_v38  ;;  %v1459_v2 = vmul.f32 512.0, %v1296_v60  ;;  %v4465_v38 = vld [vmem:[#allocation2 + $0x178] sm:$0xff]  ;;  %v4467_v55 = vld [vmem:[#allocation2 + $0x80] sm:$0xff] }
 0x1f5   : > { %v1202_v32 = vpop.f32.mrf.mxu0  ;;  %v4458_v29 = vmul.f32 %v1458_v56, %v4441_v62  ;;  %v1298_v40 = vpop.f32.mrf.mxu1  ;;  %5644 = vst [vmem:[#allocation28_spill] sm:$0xff] %v4465_v38  ;;  %5645 = vst [vmem:[#allocation29_spill] sm:$0xff] %v4467_v55 }
 0x1f6   : > { %v4461_v10 = vmul.f32 %v1427_v36, %v4443_v42  ;;  %v1428_v27 = vmul.f32 512.0, %v1202_v32  ;;  %v1559_v61 = vmax.f32 %v4437_v41, %v4449_v14  ;;  %v4470_v3 = vmul.f32 %v1459_v2, %v4451_v26  ;;  %v4475_v32 = vld [vmem:[#allocation2 + $0x180] sm:$0xff] }
 0x1f7   : > { %v1206_v60 = vpop.f32.mrf.mxu0  ;;  %v1460_v1 = vmul.f32 512.0, %v1298_v40  ;;  %v1302_v52 = vpop.f32.mrf.mxu1  ;;  %5647 = vst [vmem:[#allocation31_spill] sm:$0xff] %v4475_v32  ;;  %v1607_v42 = vmax.f32 %v4446_v8, %v4458_v29 }
 0x1f8   : > { %5646 = vst [vmem:[#allocation30_spill] sm:$0xff] %v4470_v3  ;;  %v4473_v56 = vmul.f32 %v1428_v27, %v4455_v39  ;;  %v1429_v62 = vmul.f32 512.0, %v1206_v60  ;;  %1605 = vmax.xlane.f32.xlu1 %v1604_v51  ;;  %1560 = vmax.xlane.f32.xlu0 %v1559_v61  ;;  %v1461_v36 = vmul.f32 512.0, %v1302_v52  ;;  %v4489_v61 = vld [vmem:[#allocation2 + $0x188] sm:$0xff]  ;;  %v4491_v60 = vld [vmem:[#allocation2 + $0x90] sm:$0xff] }
 0x1f9   : > { %v1208_v31 = vpop.f32.mrf.mxu0  ;;  %v4482_v2 = vmul.f32 %v1460_v1, %v4465_v38  ;;  %v1304_v40 = vpop.f32.mrf.mxu1  ;;  %5651 = vst [vmem:[#allocation35_spill] sm:$0xff] %v4489_v61  ;;  %5652 = vst [vmem:[#allocation36_spill] sm:$0xff] %v4491_v60 }
 0x1fa   : > { %v4485_v26 = vmul.f32 %v1429_v62, %v4467_v55  ;;  %v1430_v27 = vmul.f32 512.0, %v1208_v31  ;;  %v1562_v51 = vmax.f32 %v4461_v10, %v4473_v56  ;;  %v4494_v39 = vmul.f32 %v1461_v36, %v4475_v32  ;;  %v4499_v31 = vld [vmem:[#allocation2 + $0x190] sm:$0xff] }
 0x1fb   : > { %5649 = vst [vmem:[#allocation33_spill] sm:$0xff] %v4482_v2  ;;  %v1212_v52 = vpop.f32.mrf.mxu0  ;;  %v1462_v34 = vmul.f32 512.0, %v1304_v40  ;;  %v1308_v54 = vpop.f32.mrf.mxu1  ;;  %5655 = vst [vmem:[#allocation39_spill] sm:$0xff] %v4499_v31  ;;  %v1610_v55 = vmax.f32 %v4470_v3, %v4482_v2 }
 0x1fc   : > { %5650 = vst [vmem:[#allocation34_spill] sm:$0xff] %v4485_v26  ;;  %5653 = vst [vmem:[#allocation37_spill] sm:$0xff] %v4494_v39  ;;  %v4497_v1 = vmul.f32 %v1430_v27, %v4479_v30  ;;  %v1431_v38 = vmul.f32 512.0, %v1212_v52  ;;  %1608 = vmax.xlane.f32.xlu0 %v1607_v42  ;;  %1563 = vmax.xlane.f32.xlu1 %v1562_v51  ;;  %v1463_v62 = vmul.f32 512.0, %v1308_v54  ;;  %v4513_v51 = vld [vmem:[#allocation2 + $0x198] sm:$0xff]  ;;  %v4515_v52 = vld [vmem:[#allocation2 + $0xa0] sm:$0xff] }
 0x1fd   : > { %v1214_v0 = vpop.f32.mrf.mxu0  ;;  %v4506_v36 = vmul.f32 %v1462_v34, %v4489_v61  ;;  %v1310_v40 = vpop.f32.mrf.mxu1  ;;  %5659 = vst [vmem:[#allocation43_spill] sm:$0xff] %v4513_v51  ;;  %5660 = vst [vmem:[#allocation44_spill] sm:$0xff] %v4515_v52 }
 0x1fe   : > { %5654 = vst [vmem:[#allocation38_spill] sm:$0xff] %v4497_v1  ;;  %v4509_v32 = vmul.f32 %v1431_v38, %v4491_v60  ;;  %v1432_v27 = vmul.f32 512.0, %v1214_v0  ;;  %v1565_v42 = vmax.f32 %v4485_v26, %v4497_v1  ;;  %v4518_v30 = vmul.f32 %v1463_v62, %v4499_v31  ;;  %v4523_v0 = vld [vmem:[#allocation2 + $0x1a0] sm:$0xff]  ;;  %v4527_v26 = vld [vmem:[#allocation2 + $0xa8] sm:$0xff] }
 0x1ff   : > { %5657 = vst [vmem:[#allocation41_spill] sm:$0xff] %v4506_v36  ;;  %v1218_v54 = vpop.f32.mrf.mxu0  ;;  %v1464_v2 = vmul.f32 512.0, %v1310_v40  ;;  %v1314_v3 = vpop.f32.mrf.mxu1  ;;  %5663 = vst [vmem:[#allocation47_spill] sm:$0xff] %v4523_v0  ;;  %v1613_v60 = vmax.f32 %v4494_v39, %v4506_v36 }
 0x200   : > { %5658 = vst [vmem:[#allocation42_spill] sm:$0xff] %v4509_v32  ;;  %5661 = vst [vmem:[#allocation45_spill] sm:$0xff] %v4518_v30  ;;  %v4521_v34 = vmul.f32 %v1432_v27, %v4503_v12  ;;  %v1433_v61 = vmul.f32 512.0, %v1218_v54  ;;  %1611 = vmax.xlane.f32.xlu1 %v1610_v55  ;;  %1566 = vmax.xlane.f32.xlu0 %v1565_v42  ;;  %v1465_v38 = vmul.f32 512.0, %v1314_v3  ;;  %v4537_v42 = vld [vmem:[#allocation2 + $0x1a8] sm:$0xff]  ;;  %v4539_v54 = vld [vmem:[#allocation2 + $0xb0] sm:$0xff] }
 0x201   : > { %v1220_v1 = vpop.f32.mrf.mxu0  ;;  %5664 = vst [vmem:[#allocation48_spill] sm:$0xff] %v4527_v26  ;;  %v4530_v62 = vmul.f32 %v1464_v2, %v4513_v51  ;;  %v1316_v40 = vpop.f32.mrf.mxu1  ;;  %5667 = vst [vmem:[#allocation51_spill] sm:$0xff] %v4537_v42 }
 0x202   : > { %5662 = vst [vmem:[#allocation46_spill] sm:$0xff] %v4521_v34  ;;  %v4533_v31 = vmul.f32 %v1433_v61, %v4515_v52  ;;  %v1434_v27 = vmul.f32 512.0, %v1220_v1  ;;  %v1568_v55 = vmax.f32 %v4509_v32, %v4521_v34  ;;  %5668 = vst [vmem:[#allocation52_spill] sm:$0xff] %v4539_v54  ;;  %v4542_v12 = vmul.f32 %v1465_v38, %v4523_v0  ;;  %v4547_v61 = vld [vmem:[#allocation2 + $0x1b0] sm:$0xff]  ;;  %v4551_v32 = vld [vmem:[#allocation2 + $0xb8] sm:$0xff] }
 0x203   : > { %5665 = vst [vmem:[#allocation49_spill] sm:$0xff] %v4530_v62  ;;  %v1224_v3 = vpop.f32.mrf.mxu0  ;;  %v1466_v36 = vmul.f32 512.0, %v1316_v40  ;;  %v1320_v39 = vpop.f32.mrf.mxu1  ;;  %5671 = vst [vmem:[#allocation55_spill] sm:$0xff] %v4547_v61  ;;  %v1616_v52 = vmax.f32 %v4518_v30, %v4530_v62 }
 0x204   : > { %5666 = vst [vmem:[#allocation50_spill] sm:$0xff] %v4533_v31  ;;  %5669 = vst [vmem:[#allocation53_spill] sm:$0xff] %v4542_v12  ;;  %v4545_v2 = vmul.f32 %v1434_v27, %v4527_v26  ;;  %v1435_v51 = vmul.f32 512.0, %v1224_v3  ;;  %1614 = vmax.xlane.f32.xlu0 %v1613_v60  ;;  %1569 = vmax.xlane.f32.xlu1 %v1568_v55  ;;  %v1467_v1 = vmul.f32 512.0, %v1320_v39  ;;  %v4561_v55 = vld [vmem:[#allocation2 + $0x1b8] sm:$0xff]  ;;  %v4563_v3 = vld [vmem:[#allocation2 + $0xc0] sm:$0xff] }
 0x205   : > { %v1226_v34 = vpop.f32.mrf.mxu0  ;;  %5672 = vst [vmem:[#allocation56_spill] sm:$0xff] %v4551_v32  ;;  %v4554_v38 = vmul.f32 %v1466_v36, %v4537_v42  ;;  %v1322_v40 = vpop.f32.mrf.mxu1  ;;  %5675 = vst [vmem:[#allocation59_spill] sm:$0xff] %v4561_v55 }
 0x206   : > { %5670 = vst [vmem:[#allocation54_spill] sm:$0xff] %v4545_v2  ;;  %v4557_v0 = vmul.f32 %v1435_v51, %v4539_v54  ;;  %v1436_v27 = vmul.f32 512.0, %v1226_v34  ;;  %v1571_v60 = vmax.f32 %v4533_v31, %v4545_v2  ;;  %5676 = vst [vmem:[#allocation60_spill] sm:$0xff] %v4563_v3  ;;  %v4566_v26 = vmul.f32 %v1467_v1, %v4547_v61  ;;  %v4571_v51 = vld [vmem:[#allocation2 + $0x1c0] sm:$0xff]  ;;  %v4575_v31 = vld [vmem:[#allocation2 + $0xc8] sm:$0xff] }
 0x207   : > { %5673 = vst [vmem:[#allocation57_spill] sm:$0xff] %v4554_v38  ;;  %v1230_v39 = vpop.f32.mrf.mxu0  ;;  %v1468_v62 = vmul.f32 512.0, %v1322_v40  ;;  %v1326_v30 = vpop.f32.mrf.mxu1  ;;  %5679 = vst [vmem:[#allocation63_spill] sm:$0xff] %v4571_v51  ;;  %v1619_v54 = vmax.f32 %v4542_v12, %v4554_v38 }
 0x208   : > { %5674 = vst [vmem:[#allocation58_spill] sm:$0xff] %v4557_v0  ;;  %5677 = vst [vmem:[#allocation61_spill] sm:$0xff] %v4566_v26  ;;  %v4569_v36 = vmul.f32 %v1436_v27, %v4551_v32  ;;  %v1437_v42 = vmul.f32 512.0, %v1230_v39  ;;  %1617 = vmax.xlane.f32.xlu1 %v1616_v52  ;;  %1572 = vmax.xlane.f32.xlu0 %v1571_v60  ;;  %v1469_v34 = vmul.f32 512.0, %v1326_v30  ;;  %v4585_v60 = vld [vmem:[#allocation2 + $0x1c8] sm:$0xff]  ;;  %v4587_v39 = vld [vmem:[#allocation2 + $0xd0] sm:$0xff] }
 0x209   : > { %v1232_v2 = vpop.f32.mrf.mxu0  ;;  %5680 = vst [vmem:[#allocation64_spill] sm:$0xff] %v4575_v31  ;;  %v4578_v1 = vmul.f32 %v1468_v62, %v4561_v55  ;;  %v1328_v40 = vpop.f32.mrf.mxu1  ;;  %5683 = vst [vmem:[#allocation67_spill] sm:$0xff] %v4585_v60 }
 0x20a   : > { %5678 = vst [vmem:[#allocation62_spill] sm:$0xff] %v4569_v36  ;;  %v4581_v61 = vmul.f32 %v1437_v42, %v4563_v3  ;;  %v1438_v27 = vmul.f32 512.0, %v1232_v2  ;;  %v1574_v52 = vmax.f32 %v4557_v0, %v4569_v36  ;;  %5684 = vst [vmem:[#allocation68_spill] sm:$0xff] %v4587_v39  ;;  %v4590_v32 = vmul.f32 %v1469_v34, %v4571_v51  ;;  %v4595_v42 = vld [vmem:[#allocation2 + $0x1d0] sm:$0xff]  ;;  %v4599_v0 = vld [vmem:[#allocation2 + $0xd8] sm:$0xff] }
 0x20b   : > { %5681 = vst [vmem:[#allocation65_spill] sm:$0xff] %v4578_v1  ;;  %v1236_v30 = vpop.f32.mrf.mxu0  ;;  %v1470_v38 = vmul.f32 512.0, %v1328_v40  ;;  %v1332_v12 = vpop.f32.mrf.mxu1  ;;  %5687 = vst [vmem:[#allocation71_spill] sm:$0xff] %v4595_v42  ;;  %v1622_v3 = vmax.f32 %v4566_v26, %v4578_v1 }
 0x20c   : > { %5682 = vst [vmem:[#allocation66_spill] sm:$0xff] %v4581_v61  ;;  %5685 = vst [vmem:[#allocation69_spill] sm:$0xff] %v4590_v32  ;;  %v4593_v62 = vmul.f32 %v1438_v27, %v4575_v31  ;;  %v1439_v55 = vmul.f32 512.0, %v1236_v30  ;;  %1620 = vmax.xlane.f32.xlu0 %v1619_v54  ;;  %1575 = vmax.xlane.f32.xlu1 %v1574_v52  ;;  %v1471_v2 = vmul.f32 512.0, %v1332_v12  ;;  %v4609_v52 = vld [vmem:[#allocation2 + $0x1d8] sm:$0xff]  ;;  %v4611_v30 = vld [vmem:[#allocation2 + $0xe0] sm:$0xff] }
 0x20d   : > { %v1238_v36 = vpop.f32.mrf.mxu0  ;;  %5688 = vst [vmem:[#allocation72_spill] sm:$0xff] %v4599_v0  ;;  %v4602_v34 = vmul.f32 %v1470_v38, %v4585_v60  ;;  %v1334_v40 = vpop.f32.mrf.mxu1  ;;  %5691 = vst [vmem:[#allocation75_spill] sm:$0xff] %v4609_v52 }
 0x20e   : > { %5686 = vst [vmem:[#allocation70_spill] sm:$0xff] %v4593_v62  ;;  %v4605_v51 = vmul.f32 %v1439_v55, %v4587_v39  ;;  %v1440_v27 = vmul.f32 512.0, %v1238_v36  ;;  %v1577_v54 = vmax.f32 %v4581_v61, %v4593_v62  ;;  %5692 = vst [vmem:[#allocation76_spill] sm:$0xff] %v4611_v30  ;;  %v4614_v31 = vmul.f32 %v1471_v2, %v4595_v42  ;;  %v4619_v55 = vld [vmem:[#allocation2 + $0x1e0] sm:$0xff]  ;;  %v4623_v61 = vld [vmem:[#allocation2 + $0xe8] sm:$0xff] }
 0x20f   : > { %5689 = vst [vmem:[#allocation73_spill] sm:$0xff] %v4602_v34  ;;  %v1242_v12 = vpop.f32.mrf.mxu0  ;;  %v1472_v1 = vmul.f32 512.0, %v1334_v40  ;;  %v1338_v26 = vpop.f32.mrf.mxu1  ;;  %5694 = vst [vmem:[#allocation78_spill] sm:$0xff] %v4619_v55  ;;  %v1625_v39 = vmax.f32 %v4590_v32, %v4602_v34 }
 0x210   : > { %5690 = vst [vmem:[#allocation74_spill] sm:$0xff] %v4605_v51  ;;  %v4617_v38 = vmul.f32 %v1440_v27, %v4599_v0  ;;  %v1441_v60 = vmul.f32 512.0, %v1242_v12  ;;  %1623 = vmax.xlane.f32.xlu1 %v1622_v3  ;;  %1578 = vmax.xlane.f32.xlu0 %v1577_v54  ;;  %v1473_v36 = vmul.f32 512.0, %v1338_v26  ;;  %5695 = vst [vmem:[#allocation79_spill] sm:$0xff] %v4623_v61  ;;  %v4633_v54 = vld [vmem:[#allocation2 + $0x1e8] sm:$0xff]  ;;  %v4635_v12 = vld [vmem:[#allocation2 + $0xf0] sm:$0xff] }
 0x211   : > { %v1244_v62 = vpop.f32.mrf.mxu0  ;;  %v4626_v2 = vmul.f32 %v1472_v1, %v4609_v52  ;;  %v1340_v40 = vpop.f32.mrf.mxu1  ;;  %5696 = vst [vmem:[#allocation80_spill] sm:$0xff] %v4633_v54 }
 0x212   : > { %5693 = vst [vmem:[#allocation77_spill] sm:$0xff] %v4617_v38  ;;  %v4629_v42 = vmul.f32 %v1441_v60, %v4611_v30  ;;  %v1442_v27 = vmul.f32 512.0, %v1244_v62  ;;  %v1580_v3 = vmax.f32 %v4605_v51, %v4617_v38  ;;  %v4638_v0 = vmul.f32 %v1473_v36, %v4619_v55  ;;  %v4645_v38 = vld [vmem:[#allocation2 + $0xf8] sm:$0xff]  ;;  %v4650_v36 = vld [vmem:[#allocation2 + $0x1f0] sm:$0xff] }
 0x213   : > { %v1248_v26 = vpop.f32.mrf.mxu0  ;;  %v1474_v34 = vmul.f32 512.0, %v1340_v40  ;;  %v1344_v32 = vpop.f32.mrf.mxu1  ;;  %v1628_v62 = vmax.f32 %v4614_v31, %v4626_v2  ;;  %5697 = vst [vmem:[#allocation81_spill] sm:$0xff] %v4645_v38  ;;  %5698 = vst [vmem:[#allocation82_spill] sm:$0xff] %v4650_v36 }
 0x214   : > { %v4641_v1 = vmul.f32 %v1442_v27, %v4623_v61  ;;  %v1443_v52 = vmul.f32 512.0, %v1248_v26  ;;  %1626 = vmax.xlane.f32.xlu0 %v1625_v39  ;;  %1581 = vmax.xlane.f32.xlu1 %v1580_v3  ;;  %v1475_v60 = vmul.f32 512.0, %v1344_v32  ;;  %v4657_v32 = vld [vmem:[#allocation2 + $0x1f8] sm:$0xff] }
 0x215   : > { %v1250_v30 = vpop.f32.mrf.mxu0  ;;  %v4648_v51 = vmul.f32 %v1474_v34, %v4633_v54  ;;  %v1346_v40 = vpop.f32.mrf.mxu1  ;;  %5699 = vst [vmem:[#allocation83_spill] sm:$0xff] %v4657_v32 }
 0x216   : > { %v4653_v55 = vmul.f32 %v1443_v52, %v4635_v12  ;;  %v1444_v27 = vmul.f32 512.0, %v1250_v30  ;;  %v1583_v39 = vmax.f32 %v4629_v42, %v4641_v1  ;;  %v1476_v3 = vmul.f32 512.0, %v1346_v40 }
 0x217   : > { %v4663_v61 = vmul.f32 %v1475_v60, %v4650_v36  ;;  %v1631_v34 = vmax.f32 %v4638_v0, %v4648_v51 }
 0x218   : > { %v4660_v26 = vmul.f32 %v1444_v27, %v4645_v38  ;;  %1629 = vmax.xlane.f32.xlu1 %v1628_v62  ;;  %1584 = vmax.xlane.f32.xlu0 %v1583_v39  ;;  %v4668_v52 = vmul.f32 %v1476_v3, %v4657_v32 }
 0x21a   : > { %v1586_v30 = vmax.f32 %v4653_v55, %v4660_v26  ;;  %v1634_v40 = vmax.f32 %v4663_v61, %v4668_v52 }
 0x21c   : > { %1632 = vmax.xlane.f32.xlu0 %v1631_v34  ;;  %1587 = vmax.xlane.f32.xlu1 %v1586_v30 }
 0x220   : > { %1635 = vmax.xlane.f32.xlu1 %v1634_v40 }
 0x269   : > { %v4674_v27 = vpop.xlane.xlu0 %1542 }
 0x26a   : > { %5700 = vst [vmem:[#allocation84_spill] sm:$0xff] %v4674_v27  ;;  %v1637_v60 = vsub.f32 %v4301_v15, %v4674_v27  ;;  %v1638_v62 = vsub.f32 %v4304_v5, %v4674_v27 }
 0x26c   : > { %v1701_v39 = vmul.f32 1.442695, %v1637_v60  ;;  %v1703_v36 = vmul.f32 1.442695, %v1638_v62 }
 0x26d   : > { %v4680_v3 = vpop.xlane.xlu1 %1545  ;;  %v4682_v32 = vpop.xlane.xlu0 %1590 }
 0x26e   : > { %v1639_v34 = vsub.f32 %v4317_v22, %v4680_v3  ;;  %v1640_v30 = vsub.f32 %v4326_v44, %v4680_v3  ;;  %v1669_v40 = vsub.f32 %v4307_v9, %v4682_v32  ;;  %v1670_v15 = vsub.f32 %v4314_v6, %v4682_v32 }
 0x26f   : > { %3213 = vpow2.f32 %v1701_v39 }
 0x270   : > { %v1705_v54 = vmul.f32 1.442695, %v1639_v34  ;;  %v1707_v5 = vmul.f32 1.442695, %v1640_v30  ;;  %3215 = vpow2.f32 %v1703_v36  ;;  %v1765_v62 = vmul.f32 1.442695, %v1669_v40 }
 0x271   : > { %v4692_v60 = vpop.xlane.xlu1 %1593  ;;  %v4694_v27 = vpop.xlane.xlu0 %1548  ;;  %v1767_v38 = vmul.f32 1.442695, %v1670_v15 }
 0x272   : > { %v1671_v22 = vsub.f32 %v4329_v45, %v4692_v60  ;;  %3217 = vpow2.f32 %v1705_v54  ;;  %v1672_v9 = vsub.f32 %v4336_v11, %v4692_v60  ;;  %v1641_v6 = vsub.f32 %v4339_v18, %v4694_v27 }
 0x273   : > { %3219 = vpow2.f32 %v1707_v5  ;;  %v1642_v36 = vsub.f32 %v4353_v20, %v4694_v27 }
 0x274   : > { %3221 = vpow2.f32 %v1765_v62  ;;  %v1769_v34 = vmul.f32 1.442695, %v1671_v22  ;;  %v1771_v30 = vmul.f32 1.442695, %v1672_v9  ;;  %v1709_v54 = vmul.f32 1.442695, %v1641_v6 }
 0x275   : > { %v4702_v44 = vpop.xlane.xlu1 %1551  ;;  %v4704_v39 = vpop.xlane.xlu0 %1596  ;;  %3223 = vpow2.f32 %v1767_v38  ;;  %v1711_v18 = vmul.f32 1.442695, %v1642_v36 }
 0x276   : > { %v1643_v45 = vsub.f32 %v4365_v63, %v4702_v44  ;;  %v1644_v11 = vsub.f32 %v4377_v58, %v4702_v44  ;;  %v1673_v15 = vsub.f32 %v4350_v17, %v4704_v39  ;;  %3225 = vpow2.f32 %v1769_v34 }
 0x277   : > { %v1674_v20 = vsub.f32 %v4362_v57, %v4704_v39  ;;  %3227 = vpow2.f32 %v1771_v30 }
 0x278   : > { %v1713_v5 = vmul.f32 1.442695, %v1643_v45  ;;  %3229 = vpow2.f32 %v1709_v54  ;;  %v1715_v63 = vmul.f32 1.442695, %v1644_v11  ;;  %v1773_v58 = vmul.f32 1.442695, %v1673_v15 }
 0x279   : > { %v4712_v40 = vpop.xlane.xlu1 %1599  ;;  %v4718_v38 = vpop.xlane.xlu0 %1554  ;;  %3231 = vpow2.f32 %v1711_v18  ;;  %v1775_v6 = vmul.f32 1.442695, %v1674_v20 }
 0x27a   : > { %v1675_v17 = vsub.f32 %v4374_v37, %v4712_v40  ;;  %3233 = vpow2.f32 %v1713_v5  ;;  %v1676_v57 = vsub.f32 %v4386_v47, %v4712_v40  ;;  %v1645_v34 = vsub.f32 %v4389_v23, %v4718_v38 }
 0x27b   : > { %3235 = vpow2.f32 %v1715_v63  ;;  %v1646_v54 = vsub.f32 %v4401_v49, %v4718_v38 }
 0x27c   : > { %v3214_v22 = vpop.eup %3213  ;;  %3237 = vpow2.f32 %v1773_v58  ;;  %v1777_v47 = vmul.f32 1.442695, %v1675_v17  ;;  %v1779_v23 = vmul.f32 1.442695, %v1676_v57  ;;  %v1717_v49 = vmul.f32 1.442695, %v1645_v34 }
 0x27d   : > { %v4720_v62 = vpop.xlane.xlu1 %1557  ;;  %v3216_v9 = vpop.eup %3215  ;;  %v4733_v11 = vmul.f32 %v3214_v22, %v4290_v4  ;;  %3239 = vpow2.f32 %v1775_v6  ;;  %v1719_v22 = vmul.f32 1.442695, %v1646_v54 }
 0x27e   : > { %v4728_v30 = vpop.xlane.xlu0 %1602  ;;  %v4736_v37 = vmul.f32 %v3216_v9, %v4292_v50  ;;  %v1647_v5 = vsub.f32 %v4413_v13, %v4720_v62  ;;  %v1648_v4 = vsub.f32 %v4425_v25, %v4720_v62  ;;  %3241 = vpow2.f32 %v1777_v47 }
 0x27f   : > { %v3218_v36 = vpop.eup %3217  ;;  %v1677_v50 = vsub.f32 %v4398_v7, %v4728_v30  ;;  %v1678_v58 = vsub.f32 %v4410_v21, %v4728_v30  ;;  %3243 = vpow2.f32 %v1779_v23 }
 0x280   : > { %v3220_v45 = vpop.eup %3219  ;;  %v1893_v63 = vadd.f32 %v4736_v37, %v4733_v11  ;;  %v4751_v9 = vmul.f32 %v3218_v36, %v4298_v33  ;;  %v1721_v57 = vmul.f32 1.442695, %v1647_v5  ;;  %3245 = vpow2.f32 %v1717_v49 }
 0x281   : > { %v3222_v18 = vpop.eup %3221  ;;  %v4738_v15 = vpop.xlane.xlu1 %1605  ;;  %v4756_v6 = vmul.f32 %v3220_v45, %v4309_v53  ;;  %v1723_v34 = vmul.f32 1.442695, %v1648_v4  ;;  %3247 = vpow2.f32 %v1719_v22 }
 0x282   : > { %v3224_v20 = vpop.eup %3223  ;;  %1894 = vadd.xlane.f32.xlu0 %v1893_v63  ;;  %5701 = vst [vmem:[#allocation85_spill] sm:$0xff] %v4751_v9  ;;  %v4753_v13 = vpop.xlane.xlu0 %1560  ;;  %v4759_v17 = vmul.f32 %v3222_v18, %v4294_v43  ;;  %v1781_v43 = vmul.f32 1.442695, %v1677_v50  ;;  %v1679_v18 = vsub.f32 %v4422_v24, %v4738_v15  ;;  %3249 = vpow2.f32 %v1721_v57 }
 0x283   : > { %5702 = vst [vmem:[#allocation86_spill] sm:$0xff] %v4756_v6  ;;  %v4762_v25 = vmul.f32 %v3224_v20, %v4296_v59  ;;  %v3226_v7 = vpop.eup %3225  ;;  %v1896_v33 = vadd.f32 %v4756_v6, %v4751_v9  ;;  %v1783_v59 = vmul.f32 1.442695, %v1678_v58  ;;  %v1680_v47 = vsub.f32 %v4434_v19, %v4738_v15  ;;  %v5756_v6 = vld [vmem:[#allocation25_spill] sm:$0xff] }
 0x284   : > { %v3228_v21 = vpop.eup %3227  ;;  %v4775_v20 = vmul.f32 %v3226_v7, %v4311_v46  ;;  %3251 = vpow2.f32 %v1723_v34  ;;  %v1649_v63 = vsub.f32 %v4437_v41, %v4753_v13  ;;  %v1650_v19 = vsub.f32 %v4449_v14, %v4753_v13 }
 0x285   : > { %5703 = vst [vmem:[#allocation87_spill] sm:$0xff] %v4762_v25  ;;  %v1941_v36 = vadd.f32 %v4762_v25, %v4759_v17  ;;  %v4768_v53 = vpop.xlane.xlu1 %1563  ;;  %v3230_v45 = vpop.eup %3229  ;;  %1897 = vadd.xlane.f32.xlu1 %v1896_v33  ;;  %v4778_v23 = vmul.f32 %v3228_v21, %v4321_v35  ;;  %3253 = vpow2.f32 %v1781_v43  ;;  %v1785_v50 = vmul.f32 1.442695, %v1679_v18 }
 0x286   : > { %v3232_v54 = vpop.eup %3231  ;;  %5704 = vst [vmem:[#allocation88_spill] sm:$0xff] %v4775_v20  ;;  %v4782_v49 = vpop.xlane.xlu0 %1608  ;;  %v4785_v24 = vmul.f32 %v3230_v45, %v4323_v28  ;;  %3255 = vpow2.f32 %v1783_v59  ;;  %v1787_v7 = vmul.f32 1.442695, %v1680_v47  ;;  %v1651_v28 = vsub.f32 %v4461_v10, %v4768_v53  ;;  %v5709_v45 = vld [vmem:[#allocation11_spill] sm:$0xff] }
 0x287   : > { %1942 = vadd.xlane.f32.xlu0 %v1941_v36  ;;  %5705 = vst [vmem:[#allocation89_spill] sm:$0xff] %v4778_v23  ;;  %v3234_v5 = vpop.eup %3233  ;;  %v1944_v46 = vadd.f32 %v4778_v23, %v4775_v20  ;;  %v4792_v35 = vmul.f32 %v3232_v54, %v4333_v48  ;;  %v1725_v57 = vmul.f32 1.442695, %v1649_v63  ;;  %v1652_v21 = vsub.f32 %v4473_v56, %v4768_v53  ;;  %v5711_v54 = vld [vmem:[#allocation8_spill] sm:$0xff]  ;;  %v5713_v56 = vld [vmem:[#allocation9_spill] sm:$0xff] }
 0x288   : > { %5706 = vst [vmem:[#allocation90_spill] sm:$0xff] %v4785_v24  ;;  %v3236_v4 = vpop.eup %3235  ;;  %v1727_v48 = vmul.f32 1.442695, %v1650_v19  ;;  %v1681_v34 = vsub.f32 %v4446_v8, %v4782_v49  ;;  %v1682_v33 = vsub.f32 %v4458_v29, %v4782_v49  ;;  %v4807_v36 = vmul.f32 %v3234_v5, %v4347_v16 }
 0x289   : > { %5707 = vst [vmem:[#allocation91_spill] sm:$0xff] %v4792_v35  ;;  %v3238_v22 = vpop.eup %3237  ;;  %v4794_v41 = vpop.xlane.xlu1 %1611  ;;  %1945 = vadd.xlane.f32.xlu1 %v1944_v46  ;;  %v1899_v14 = vadd.f32 %v4792_v35, %v4785_v24  ;;  %3257 = vpow2.f32 %v1785_v50  ;;  %v4812_v43 = vmul.f32 %v3236_v4, %v5709_v45  ;;  %v1729_v47 = vmul.f32 1.442695, %v1651_v28  ;;  %v5716_v28 = vld [vmem:[#allocation33_spill] sm:$0xff]  ;;  %v5719_v45 = vld [vmem:[#allocation12_spill] sm:$0xff] }
 0x28a   : > { %v3240_v58 = vpop.eup %3239  ;;  %5708 = vst [vmem:[#allocation92_spill] sm:$0xff] %v4807_v36  ;;  %v4809_v10 = vpop.xlane.xlu0 %1566  ;;  %v4815_v59 = vmul.f32 %v3238_v22, %v5711_v54  ;;  %3259 = vpow2.f32 %v1787_v7  ;;  %v1731_v63 = vmul.f32 1.442695, %v1652_v21  ;;  %v1789_v46 = vmul.f32 1.442695, %v1681_v34 }
 0x28b   : > { %1900 = vadd.xlane.f32.xlu0 %v1899_v14  ;;  %5710 = vst [vmem:[#allocation11_spill] sm:$0xff] %v4812_v43  ;;  %v4818_v18 = vmul.f32 %v3240_v58, %v5713_v56  ;;  %v3242_v8 = vpop.eup %3241  ;;  %3261 = vpow2.f32 %v1725_v57  ;;  %v1902_v16 = vadd.f32 %v4812_v43, %v4807_v36  ;;  %v1791_v50 = vmul.f32 1.442695, %v1682_v33  ;;  %v5715_v58 = vld [vmem:[#allocation30_spill] sm:$0xff] }
 0x28c   : > { %5712 = vst [vmem:[#allocation8_spill] sm:$0xff] %v4815_v59  ;;  %v3244_v29 = vpop.eup %3243  ;;  %3263 = vpow2.f32 %v1727_v48  ;;  %v1683_v7 = vsub.f32 %v5715_v58, %v4794_v41  ;;  %v1684_v14 = vsub.f32 %v5716_v28, %v4794_v41  ;;  %v5717_v57 = vld [vmem:[#allocation10_spill] sm:$0xff]  ;;  %v5722_v58 = vld [vmem:[#allocation13_spill] sm:$0xff] }
 0x28d   : > { %5714 = vst [vmem:[#allocation9_spill] sm:$0xff] %v4818_v18  ;;  %v1947_v5 = vadd.f32 %v4818_v18, %v4815_v59  ;;  %v4824_v4 = vpop.xlane.xlu1 %1569  ;;  %v3246_v19 = vpop.eup %3245  ;;  %1903 = vadd.xlane.f32.xlu1 %v1902_v16  ;;  %3265 = vpow2.f32 %v1729_v47  ;;  %v4831_v21 = vmul.f32 %v3242_v8, %v5717_v57  ;;  %v4834_v54 = vmul.f32 %v3244_v29, %v5719_v45  ;;  %v5721_v48 = vld [vmem:[#allocation34_spill] sm:$0xff]  ;;  %v5725_v29 = vld [vmem:[#allocation15_spill] sm:$0xff] }
 0x28e   : > { %v3248_v22 = vpop.eup %3247  ;;  %3267 = vpow2.f32 %v1731_v63  ;;  %v1653_v34 = vsub.f32 %v5721_v48, %v4809_v10  ;;  %v4838_v33 = vpop.xlane.xlu0 %1614  ;;  %v4841_v16 = vmul.f32 %v3246_v19, %v5722_v58  ;;  %v1793_v45 = vmul.f32 1.442695, %v1683_v7  ;;  %v5727_v19 = vld [vmem:[#allocation42_spill] sm:$0xff]  ;;  %v5730_v7 = vld [vmem:[#allocation41_spill] sm:$0xff] }
 0x28f   : > { %1948 = vadd.xlane.f32.xlu0 %v1947_v5  ;;  %5718 = vst [vmem:[#allocation30_spill] sm:$0xff] %v4831_v21  ;;  %5720 = vst [vmem:[#allocation33_spill] sm:$0xff] %v4834_v54  ;;  %v3250_v56 = vpop.eup %3249  ;;  %3269 = vpow2.f32 %v1789_v46  ;;  %v5724_v5 = vld [vmem:[#allocation38_spill] sm:$0xff]  ;;  %v1950_v8 = vadd.f32 %v4834_v54, %v4831_v21  ;;  %v4848_v57 = vmul.f32 %v3248_v22, %v5725_v29  ;;  %v1795_v36 = vmul.f32 1.442695, %v1684_v14  ;;  %v5729_v29 = vld [vmem:[#allocation37_spill] sm:$0xff] }
 0x290   : > { %5723 = vst [vmem:[#allocation10_spill] sm:$0xff] %v4841_v16  ;;  %v1654_v28 = vsub.f32 %v5724_v5, %v4809_v10  ;;  %3271 = vpow2.f32 %v1791_v50  ;;  %v1655_v58 = vsub.f32 %v5727_v19, %v4824_v4  ;;  %v1733_v5 = vmul.f32 1.442695, %v1653_v34  ;;  %v5728_v54 = vld [vmem:[#allocation46_spill] sm:$0xff]  ;;  %v5731_v14 = vld [vmem:[#allocation17_spill] sm:$0xff]  ;;  %v5733_v19 = vld [vmem:[#allocation19_spill] sm:$0xff] }
 0x291   : > { %v3252_v47 = vpop.eup %3251  ;;  %5726 = vst [vmem:[#allocation12_spill] sm:$0xff] %v4848_v57  ;;  %v4850_v48 = vpop.xlane.xlu1 %1617  ;;  %1951 = vadd.xlane.f32.xlu1 %v1950_v8  ;;  %v1905_v46 = vadd.f32 %v4848_v57, %v4841_v16  ;;  %v1656_v21 = vsub.f32 %v5728_v54, %v4824_v4  ;;  %v1685_v50 = vsub.f32 %v5729_v29, %v4838_v33  ;;  %3273 = vpow2.f32 %v1793_v45  ;;  %v5735_v34 = vld [vmem:[#allocation14_spill] sm:$0xff]  ;;  %v5737_v54 = vld [vmem:[#allocation16_spill] sm:$0xff] }
 0x292   : > { %v3254_v63 = vpop.eup %3253  ;;  %v1735_v22 = vmul.f32 1.442695, %v1654_v28  ;;  %v1686_v18 = vsub.f32 %v5730_v7, %v4838_v33  ;;  %v4863_v59 = vmul.f32 %v3250_v56, %v5731_v14  ;;  %v4865_v8 = vpop.xlane.xlu0 %1572  ;;  %v4868_v57 = vmul.f32 %v3252_v47, %v5733_v19 }
 0x293   : > { %v3256_v43 = vpop.eup %3255  ;;  %1906 = vadd.xlane.f32.xlu0 %v1905_v46  ;;  %v4871_v16 = vmul.f32 %v3254_v63, %v5735_v34  ;;  %3275 = vpow2.f32 %v1795_v36  ;;  %v1737_v35 = vmul.f32 1.442695, %v1655_v58  ;;  %v1739_v46 = vmul.f32 1.442695, %v1656_v21  ;;  %v5739_v34 = vld [vmem:[#allocation45_spill] sm:$0xff] }
 0x294   : > { %5732 = vst [vmem:[#allocation34_spill] sm:$0xff] %v4863_v59  ;;  %5734 = vst [vmem:[#allocation13_spill] sm:$0xff] %v4868_v57  ;;  %v4874_v28 = vmul.f32 %v3256_v43, %v5737_v54  ;;  %3277 = vpow2.f32 %v1733_v5  ;;  %v1908_v56 = vadd.f32 %v4868_v57, %v4863_v59  ;;  %v1797_v63 = vmul.f32 1.442695, %v1685_v50  ;;  %v5740_v21 = vld [vmem:[#allocation49_spill] sm:$0xff]  ;;  %v5741_v5 = vld [vmem:[#allocation18_spill] sm:$0xff] }
 0x295   : > { %5736 = vst [vmem:[#allocation38_spill] sm:$0xff] %v4871_v16  ;;  %v4880_v47 = vpop.xlane.xlu1 %1575  ;;  %3279 = vpow2.f32 %v1735_v22  ;;  %v1799_v43 = vmul.f32 1.442695, %v1686_v18  ;;  %v1687_v36 = vsub.f32 %v5739_v34, %v4850_v48  ;;  %v1688_v58 = vsub.f32 %v5740_v21, %v4850_v48  ;;  %v5743_v57 = vld [vmem:[#allocation20_spill] sm:$0xff]  ;;  %v5745_v22 = vld [vmem:[#allocation50_spill] sm:$0xff] }
 0x296   : > { %5738 = vst [vmem:[#allocation15_spill] sm:$0xff] %v4874_v28  ;;  %v3258_v29 = vpop.eup %3257  ;;  %v1953_v45 = vadd.f32 %v4874_v28, %v4871_v16  ;;  %1909 = vadd.xlane.f32.xlu1 %v1908_v56  ;;  %3281 = vpow2.f32 %v1737_v35  ;;  %v1657_v18 = vsub.f32 %v5745_v22, %v4865_v8  ;;  %v5746_v50 = vld [vmem:[#allocation54_spill] sm:$0xff]  ;;  %v4896_v56 = vpop.xlane.xlu0 %1620  ;;  %v5747_v35 = vld [vmem:[#allocation21_spill] sm:$0xff] }
 0x297   : > { %v3260_v7 = vpop.eup %3259  ;;  %v4887_v54 = vmul.f32 %v3258_v29, %v5741_v5  ;;  %3283 = vpow2.f32 %v1739_v46  ;;  %v1658_v34 = vsub.f32 %v5746_v50, %v4865_v8  ;;  %v5749_v29 = vld [vmem:[#allocation58_spill] sm:$0xff]  ;;  %v1801_v16 = vmul.f32 1.442695, %v1687_v36 }
 0x298   : > { %v3262_v14 = vpop.eup %3261  ;;  %1954 = vadd.xlane.f32.xlu0 %v1953_v45  ;;  %v4890_v59 = vmul.f32 %v3260_v7, %v5743_v57  ;;  %3285 = vpow2.f32 %v1797_v63  ;;  %v1659_v5 = vsub.f32 %v5749_v29, %v4880_v47  ;;  %v5750_v7 = vld [vmem:[#allocation23_spill] sm:$0xff]  ;;  %v1803_v23 = vmul.f32 1.442695, %v1688_v58  ;;  %v5753_v63 = vld [vmem:[#allocation53_spill] sm:$0xff] }
 0x299   : > { %v3264_v19 = vpop.eup %3263  ;;  %5742 = vst [vmem:[#allocation42_spill] sm:$0xff] %v4887_v54  ;;  %v4899_v45 = vmul.f32 %v3262_v14, %v5747_v35  ;;  %3287 = vpow2.f32 %v1799_v43  ;;  %v4908_v50 = vpop.xlane.xlu1 %1623  ;;  %v5752_v14 = vld [vmem:[#allocation62_spill] sm:$0xff]  ;;  %v1689_v20 = vsub.f32 %v5753_v63, %v4896_v56  ;;  %v5754_v43 = vld [vmem:[#allocation57_spill] sm:$0xff] }
 0x29a   : > { %5744 = vst [vmem:[#allocation46_spill] sm:$0xff] %v4890_v59  ;;  %v3266_v28 = vpop.eup %3265  ;;  %v1956_v57 = vadd.f32 %v4890_v59, %v4887_v54  ;;  %v4906_v46 = vmul.f32 %v3264_v19, %v5750_v7  ;;  %v1660_v35 = vsub.f32 %v5752_v14, %v4880_v47  ;;  %v1741_v59 = vmul.f32 1.442695, %v1657_v18  ;;  %v5755_v54 = vld [vmem:[#allocation61_spill] sm:$0xff]  ;;  %v5758_v14 = vld [vmem:[#allocation27_spill] sm:$0xff]  ;;  %v5762_v18 = vld [vmem:[#allocation24_spill] sm:$0xff] }
 0x29b   : > { %5748 = vst [vmem:[#allocation37_spill] sm:$0xff] %v4899_v45  ;;  %v3268_v21 = vpop.eup %3267  ;;  %v1743_v19 = vmul.f32 1.442695, %v1658_v34  ;;  %v1745_v7 = vmul.f32 1.442695, %v1659_v5  ;;  %v1690_v36 = vsub.f32 %v5754_v43, %v4896_v56  ;;  %v1691_v58 = vsub.f32 %v5755_v54, %v4908_v50 }
 0x29c   : > { %5751 = vst [vmem:[#allocation41_spill] sm:$0xff] %v4906_v46  ;;  %v3270_v22 = vpop.eup %3269  ;;  %1957 = vadd.xlane.f32.xlu1 %v1956_v57  ;;  %v1911_v29 = vadd.f32 %v4906_v46, %v4899_v45  ;;  %v4921_v9 = vmul.f32 %v3266_v28, %v5756_v6  ;;  %3289 = vpow2.f32 %v1801_v16  ;;  %v4924_v63 = vmul.f32 %v3268_v21, %v5758_v14  ;;  %v5760_v57 = vld [vmem:[#allocation22_spill] sm:$0xff]  ;;  %v4932_v46 = vpop.xlane.xlu0 %1578  ;;  %v5764_v6 = vld [vmem:[#allocation65_spill] sm:$0xff] }
 0x29d   : > { %v3272_v24 = vpop.eup %3271  ;;  %v4927_v25 = vmul.f32 %v3270_v22, %v5760_v57  ;;  %3291 = vpow2.f32 %v1803_v23  ;;  %v1747_v43 = vmul.f32 1.442695, %v1660_v35  ;;  %v1692_v16 = vsub.f32 %v5764_v6, %v4908_v50  ;;  %v4940_v14 = vpop.xlane.xlu1 %1581  ;;  %v5765_v35 = vld [vmem:[#allocation66_spill] sm:$0xff] }
 0x29e   : > { %1912 = vadd.xlane.f32.xlu0 %v1911_v29  ;;  %5757 = vst [vmem:[#allocation17_spill] sm:$0xff] %v4921_v9  ;;  %5759 = vst [vmem:[#allocation19_spill] sm:$0xff] %v4924_v63  ;;  %v4930_v34 = vmul.f32 %v3272_v24, %v5762_v18  ;;  %v3274_v5 = vpop.eup %3273  ;;  %v1805_v29 = vmul.f32 1.442695, %v1689_v20  ;;  %3293 = vpow2.f32 %v1741_v59  ;;  %v1914_v28 = vadd.f32 %v4924_v63, %v4921_v9  ;;  %v5766_v57 = vld [vmem:[#allocation70_spill] sm:$0xff]  ;;  %v5769_v9 = vld [vmem:[#allocation28_spill] sm:$0xff] }
 0x29f   : > { %5761 = vst [vmem:[#allocation14_spill] sm:$0xff] %v4927_v25  ;;  %3295 = vpow2.f32 %v1743_v19  ;;  %v1807_v24 = vmul.f32 1.442695, %v1690_v36  ;;  %v1809_v20 = vmul.f32 1.442695, %v1691_v58  ;;  %v1661_v59 = vsub.f32 %v5765_v35, %v4932_v46  ;;  %v5767_v6 = vld [vmem:[#allocation26_spill] sm:$0xff] }
 0x2a0   : > { %5763 = vst [vmem:[#allocation16_spill] sm:$0xff] %v4930_v34  ;;  %v3276_v54 = vpop.eup %3275  ;;  %v1959_v21 = vadd.f32 %v4930_v34, %v4927_v25  ;;  %3297 = vpow2.f32 %v1745_v7  ;;  %1915 = vadd.xlane.f32.xlu1 %v1914_v28  ;;  %v1662_v18 = vsub.f32 %v5766_v57, %v4932_v46  ;;  %v4947_v63 = vmul.f32 %v3274_v5, %v5767_v6  ;;  %v5771_v7 = vld [vmem:[#allocation74_spill] sm:$0xff]  ;;  %v5772_v25 = vld [vmem:[#allocation29_spill] sm:$0xff]  ;;  %v4959_v57 = vpop.xlane.xlu0 %1626  ;;  %v5775_v5 = vld [vmem:[#allocation32_spill] sm:$0xff] }
 0x2a1   : > { %v3278_v22 = vpop.eup %3277  ;;  %3299 = vpow2.f32 %v1747_v43  ;;  %v4950_v19 = vmul.f32 %v3276_v54, %v5769_v9  ;;  %v1811_v34 = vmul.f32 1.442695, %v1692_v16  ;;  %v1663_v58 = vsub.f32 %v5771_v7, %v4940_v14  ;;  %v5774_v43 = vld [vmem:[#allocation77_spill] sm:$0xff] }
 0x2a2   : > { %v3280_v23 = vpop.eup %3279  ;;  %1960 = vadd.xlane.f32.xlu0 %v1959_v21  ;;  %5768 = vst [vmem:[#allocation45_spill] sm:$0xff] %v4947_v63  ;;  %3301 = vpow2.f32 %v1805_v29  ;;  %v4955_v35 = vmul.f32 %v3278_v22, %v5772_v25  ;;  %v1664_v21 = vsub.f32 %v5774_v43, %v4940_v14  ;;  %v1749_v16 = vmul.f32 1.442695, %v1661_v59  ;;  %v4968_v22 = vpop.xlane.xlu1 %1629  ;;  %v5779_v59 = vld [vmem:[#allocation36_spill] sm:$0xff] }
 0x2a3   : > { %5770 = vst [vmem:[#allocation49_spill] sm:$0xff] %v4950_v19  ;;  %v3282_v36 = vpop.eup %3281  ;;  %3303 = vpow2.f32 %v1807_v24  ;;  %v1962_v9 = vadd.f32 %v4950_v19, %v4947_v63  ;;  %v4964_v54 = vmul.f32 %v3280_v23, %v5775_v5  ;;  %v1751_v7 = vmul.f32 1.442695, %v1662_v18  ;;  %v5777_v24 = vld [vmem:[#allocation69_spill] sm:$0xff] }
 0x2a4   : > { %5773 = vst [vmem:[#allocation18_spill] sm:$0xff] %v4955_v35  ;;  %v3284_v28 = vpop.eup %3283  ;;  %3305 = vpow2.f32 %v1809_v20  ;;  %v1693_v43 = vsub.f32 %v5777_v24, %v4959_v57  ;;  %v1753_v45 = vmul.f32 1.442695, %v1663_v58  ;;  %v1755_v19 = vmul.f32 1.442695, %v1664_v21  ;;  %v5778_v23 = vld [vmem:[#allocation73_spill] sm:$0xff]  ;;  %v4988_v21 = vpop.xlane.xlu0 %1584 }
 0x2a5   : > { %5776 = vst [vmem:[#allocation20_spill] sm:$0xff] %v4964_v54  ;;  %v3286_v29 = vpop.eup %3285  ;;  %1963 = vadd.xlane.f32.xlu1 %v1962_v9  ;;  %v1917_v25 = vadd.f32 %v4964_v54, %v4955_v35  ;;  %3307 = vpow2.f32 %v1811_v34  ;;  %v1694_v5 = vsub.f32 %v5778_v23, %v4959_v57  ;;  %v4975_v63 = vmul.f32 %v3282_v36, %v5779_v59  ;;  %v5780_v20 = vld [vmem:[#allocation40_spill] sm:$0xff]  ;;  %v5782_v9 = vld [vmem:[#allocation31_spill] sm:$0xff] }
 0x2a6   : > { %v3288_v6 = vpop.eup %3287  ;;  %3309 = vpow2.f32 %v1749_v16  ;;  %v4978_v18 = vmul.f32 %v3284_v28, %v5780_v20  ;;  %v4981_v54 = vmul.f32 %v3286_v29, %v5782_v9  ;;  %v5784_v34 = vld [vmem:[#allocation35_spill] sm:$0xff]  ;;  %v1695_v58 = vsub.f32 %v4614_v31, %v4968_v22 }
 0x2a7   : > { %1918 = vadd.xlane.f32.xlu0 %v1917_v25  ;;  %v4984_v35 = vmul.f32 %v3288_v6, %v5784_v34  ;;  %3311 = vpow2.f32 %v1751_v7  ;;  %v1813_v36 = vmul.f32 1.442695, %v1693_v43  ;;  %v1696_v16 = vsub.f32 %v4626_v2, %v4968_v22  ;;  %v4996_v7 = vpop.xlane.xlu1 %1587  ;;  %v5786_v9 = vld [vmem:[#allocation39_spill] sm:$0xff] }
 0x2a8   : > { %5781 = vst [vmem:[#allocation50_spill] sm:$0xff] %v4978_v18  ;;  %5783 = vst [vmem:[#allocation54_spill] sm:$0xff] %v4981_v54  ;;  %v1920_v28 = vadd.f32 %v4978_v18, %v4975_v63  ;;  %3313 = vpow2.f32 %v1753_v45  ;;  %v1815_v23 = vmul.f32 1.442695, %v1694_v5  ;;  %v1665_v31 = vsub.f32 %v4629_v42, %v4988_v21  ;;  %v5789_v42 = vld [vmem:[#allocation44_spill] sm:$0xff] }
 0x2a9   : > { %5785 = vst [vmem:[#allocation21_spill] sm:$0xff] %v4984_v35  ;;  %v3290_v24 = vpop.eup %3289  ;;  %v1965_v29 = vadd.f32 %v4984_v35, %v4981_v54  ;;  %3315 = vpow2.f32 %v1755_v19  ;;  %v1817_v2 = vmul.f32 1.442695, %v1695_v58  ;;  %v1666_v20 = vsub.f32 %v4641_v1, %v4988_v21  ;;  %v5787_v35 = vld [vmem:[#allocation43_spill] sm:$0xff]  ;;  %v5013_v58 = vpop.xlane.xlu0 %1632 }
 0x2aa   : > { %v3292_v25 = vpop.eup %3291  ;;  %1921 = vadd.xlane.f32.xlu1 %v1920_v28  ;;  %v5003_v34 = vmul.f32 %v3290_v24, %v5786_v9  ;;  %3317 = vpow2.f32 %v1813_v36  ;;  %v1819_v54 = vmul.f32 1.442695, %v1696_v16  ;;  %v1667_v19 = vsub.f32 %v4653_v55, %v4996_v7  ;;  %v5790_v24 = vld [vmem:[#allocation48_spill] sm:$0xff] }
 0x2ab   : > { %v3294_v6 = vpop.eup %3293  ;;  %1966 = vadd.xlane.f32.xlu0 %v1965_v29  ;;  %v5006_v45 = vmul.f32 %v3292_v25, %v5787_v35  ;;  %3319 = vpow2.f32 %v1815_v23  ;;  %v1757_v25 = vmul.f32 1.442695, %v1665_v31  ;;  %v1668_v36 = vsub.f32 %v4660_v26, %v4996_v7  ;;  %v5792_v16 = vld [vmem:[#allocation52_spill] sm:$0xff]  ;;  %v5794_v26 = vld [vmem:[#allocation47_spill] sm:$0xff] }
 0x2ac   : > { %v3296_v59 = vpop.eup %3295  ;;  %v5011_v28 = vmul.f32 %v3294_v6, %v5789_v42  ;;  %3321 = vpow2.f32 %v1817_v2  ;;  %v1759_v6 = vmul.f32 1.442695, %v1666_v20  ;;  %v5793_v42 = vld [vmem:[#allocation56_spill] sm:$0xff]  ;;  %v1697_v31 = vsub.f32 %v4638_v0, %v5013_v58 }
 0x2ad   : > { %v3298_v43 = vpop.eup %3297  ;;  %5788 = vst [vmem:[#allocation58_spill] sm:$0xff] %v5006_v45  ;;  %v1968_v1 = vadd.f32 %v5006_v45, %v5003_v34  ;;  %v5018_v9 = vmul.f32 %v3296_v59, %v5790_v24  ;;  %3323 = vpow2.f32 %v1819_v54  ;;  %v1761_v59 = vmul.f32 1.442695, %v1667_v19  ;;  %v5032_v24 = vpop.xlane.xlu1 %1635  ;;  %v5797_v54 = vld [vmem:[#allocation55_spill] sm:$0xff] }
 0x2ae   : > { %v3300_v5 = vpop.eup %3299  ;;  %v5023_v55 = vmul.f32 %v3298_v43, %v5792_v16  ;;  %v1698_v20 = vsub.f32 %v4648_v51, %v5013_v58  ;;  %3325 = vpow2.f32 %v1757_v25  ;;  %v1763_v0 = vmul.f32 1.442695, %v1668_v36  ;;  %v5800_v36 = vld [vmem:[#allocation60_spill] sm:$0xff] }
 0x2af   : > { %v3302_v29 = vpop.eup %3301  ;;  %5791 = vst [vmem:[#allocation23_spill] sm:$0xff] %v5018_v9  ;;  %1969 = vadd.xlane.f32.xlu1 %v1968_v1  ;;  %v1923_v23 = vadd.f32 %v5018_v9, %v5011_v28  ;;  %v5028_v18 = vmul.f32 %v3300_v5, %v5793_v42  ;;  %v5795_v1 = vld [vmem:[#allocation51_spill] sm:$0xff]  ;;  %3327 = vpow2.f32 %v1759_v6  ;;  %v1699_v51 = vsub.f32 %v4663_v61, %v5032_v24 }
 0x2b0   : > { %v3304_v35 = vpop.eup %3303  ;;  %v5035_v43 = vmul.f32 %v3302_v29, %v5794_v26  ;;  %v5798_v42 = vld [vmem:[#allocation59_spill] sm:$0xff]  ;;  %3329 = vpow2.f32 %v1761_v59  ;;  %v1823_v6 = vmul.f32 1.442695, %v1698_v20  ;;  %v5803_v20 = vld [vmem:[#allocation72_spill] sm:$0xff] }
 0x2b1   : > { %v3306_v45 = vpop.eup %3305  ;;  %1924 = vadd.xlane.f32.xlu0 %v1923_v23  ;;  %v1926_v5 = vadd.f32 %v5028_v18, %v5023_v55  ;;  %v5042_v16 = vmul.f32 %v3304_v35, %v5795_v1  ;;  %v1821_v35 = vmul.f32 1.442695, %v1697_v31  ;;  %v5801_v1 = vld [vmem:[#allocation64_spill] sm:$0xff]  ;;  %3331 = vpow2.f32 %v1763_v0 }
 0x2b2   : > { %v3308_v2 = vpop.eup %3307  ;;  %v5045_v19 = vmul.f32 %v3306_v45, %v5797_v54  ;;  %v1700_v45 = vsub.f32 %v4668_v52, %v5032_v24  ;;  %v5802_v31 = vld [vmem:[#allocation68_spill] sm:$0xff] }
 0x2b3   : > { %5796 = vst [vmem:[#allocation62_spill] sm:$0xff] %v5042_v16  ;;  %v5048_v9 = vmul.f32 %v3308_v2, %v5798_v42  ;;  %v3310_v29 = vpop.eup %3309  ;;  %1927 = vadd.xlane.f32.xlu1 %v1926_v5  ;;  %v1971_v23 = vadd.f32 %v5042_v16, %v5035_v43  ;;  %v1825_v42 = vmul.f32 1.442695, %v1699_v51  ;;  %3333 = vpow2.f32 %v1821_v35 }
 0x2b4   : > { %v3312_v26 = vpop.eup %3311  ;;  %v5059_v2 = vmul.f32 %v3310_v29, %v5800_v36  ;;  %v1827_v59 = vmul.f32 1.442695, %v1700_v45  ;;  %3335 = vpow2.f32 %v1823_v6  ;;  %v5805_v36 = vld [vmem:[#allocation67_spill] sm:$0xff] }
 0x2b5   : > { %5799 = vst [vmem:[#allocation53_spill] sm:$0xff] %v5048_v9  ;;  %v1974_v25 = vadd.f32 %v5048_v9, %v5045_v19  ;;  %1972 = vadd.xlane.f32.xlu0 %v1971_v23  ;;  %v5062_v61 = vmul.f32 %v3312_v26, %v5801_v1  ;;  %v3314_v5 = vpop.eup %3313  ;;  %v3596_v9 = vmov 0   ;;  %v5804_v26 = vld [vmem:[#allocation63_spill] sm:$0xff]  ;;  %3337 = vpow2.f32 %v1825_v42 }
 0x2b6   : > { %v3316_v54 = vpop.eup %3315  ;;  %v5067_v16 = vmul.f32 %v3314_v5, %v5802_v31  ;;  %3083 = vset.pattern.permute.xlu0 %v3596_v9  ;;  %3084 = vset.pattern.permute.xlu1 %v3596_v9  ;;  %3339 = vpow2.f32 %v1827_v59  ;;  %v5806_v6 = vld [vmem:[#allocation71_spill] sm:$0xff] }
 0x2b7   : > { %1975 = vadd.xlane.f32.xlu1 %v1974_v25  ;;  %v1929_v52 = vadd.f32 %v5062_v61, %v5059_v2  ;;  %v5070_v29 = vmul.f32 %v3316_v54, %v5803_v20  ;;  %v3318_v23 = vpop.eup %3317  ;;  %v5808_v54 = vld [vmem:[#allocation75_spill] sm:$0xff] }
 0x2b8   : > { %v3320_v0 = vpop.eup %3319  ;;  %v5075_v25 = vmul.f32 %v3318_v23, %v5804_v26  ;;  %v5810_v23 = vld [vmem:[#allocation76_spill] sm:$0xff]  ;;  %v5811_v59 = vld [vmem:[#allocation79_spill] sm:$0xff] }
 0x2b9   : > { %1930 = vadd.xlane.f32.xlu0 %v1929_v52  ;;  %v1932_v51 = vadd.f32 %v5070_v29, %v5067_v16  ;;  %v5078_v1 = vmul.f32 %v3320_v0, %v5805_v36  ;;  %v3322_v35 = vpop.eup %3321 }
 0x2ba   : > { %v3324_v45 = vpop.eup %3323  ;;  %v5083_v5 = vmul.f32 %v3322_v35, %v5806_v6 }
 0x2bb   : > { %1933 = vadd.xlane.f32.xlu1 %v1932_v51  ;;  %v1977_v9 = vadd.f32 %v5078_v1, %v5075_v25  ;;  %v5086_v52 = vmul.f32 %v3324_v45, %v5808_v54  ;;  %v3326_v31 = vpop.eup %3325 }
 0x2bc   : > { %5807 = vst [vmem:[#allocation57_spill] sm:$0xff] %v5083_v5  ;;  %v3328_v20 = vpop.eup %3327  ;;  %v5091_v0 = vmul.f32 %v3326_v31, %v5810_v23 }
 0x2bd   : > { %5809 = vst [vmem:[#allocation61_spill] sm:$0xff] %v5086_v52  ;;  %1978 = vadd.xlane.f32.xlu0 %v1977_v9  ;;  %v1980_v42 = vadd.f32 %v5086_v52, %v5083_v5  ;;  %v5094_v51 = vmul.f32 %v3328_v20, %v5811_v59  ;;  %v3330_v26 = vpop.eup %3329  ;;  %v5813_v9 = vld [vmem:[#allocation81_spill] sm:$0xff]  ;;  %v5815_v20 = vld [vmem:[#allocation78_spill] sm:$0xff] }
 0x2be   : > { %v3332_v36 = vpop.eup %3331  ;;  %v5099_v45 = vmul.f32 %v3330_v26, %v4635_v12  ;;  %v5818_v26 = vld [vmem:[#allocation82_spill] sm:$0xff] }
 0x2bf   : > { %5812 = vst [vmem:[#allocation25_spill] sm:$0xff] %v5094_v51  ;;  %1981 = vadd.xlane.f32.xlu1 %v1980_v42  ;;  %v1935_v35 = vadd.f32 %v5094_v51, %v5091_v0  ;;  %v5102_v6 = vmul.f32 %v3332_v36, %v5813_v9  ;;  %v5816_v42 = vld [vmem:[#allocation80_spill] sm:$0xff] }
 0x2c0   : > { %v3334_v54 = vpop.eup %3333 }
 0x2c1   : > { %5814 = vst [vmem:[#allocation27_spill] sm:$0xff] %v5102_v6  ;;  %1936 = vadd.xlane.f32.xlu0 %v1935_v35  ;;  %v3336_v52 = vpop.eup %3335  ;;  %v1938_v31 = vadd.f32 %v5102_v6, %v5099_v45  ;;  %v5107_v23 = vmul.f32 %v3334_v54, %v5815_v20  ;;  %v5819_v35 = vld [vmem:[#allocation83_spill] sm:$0xff]  ;;  %v5820_v20 = vld [vmem:[#allocation84_spill] sm:$0xff]  ;;  %v2022_v6 = vsub.f32 0.0, %v4680_v3 }
 0x2c2   : > { %v5110_v59 = vmul.f32 %v3336_v52, %v5816_v42  ;;  %v3338_v5 = vpop.eup %3337  ;;  %v2021_v52 = vsub.f32 0.0, %v5820_v20  ;;  %v2024_v20 = vsub.f32 0.0, %v4702_v44  ;;  %v1989_v3 = vld [vmem:[%s5447_s1] sm:$0xff] }
 0x2c3   : > { %1939 = vadd.xlane.f32.xlu1 %v1938_v31  ;;  %v3340_v51 = vpop.eup %3339  ;;  %v5115_v36 = vmul.f32 %v3338_v5, %v5818_v26  ;;  %v2037_v31 = vsub.f32 0.0, %v4682_v32  ;;  %v2038_v5 = vsub.f32 0.0, %v4692_v60  ;;  %v2055_v26 = vmul.f32 1.442695, %v2022_v6  ;;  %v2005_v44 = vld [vmem:[%s5447_s1 + $0x80] sm:$0xff] }
 0x2c4   : > { %5817 = vst [vmem:[#allocation22_spill] sm:$0xff] %v5110_v59  ;;  %v1983_v12 = vadd.f32 %v5110_v59, %v5107_v23  ;;  %v5118_v9 = vmul.f32 %v3340_v51, %v5819_v35  ;;  %v2053_v42 = vmul.f32 1.442695, %v2021_v52  ;;  %v2023_v51 = vsub.f32 0.0, %v4694_v27 }
 0x2c5   : > { %v2085_v59 = vmul.f32 1.442695, %v2037_v31  ;;  %v2040_v60 = vsub.f32 0.0, %v4712_v40  ;;  %v2059_v6 = vmul.f32 1.442695, %v2024_v20  ;;  %v2025_v27 = vsub.f32 0.0, %v4718_v38 }
 0x2c6   : > { %1984 = vadd.xlane.f32.xlu0 %v1983_v12  ;;  %v1986_v54 = vadd.f32 %v5118_v9, %v5115_v36  ;;  %3341 = vpow2.f32 %v2053_v42  ;;  %v2087_v12 = vmul.f32 1.442695, %v2038_v5  ;;  %v2057_v35 = vmul.f32 1.442695, %v2023_v51  ;;  %v1990_v40 = vld [vmem:[%s5447_s1 + $0x8] sm:$0xff] }
 0x2c7   : > { %3343 = vpow2.f32 %v2085_v59  ;;  %v2061_v51 = vmul.f32 1.442695, %v2025_v27  ;;  %v2042_v27 = vsub.f32 0.0, %v4738_v15 }
 0x2c8   : > { %1987 = vadd.xlane.f32.xlu1 %v1986_v54  ;;  %3345 = vpow2.f32 %v2055_v26  ;;  %v2039_v54 = vsub.f32 0.0, %v4704_v39  ;;  %v2091_v39 = vmul.f32 1.442695, %v2040_v60  ;;  %v2006_v60 = vld [vmem:[%s5447_s1 + $0x88] sm:$0xff] }
 0x2c9   : > { %3347 = vpow2.f32 %v2087_v12  ;;  %v2041_v12 = vsub.f32 0.0, %v4728_v30 }
 0x2ca   : > { %3349 = vpow2.f32 %v2057_v35  ;;  %v2089_v52 = vmul.f32 1.442695, %v2039_v54 }
 0x2cb   : > { %v2093_v30 = vmul.f32 1.442695, %v2041_v12 }
 0x2cc   : > { %3351 = vpow2.f32 %v2089_v52 }
 0x2cd   : > { %3353 = vpow2.f32 %v2059_v6 }
 0x2d3   : > { %v3342_v32 = vpop.eup %3341 }
 0x2d4   : > { %v2117_v59 = vmul.f32 %v3342_v32, %v1989_v3  ;;  %v3344_v31 = vpop.eup %3343  ;;  %v2026_v32 = vsub.f32 0.0, %v4720_v62 }
 0x2d5   : > { %v3346_v26 = vpop.eup %3345  ;;  %v2133_v38 = vmul.f32 %v3344_v31, %v2005_v44 }
 0x2d6   : > { %v3348_v20 = vpop.eup %3347  ;;  %v2118_v52 = vmul.f32 %v3346_v26, %v1990_v40  ;;  %v2095_v40 = vmul.f32 1.442695, %v2042_v27 }
 0x2d7   : > { %v3350_v6 = vpop.eup %3349  ;;  %v2134_v31 = vmul.f32 %v3348_v20, %v2006_v60  ;;  %v2043_v20 = vsub.f32 0.0, %v4782_v49  ;;  %v2008_v49 = vld [vmem:[%s5447_s1 + $0x98] sm:$0xff] }
 0x2d9   : > { %v3352_v12 = vpop.eup %3351 }
 0x30b   : > { %v1895_v42 = vpop.xlane.xlu0 %1894 }
 0x30c   : > { %v2149_v5 = vadd.f32 %v2117_v59, %v1895_v42  ;;  %v1991_v42 = vld [vmem:[%s5447_s1 + $0x10] sm:$0xff] }
 0x30d   : > { %v2119_v26 = vmul.f32 %v3350_v6, %v1991_v42  ;;  %v2028_v6 = vsub.f32 0.0, %v4768_v53  ;;  %v2097_v42 = vmul.f32 1.442695, %v2043_v20 }
 0x30e   : > { %3355 = vrcp.f32 %v2149_v5  ;;  %v1898_v35 = vpop.xlane.xlu1 %1897  ;;  %v2027_v5 = vsub.f32 0.0, %v4753_v13  ;;  %v1992_v13 = vld [vmem:[%s5447_s1 + $0x18] sm:$0xff] }
 0x30f   : > { %3357 = vpow2.f32 %v2091_v39  ;;  %v2150_v59 = vadd.f32 %v2118_v52, %v1898_v35  ;;  %v2063_v39 = vmul.f32 1.442695, %v2026_v32  ;;  %v3354_v35 = vpop.eup %3353  ;;  %v2067_v53 = vmul.f32 1.442695, %v2028_v6 }
 0x310   : > { %v1943_v54 = vpop.xlane.xlu0 %1942  ;;  %3359 = vpow2.f32 %v2061_v51  ;;  %v2120_v27 = vmul.f32 %v3354_v35, %v1992_v13  ;;  %v2009_v13 = vld [vmem:[%s5447_s1 + $0xa0] sm:$0xff] }
 0x311   : > { %v2165_v3 = vadd.f32 %v2133_v38, %v1943_v54  ;;  %v2007_v38 = vld [vmem:[%s5447_s1 + $0x90] sm:$0xff]  ;;  %v2065_v54 = vmul.f32 1.442695, %v2027_v5  ;;  %v1993_v5 = vld [vmem:[%s5447_s1 + $0x20] sm:$0xff] }
 0x312   : > { %v1946_v62 = vpop.xlane.xlu1 %1945  ;;  %v2135_v52 = vmul.f32 %v3352_v12, %v2007_v38 }
 0x313   : > { %3361 = vrcp.f32 %v2165_v3  ;;  %v2166_v44 = vadd.f32 %v2134_v31, %v1946_v62 }
 0x314   : > { %3363 = vpow2.f32 %v2093_v30  ;;  %v1901_v51 = vpop.xlane.xlu0 %1900 }
 0x315   : > { %3365 = vrcp.f32 %v2150_v59  ;;  %v2151_v15 = vadd.f32 %v2119_v26, %v1901_v51  ;;  %v2029_v51 = vsub.f32 0.0, %v4809_v10 }
 0x316   : > { %3367 = vrcp.f32 %v2166_v44  ;;  %v1904_v3 = vpop.xlane.xlu1 %1903 }
 0x317   : > { %3369 = vpow2.f32 %v2063_v39  ;;  %v2044_v39 = vsub.f32 0.0, %v4794_v41  ;;  %v2152_v62 = vadd.f32 %v2120_v27, %v1904_v3  ;;  %v2069_v10 = vmul.f32 1.442695, %v2029_v51 }
 0x318   : > { %3371 = vpow2.f32 %v2095_v40  ;;  %v1949_v60 = vpop.xlane.xlu0 %1948 }
 0x319   : > { %3373 = vrcp.f32 %v2151_v15  ;;  %v2167_v59 = vadd.f32 %v2135_v52, %v1949_v60  ;;  %v2099_v35 = vmul.f32 1.442695, %v2044_v39  ;;  %v2030_v52 = vsub.f32 0.0, %v4824_v4 }
 0x31a   : > { %3375 = vpow2.f32 %v2065_v54  ;;  %v1952_v40 = vpop.xlane.xlu1 %1951  ;;  %v2045_v60 = vsub.f32 0.0, %v4838_v33  ;;  %v2010_v33 = vld [vmem:[%s5447_s1 + $0xa8] sm:$0xff] }
 0x31b   : > { %v3356_v32 = vpop.eup %3355  ;;  %3377 = vrcp.f32 %v2167_v59 }
 0x31c   : > { %2215 = vperm.xlu0 %3083, %v3356_v32   ;;  %v3358_v30 = vpop.eup %3357  ;;  %3379 = vpow2.f32 %v2097_v42  ;;  %v1907_v41 = vpop.xlane.xlu0 %1906 }
 0x31d   : > { %v3360_v31 = vpop.eup %3359  ;;  %v2136_v44 = vmul.f32 %v3358_v30, %v2008_v49  ;;  %3381 = vrcp.f32 %v2152_v62  ;;  %v1994_v30 = vld [vmem:[%s5447_s1 + $0x28] sm:$0xff]  ;;  %v2101_v62 = vmul.f32 1.442695, %v2045_v60 }
 0x31e   : > { %v2121_v15 = vmul.f32 %v3360_v31, %v1993_v5  ;;  %v2071_v31 = vmul.f32 1.442695, %v2030_v52  ;;  %v2011_v52 = vld [vmem:[%s5447_s1 + $0xb0] sm:$0xff] }
 0x31f   : > { %v2168_v12 = vadd.f32 %v2136_v44, %v1952_v40  ;;  %v1910_v59 = vpop.xlane.xlu1 %1909  ;;  %v2046_v44 = vsub.f32 0.0, %v4850_v48  ;;  %v2032_v48 = vsub.f32 0.0, %v4880_v47  ;;  %v1996_v47 = vld [vmem:[%s5447_s1 + $0x38] sm:$0xff] }
 0x320   : > { %v3362_v26 = vpop.eup %3361  ;;  %v2153_v20 = vadd.f32 %v2121_v15, %v1907_v41  ;;  %v2031_v15 = vsub.f32 0.0, %v4865_v8 }
 0x321   : > { %2295 = vperm.xlu1 %3084, %v3362_v26   ;;  %v3364_v38 = vpop.eup %3363  ;;  %3383 = vrcp.f32 %v2168_v12  ;;  %v1955_v49 = vpop.xlane.xlu0 %1954 }
 0x322   : > { %v3366_v54 = vpop.eup %3365  ;;  %3385 = vpow2.f32 %v2067_v53  ;;  %v2137_v6 = vmul.f32 %v3364_v38, %v2009_v13  ;;  %v1995_v53 = vld [vmem:[%s5447_s1 + $0x30] sm:$0xff]  ;;  %v2073_v60 = vmul.f32 1.442695, %v2031_v15 }
 0x323   : > { %v3368_v32 = vpop.eup %3367  ;;  %3387 = vpow2.f32 %v2099_v35 }
 0x324   : > { %v3370_v3 = vpop.eup %3369  ;;  %2300 = vperm.xlu0 %3083, %v3368_v32   ;;  %3389 = vrcp.f32 %v2153_v20  ;;  %v2169_v4 = vadd.f32 %v2137_v6, %v1955_v49  ;;  %v2075_v6 = vmul.f32 1.442695, %v2032_v48 }
 0x325   : > { %2220 = vperm.xlu1 %3084, %v3366_v54   ;;  %v3372_v27 = vpop.eup %3371  ;;  %v2122_v39 = vmul.f32 %v3370_v3, %v1994_v30  ;;  %3391 = vpow2.f32 %v2069_v10  ;;  %v1958_v12 = vpop.xlane.xlu1 %1957  ;;  %v2103_v54 = vmul.f32 1.442695, %v2046_v44  ;;  %v2047_v10 = vsub.f32 0.0, %v4896_v56 }
 0x326   : > { %v3374_v42 = vpop.eup %3373  ;;  %3393 = vrcp.f32 %v2169_v4  ;;  %v2138_v40 = vmul.f32 %v3372_v27, %v2010_v33  ;;  %v2048_v30 = vsub.f32 0.0, %v4908_v50  ;;  %v2033_v56 = vsub.f32 0.0, %v4932_v46  ;;  %v2012_v50 = vld [vmem:[%s5447_s1 + $0xb8] sm:$0xff] }
 0x327   : > { %v3376_v5 = vpop.eup %3375  ;;  %v2154_v26 = vadd.f32 %v2122_v39, %v1910_v59  ;;  %3395 = vpow2.f32 %v2071_v31  ;;  %v1913_v20 = vpop.xlane.xlu0 %1912  ;;  %v2105_v39 = vmul.f32 1.442695, %v2047_v10  ;;  %v2050_v10 = vsub.f32 0.0, %v4968_v22 }
 0x328   : > { %v3378_v51 = vpop.eup %3377  ;;  %3397 = vpow2.f32 %v2101_v62  ;;  %v2170_v38 = vadd.f32 %v2138_v40, %v1958_v12  ;;  %v2123_v35 = vmul.f32 %v3376_v5, %v1995_v53  ;;  %v2107_v62 = vmul.f32 1.442695, %v2048_v30 }
 0x329   : > { %2225 = vperm.xlu1 %3084, %v3374_v42   ;;  %v3380_v41 = vpop.eup %3379  ;;  %3399 = vrcp.f32 %v2154_v26  ;;  %v1916_v49 = vpop.xlane.xlu1 %1915  ;;  %v1997_v26 = vld [vmem:[%s5447_s1 + $0x40] sm:$0xff]  ;;  %v2077_v46 = vmul.f32 1.442695, %v2033_v56  ;;  %v2111_v22 = vmul.f32 1.442695, %v2050_v10  ;;  %v1999_v56 = vld [vmem:[%s5447_s1 + $0x50] sm:$0xff] }
 0x32a   : > { %v3382_v13 = vpop.eup %3381  ;;  %3401 = vrcp.f32 %v2170_v38  ;;  %v2155_v32 = vadd.f32 %v2123_v35, %v1913_v20  ;;  %v2139_v27 = vmul.f32 %v3380_v41, %v2011_v52  ;;  %v2049_v38 = vsub.f32 0.0, %v4959_v57 }
 0x32b   : > { %3403 = vpow2.f32 %v2103_v54  ;;  %v1961_v42 = vpop.xlane.xlu0 %1960 }
 0x32c   : > { %3405 = vrcp.f32 %v2155_v32  ;;  %v2171_v33 = vadd.f32 %v2139_v27, %v1961_v42  ;;  %v1998_v32 = vld [vmem:[%s5447_s1 + $0x48] sm:$0xff]  ;;  %v2109_v57 = vmul.f32 1.442695, %v2049_v38 }
 0x32d   : > { %2305 = vperm.xlu1 %3084, %v3378_v51   ;;  %3407 = vpow2.f32 %v2073_v60  ;;  %v2034_v51 = vsub.f32 0.0, %v4940_v14  ;;  %v2013_v14 = vld [vmem:[%s5447_s1 + $0xc0] sm:$0xff] }
 0x32e   : > { %v3384_v3 = vpop.eup %3383  ;;  %3409 = vpow2.f32 %v2075_v6  ;;  %v1964_v12 = vpop.xlane.xlu1 %1963 }
 0x32f   : > { %v3386_v8 = vpop.eup %3385  ;;  %2310 = vperm.xlu0 %3083, %v3384_v3   ;;  %3411 = vrcp.f32 %v2171_v33  ;;  %v2079_v3 = vmul.f32 1.442695, %v2034_v51  ;;  %v2051_v51 = vsub.f32 0.0, %v5013_v58 }
 0x330   : > { %v3388_v59 = vpop.eup %3387  ;;  %v2124_v4 = vmul.f32 %v3386_v8, %v1996_v47  ;;  %3413 = vpow2.f32 %v2105_v39  ;;  %v1919_v48 = vpop.xlane.xlu0 %1918 }
 0x331   : > { %2230 = vperm.xlu1 %3084, %v3382_v13   ;;  %v3390_v31 = vpop.eup %3389  ;;  %v2140_v53 = vmul.f32 %v3388_v59, %v2012_v50  ;;  %3415 = vpow2.f32 %v2107_v62  ;;  %v2035_v59 = vsub.f32 0.0, %v4988_v21  ;;  %v2036_v62 = vsub.f32 0.0, %v4996_v7 }
 0x332   : > { %v3392_v5 = vpop.eup %3391  ;;  %v2156_v44 = vadd.f32 %v2124_v4, %v1916_v49 }
 0x333   : > { %v3394_v40 = vpop.eup %3393  ;;  %v2172_v35 = vadd.f32 %v2140_v53, %v1964_v12  ;;  %v2125_v41 = vmul.f32 %v3392_v5, %v1997_v26  ;;  %v1922_v47 = vpop.xlane.xlu1 %1921  ;;  %v2081_v21 = vmul.f32 1.442695, %v2035_v59  ;;  %v2002_v59 = vld [vmem:[%s5447_s1 + $0x68] sm:$0xff] }
 0x334   : > { %v3396_v15 = vpop.eup %3395  ;;  %3417 = vrcp.f32 %v2156_v44  ;;  %v1967_v6 = vpop.xlane.xlu0 %1966  ;;  %v2000_v44 = vld [vmem:[%s5447_s1 + $0x58] sm:$0xff] }
 0x335   : > { %2235 = vperm.xlu1 %3084, %v3390_v31   ;;  %v3398_v54 = vpop.eup %3397  ;;  %3419 = vrcp.f32 %v2172_v35  ;;  %v2157_v13 = vadd.f32 %v2125_v41, %v1919_v48  ;;  %v2126_v8 = vmul.f32 %v3396_v15, %v1998_v32  ;;  %v2014_v31 = vld [vmem:[%s5447_s1 + $0xc8] sm:$0xff]  ;;  %v2015_v15 = vld [vmem:[%s5447_s1 + $0xd0] sm:$0xff] }
 0x336   : > { %v3400_v20 = vpop.eup %3399  ;;  %3421 = vpow2.f32 %v2077_v46  ;;  %v2141_v60 = vmul.f32 %v3398_v54, %v2013_v14  ;;  %v2083_v54 = vmul.f32 1.442695, %v2036_v62  ;;  %v2113_v14 = vmul.f32 1.442695, %v2051_v51 }
 0x337   : > { %v3402_v52 = vpop.eup %3401  ;;  %3423 = vrcp.f32 %v2157_v13  ;;  %v2158_v49 = vadd.f32 %v2126_v8, %v1922_v47 }
 0x338   : > { %2320 = vperm.xlu0 %3083, %v3402_v52   ;;  %v3404_v30 = vpop.eup %3403  ;;  %3425 = vpow2.f32 %v2079_v3  ;;  %v2173_v42 = vadd.f32 %v2141_v60, %v1967_v6  ;;  %v1970_v5 = vpop.xlane.xlu1 %1969  ;;  %v2052_v52 = vsub.f32 0.0, %v5032_v24 }
 0x339   : > { %2315 = vperm.xlu1 %3084, %v3394_v40   ;;  %v3406_v27 = vpop.eup %3405  ;;  %3427 = vpow2.f32 %v2109_v57  ;;  %v2142_v33 = vmul.f32 %v3404_v30, %v2014_v31  ;;  %v2001_v57 = vld [vmem:[%s5447_s1 + $0x60] sm:$0xff] }
 0x33a   : > { %v3408_v39 = vpop.eup %3407  ;;  %3429 = vrcp.f32 %v2158_v49  ;;  %v1925_v12 = vpop.xlane.xlu0 %1924  ;;  %v2115_v49 = vmul.f32 1.442695, %v2052_v52  ;;  %v2019_v52 = vld [vmem:[%s5447_s1 + $0xf0] sm:$0xff] }
 0x33b   : > { %v3410_v4 = vpop.eup %3409  ;;  %3431 = vrcp.f32 %v2173_v42  ;;  %v2174_v53 = vadd.f32 %v2142_v33, %v1970_v5  ;;  %v2127_v40 = vmul.f32 %v3408_v39, %v1999_v56  ;;  %v2018_v5 = vld [vmem:[%s5447_s1 + $0xe8] sm:$0xff] }
 0x33c   : > { %v3412_v50 = vpop.eup %3411  ;;  %3433 = vpow2.f32 %v2111_v22  ;;  %v2128_v35 = vmul.f32 %v3410_v4, %v2000_v44  ;;  %v1928_v48 = vpop.xlane.xlu1 %1927  ;;  %v2017_v4 = vld [vmem:[%s5447_s1 + $0xe0] sm:$0xff] }
 0x33d   : > { %2240 = vperm.xlu1 %3084, %v3400_v20   ;;  %v3414_v26 = vpop.eup %3413  ;;  %3435 = vrcp.f32 %v2174_v53  ;;  %v2159_v7 = vadd.f32 %v2127_v40, %v1925_v12  ;;  %v2016_v20 = vld [vmem:[%s5447_s1 + $0xd8] sm:$0xff]  ;;  %v2003_v12 = vld [vmem:[%s5447_s1 + $0x70] sm:$0xff] }
 0x33e   : > { %v3416_v46 = vpop.eup %3415  ;;  %3437 = vpow2.f32 %v2081_v21  ;;  %v2160_v13 = vadd.f32 %v2128_v35, %v1928_v48  ;;  %v2143_v58 = vmul.f32 %v3414_v26, %v2015_v15  ;;  %v1973_v3 = vpop.xlane.xlu0 %1972 }
 0x33f   : > { %3439 = vrcp.f32 %v2159_v7  ;;  %v2144_v8 = vmul.f32 %v3416_v46, %v2016_v20 }
 0x340   : > { %3441 = vrcp.f32 %v2160_v13  ;;  %v2175_v10 = vadd.f32 %v2143_v58, %v1973_v3  ;;  %v1976_v30 = vpop.xlane.xlu1 %1975 }
 0x341   : > { %2245 = vperm.xlu1 %3084, %v3406_v27   ;;  %v3418_v38 = vpop.eup %3417  ;;  %3443 = vpow2.f32 %v2083_v54  ;;  %v2176_v6 = vadd.f32 %v2144_v8, %v1976_v30  ;;  %v2004_v54 = vld [vmem:[%s5447_s1 + $0x78] sm:$0xff] }
 0x342   : > { %v3420_v41 = vpop.eup %3419  ;;  %3445 = vrcp.f32 %v2175_v10  ;;  %v1931_v42 = vpop.xlane.xlu0 %1930  ;;  %v2020_v30 = vld [vmem:[%s5447_s1 + $0xf8] sm:$0xff] }
 0x343   : > { %2330 = vperm.xlu0 %3083, %v3420_v41   ;;  %v3422_v32 = vpop.eup %3421  ;;  %3447 = vpow2.f32 %v2113_v14 }
 0x344   : > { %v3424_v60 = vpop.eup %3423  ;;  %v2129_v27 = vmul.f32 %v3422_v32, %v2001_v57  ;;  %3449 = vrcp.f32 %v2176_v6  ;;  %v1934_v33 = vpop.xlane.xlu1 %1933 }
 0x345   : > { %2325 = vperm.xlu1 %3084, %v3412_v50   ;;  %v3426_v47 = vpop.eup %3425 }
 0x346   : > { %v3428_v24 = vpop.eup %3427  ;;  %v2161_v39 = vadd.f32 %v2129_v27, %v1931_v42  ;;  %v2130_v56 = vmul.f32 %v3426_v47, %v2002_v59  ;;  %v1979_v26 = vpop.xlane.xlu0 %1978 }
 0x347   : > { %v3430_v31 = vpop.eup %3429  ;;  %v2145_v62 = vmul.f32 %v3428_v24, %v2017_v4 }
 0x348   : > { %v3432_v22 = vpop.eup %3431  ;;  %2260 = vperm.xlu0 %3083, %v3430_v31   ;;  %3451 = vrcp.f32 %v2161_v39  ;;  %v2162_v50 = vadd.f32 %v2130_v56, %v1934_v33  ;;  %v1982_v15 = vpop.xlane.xlu1 %1981 }
 0x349   : > { %2250 = vperm.xlu1 %3084, %v3418_v38   ;;  %3453 = vpow2.f32 %v2115_v49  ;;  %v3434_v21 = vpop.eup %3433  ;;  %v2177_v40 = vadd.f32 %v2145_v62, %v1979_v26 }
 0x34a   : > { %v3436_v44 = vpop.eup %3435  ;;  %3455 = vrcp.f32 %v2162_v50  ;;  %v2146_v51 = vmul.f32 %v3434_v21, %v2018_v5  ;;  %v1937_v20 = vpop.xlane.xlu0 %1936 }
 0x34b   : > { %v3438_v53 = vpop.eup %3437  ;;  %3457 = vrcp.f32 %v2177_v40 }
 0x34c   : > { %2340 = vperm.xlu0 %3083, %v3436_v44   ;;  %v3440_v46 = vpop.eup %3439  ;;  %v2178_v7 = vadd.f32 %v2146_v51, %v1982_v15  ;;  %v2131_v41 = vmul.f32 %v3438_v53, %v2003_v12  ;;  %v1940_v3 = vpop.xlane.xlu1 %1939  ;;  %v5821_v44 = vld [vmem:[#allocation87_spill] sm:$0xff]  ;;  %v5822_v53 = vld [vmem:[#allocation85_spill] sm:$0xff]  ;;  %v5824_v12 = vld [vmem:[#allocation88_spill] sm:$0xff] }
 0x34d   : > { %2255 = vperm.xlu1 %3084, %v3424_v60   ;;  %v3442_v38 = vpop.eup %3441 }
 0x34e   : > { %v3444_v35 = vpop.eup %3443  ;;  %3459 = vrcp.f32 %v2178_v7  ;;  %v2163_v58 = vadd.f32 %v2131_v41, %v1937_v20 }
 0x34f   : > { %v3446_v48 = vpop.eup %3445  ;;  %v2132_v14 = vmul.f32 %v3444_v35, %v2004_v54  ;;  %v1985_v47 = vpop.xlane.xlu0 %1984  ;;  %v5826_v35 = vld [vmem:[#allocation90_spill] sm:$0xff]  ;;  %v5827_v54 = vld [vmem:[#allocation91_spill] sm:$0xff] }
 0x350   : > { %2270 = vperm.xlu0 %3083, %v3442_v38   ;;  %v3448_v13 = vpop.eup %3447  ;;  %3461 = vrcp.f32 %v2163_v58  ;;  %v5825_v38 = vld [vmem:[#allocation89_spill] sm:$0xff] }
 0x351   : > { %2335 = vperm.xlu1 %3084, %v3432_v22   ;;  %v3450_v32 = vpop.eup %3449  ;;  %v2164_v10 = vadd.f32 %v2132_v14, %v1940_v3  ;;  %v2147_v60 = vmul.f32 %v3448_v13, %v2019_v52  ;;  %v1988_v24 = vpop.xlane.xlu1 %1987  ;;  %v5828_v13 = vld [vmem:[#allocation8_spill] sm:$0xff] }
 0x353   : > { %3463 = vrcp.f32 %v2164_v10  ;;  %v2179_v27 = vadd.f32 %v2147_v60, %v1985_v47 }
 0x354   : > { %2350 = vperm.xlu0 %3083, %v3450_v32   ;;  %v5829_v32 = vld [vmem:[#allocation9_spill] sm:$0xff] }
 0x355   : > { %2265 = vperm.xlu1 %3084, %v3440_v46   ;;  %v3452_v57 = vpop.eup %3451  ;;  %3465 = vrcp.f32 %v2179_v27  ;;  %v5823_v46 = vld [vmem:[#allocation86_spill] sm:$0xff] }
 0x356   : > { %v3454_v8 = vpop.eup %3453 }
 0x357   : > { %v3456_v6 = vpop.eup %3455  ;;  %v2148_v59 = vmul.f32 %v3454_v8, %v2020_v30  ;;  %v5831_v8 = vld [vmem:[#allocation33_spill] sm:$0xff]  ;;  %v5832_v30 = vld [vmem:[#allocation92_spill] sm:$0xff] }
 0x358   : > { %2280 = vperm.xlu0 %3083, %v3456_v6   ;;  %v3458_v49 = vpop.eup %3457  ;;  %v5833_v6 = vld [vmem:[#allocation11_spill] sm:$0xff] }
 0x359   : > { %2345 = vperm.xlu1 %3084, %v3446_v48   ;;  %v2180_v42 = vadd.f32 %v2148_v59, %v1988_v24  ;;  %v5834_v24 = vld [vmem:[#allocation10_spill] sm:$0xff] }
 0x35b   : > { %3467 = vrcp.f32 %v2180_v42  ;;  %v3460_v31 = vpop.eup %3459  ;;  %v5835_v42 = vld [vmem:[#allocation12_spill] sm:$0xff] }
 0x35c   : > { %2360 = vperm.xlu0 %3083, %v3460_v31  }
 0x35d   : > { %2275 = vperm.xlu1 %3084, %v3452_v57   ;;  %v3462_v39 = vpop.eup %3461  ;;  %v5830_v57 = vld [vmem:[#allocation30_spill] sm:$0xff] }
 0x360   : > { %v3464_v22 = vpop.eup %3463 }
 0x361   : > { %2355 = vperm.xlu1 %3084, %v3458_v49   ;;  %2290 = vperm.xlu0 %3083, %v3464_v22   ;;  %v5836_v22 = vld [vmem:[#allocation38_spill] sm:$0xff] }
 0x362   : > { %v3466_v56 = vpop.eup %3465 }
 0x365   : > { %2285 = vperm.xlu1 %3084, %v3462_v39  }
 0x368   : > { %v3468_v4 = vpop.eup %3467 }
 0x369   : > { %2365 = vperm.xlu1 %3084, %v3466_v56   ;;  %2370 = vperm.xlu0 %3083, %v3468_v4   ;;  %v5837_v4 = vld [vmem:[#allocation15_spill] sm:$0xff] }
 0x397   : > { %v2216_v33 = vpop.permute.xlu0 %2215 }
 0x398   : > { %v2373_v50 = vmul.f32 %v2216_v33, %v4733_v11  ;;  %v2374_v21 = vmul.f32 %v2216_v33, %v4736_v37 }
 0x39a   : > { %2437 = vst [vmem:[%s5255_s28] sm:$0xff] %v2373_v50  ;;  %2438 = vst [vmem:[%s5255_s28 + $0x8] sm:$0xff] %v2374_v21 }
 0x39c   : > { %v2296_v62 = vpop.permute.xlu1 %2295 }
 0x39d   : > { %v2405_v5 = vmul.f32 %v2296_v62, %v4759_v17  ;;  %v2406_v26 = vmul.f32 %v2296_v62, %v5821_v44  ;;  %v5838_v62 = vld [vmem:[#allocation42_spill] sm:$0xff] }
 0x39e   : > { %v5839_v44 = vld [vmem:[#allocation46_spill] sm:$0xff] }
 0x39f   : > { %2469 = vst [vmem:[%s5255_s28 + $0x100] sm:$0xff] %v2405_v5  ;;  %2470 = vst [vmem:[%s5255_s28 + $0x108] sm:$0xff] %v2406_v26  ;;  %v2301_v37 = vpop.permute.xlu0 %2300 }
 0x3a0   : > { %v2221_v11 = vpop.permute.xlu1 %2220  ;;  %v2407_v15 = vmul.f32 %v2301_v37, %v5824_v12  ;;  %v2408_v7 = vmul.f32 %v2301_v37, %v5825_v38 }
 0x3a1   : > { %v2375_v40 = vmul.f32 %v2221_v11, %v5822_v53  ;;  %v2376_v51 = vmul.f32 %v2221_v11, %v5823_v46  ;;  %v5840_v11 = vld [vmem:[#allocation34_spill] sm:$0xff]  ;;  %v5841_v53 = vld [vmem:[#allocation13_spill] sm:$0xff] }
 0x3a2   : > { %2471 = vst [vmem:[%s5255_s28 + $0x110] sm:$0xff] %v2407_v15  ;;  %2472 = vst [vmem:[%s5255_s28 + $0x118] sm:$0xff] %v2408_v7  ;;  %v5843_v15 = vld [vmem:[#allocation41_spill] sm:$0xff] }
 0x3a3   : > { %2439 = vst [vmem:[%s5255_s28 + $0x10] sm:$0xff] %v2375_v40  ;;  %2440 = vst [vmem:[%s5255_s28 + $0x18] sm:$0xff] %v2376_v51  ;;  %v5842_v51 = vld [vmem:[#allocation37_spill] sm:$0xff] }
 0x3a4   : > { %v2226_v17 = vpop.permute.xlu1 %2225 }
 0x3a5   : > { %v2377_v41 = vmul.f32 %v2226_v17, %v5826_v35  ;;  %v2378_v48 = vmul.f32 %v2226_v17, %v5827_v54  ;;  %v5844_v17 = vld [vmem:[#allocation14_spill] sm:$0xff] }
 0x3a7   : > { %2441 = vst [vmem:[%s5255_s28 + $0x20] sm:$0xff] %v2377_v41  ;;  %2442 = vst [vmem:[%s5255_s28 + $0x28] sm:$0xff] %v2378_v48  ;;  %v5845_v41 = vld [vmem:[#allocation16_spill] sm:$0xff] }
 0x3a8   : > { %v2306_v20 = vpop.permute.xlu1 %2305 }
 0x3a9   : > { %v2409_v58 = vmul.f32 %v2306_v20, %v5828_v13  ;;  %v2410_v14 = vmul.f32 %v2306_v20, %v5829_v32  ;;  %v5846_v13 = vld [vmem:[#allocation45_spill] sm:$0xff] }
 0x3aa   : > { %v2311_v52 = vpop.permute.xlu0 %2310  ;;  %v5847_v32 = vld [vmem:[#allocation49_spill] sm:$0xff] }
 0x3ab   : > { %2473 = vst [vmem:[%s5255_s28 + $0x120] sm:$0xff] %v2409_v58  ;;  %2474 = vst [vmem:[%s5255_s28 + $0x128] sm:$0xff] %v2410_v14  ;;  %v2411_v10 = vmul.f32 %v2311_v52, %v5830_v57  ;;  %v2412_v60 = vmul.f32 %v2311_v52, %v5831_v8  ;;  %v5848_v52 = vld [vmem:[#allocation17_spill] sm:$0xff]  ;;  %v5849_v57 = vld [vmem:[#allocation19_spill] sm:$0xff] }
 0x3ac   : > { %v2231_v3 = vpop.permute.xlu1 %2230 }
 0x3ad   : > { %v2379_v47 = vmul.f32 %v2231_v3, %v5832_v30  ;;  %v2380_v27 = vmul.f32 %v2231_v3, %v5833_v6  ;;  %2475 = vst [vmem:[%s5255_s28 + $0x130] sm:$0xff] %v2411_v10  ;;  %2476 = vst [vmem:[%s5255_s28 + $0x138] sm:$0xff] %v2412_v60  ;;  %v5850_v60 = vld [vmem:[#allocation18_spill] sm:$0xff] }
 0x3af   : > { %2443 = vst [vmem:[%s5255_s28 + $0x30] sm:$0xff] %v2379_v47  ;;  %2444 = vst [vmem:[%s5255_s28 + $0x38] sm:$0xff] %v2380_v27  ;;  %v5851_v47 = vld [vmem:[#allocation20_spill] sm:$0xff] }
 0x3b0   : > { %v2236_v59 = vpop.permute.xlu1 %2235 }
 0x3b1   : > { %v2381_v49 = vmul.f32 %v2236_v59, %v5834_v24  ;;  %v2382_v31 = vmul.f32 %v2236_v59, %v5835_v42  ;;  %v5852_v24 = vld [vmem:[#allocation50_spill] sm:$0xff] }
 0x3b3   : > { %2445 = vst [vmem:[%s5255_s28 + $0x40] sm:$0xff] %v2381_v49  ;;  %2446 = vst [vmem:[%s5255_s28 + $0x48] sm:$0xff] %v2382_v31  ;;  %v2321_v50 = vpop.permute.xlu0 %2320  ;;  %v5853_v31 = vld [vmem:[#allocation54_spill] sm:$0xff] }
 0x3b4   : > { %v2316_v39 = vpop.permute.xlu1 %2315  ;;  %v2415_v5 = vmul.f32 %v2321_v50, %v5838_v62  ;;  %v2416_v26 = vmul.f32 %v2321_v50, %v5839_v44  ;;  %v5855_v50 = vld [vmem:[#allocation58_spill] sm:$0xff] }
 0x3b5   : > { %v2413_v56 = vmul.f32 %v2316_v39, %v5836_v22  ;;  %v2414_v33 = vmul.f32 %v2316_v39, %v5837_v4  ;;  %v5854_v22 = vld [vmem:[#allocation21_spill] sm:$0xff] }
 0x3b6   : > { %2479 = vst [vmem:[%s5255_s28 + $0x150] sm:$0xff] %v2415_v5  ;;  %2480 = vst [vmem:[%s5255_s28 + $0x158] sm:$0xff] %v2416_v26  ;;  %v5856_v5 = vld [vmem:[#allocation23_spill] sm:$0xff] }
 0x3b7   : > { %2477 = vst [vmem:[%s5255_s28 + $0x140] sm:$0xff] %v2413_v56  ;;  %2478 = vst [vmem:[%s5255_s28 + $0x148] sm:$0xff] %v2414_v33 }
 0x3b8   : > { %v2241_v21 = vpop.permute.xlu1 %2240 }
 0x3b9   : > { %v2383_v37 = vmul.f32 %v2241_v21, %v5840_v11  ;;  %v2384_v40 = vmul.f32 %v2241_v21, %v5841_v53 }
 0x3bb   : > { %2447 = vst [vmem:[%s5255_s28 + $0x50] sm:$0xff] %v2383_v37  ;;  %2448 = vst [vmem:[%s5255_s28 + $0x58] sm:$0xff] %v2384_v40 }
 0x3bc   : > { %v2246_v46 = vpop.permute.xlu1 %2245 }
 0x3bd   : > { %v2385_v12 = vmul.f32 %v2246_v46, %v5842_v51  ;;  %v2386_v38 = vmul.f32 %v2246_v46, %v5843_v15 }
 0x3be   : > { %v2331_v48 = vpop.permute.xlu0 %2330 }
 0x3bf   : > { %2449 = vst [vmem:[%s5255_s28 + $0x60] sm:$0xff] %v2385_v12  ;;  %2450 = vst [vmem:[%s5255_s28 + $0x68] sm:$0xff] %v2386_v38  ;;  %v2419_v58 = vmul.f32 %v2331_v48, %v5846_v13  ;;  %v2420_v14 = vmul.f32 %v2331_v48, %v5847_v32  ;;  %v5861_v13 = vld [vmem:[#allocation25_spill] sm:$0xff]  ;;  %v5862_v32 = vld [vmem:[#allocation27_spill] sm:$0xff] }
 0x3c0   : > { %v2326_v7 = vpop.permute.xlu1 %2325 }
 0x3c1   : > { %v2417_v35 = vmul.f32 %v2326_v7, %v5844_v17  ;;  %v2418_v54 = vmul.f32 %v2326_v7, %v5845_v41  ;;  %2483 = vst [vmem:[%s5255_s28 + $0x170] sm:$0xff] %v2419_v58  ;;  %2484 = vst [vmem:[%s5255_s28 + $0x178] sm:$0xff] %v2420_v14  ;;  %v5859_v41 = vld [vmem:[#allocation57_spill] sm:$0xff] }
 0x3c3   : > { %2481 = vst [vmem:[%s5255_s28 + $0x160] sm:$0xff] %v2417_v35  ;;  %2482 = vst [vmem:[%s5255_s28 + $0x168] sm:$0xff] %v2418_v54  ;;  %v2261_v27 = vpop.permute.xlu0 %2260 }
 0x3c4   : > { %v2251_v20 = vpop.permute.xlu1 %2250  ;;  %v2391_v59 = vmul.f32 %v2261_v27, %v4975_v63  ;;  %v2392_v49 = vmul.f32 %v2261_v27, %v5852_v24 }
 0x3c5   : > { %v2387_v3 = vmul.f32 %v2251_v20, %v5848_v52  ;;  %v2388_v10 = vmul.f32 %v2251_v20, %v5849_v57 }
 0x3c6   : > { %2455 = vst [vmem:[%s5255_s28 + $0x90] sm:$0xff] %v2391_v59  ;;  %2456 = vst [vmem:[%s5255_s28 + $0x98] sm:$0xff] %v2392_v49 }
 0x3c7   : > { %2451 = vst [vmem:[%s5255_s28 + $0x70] sm:$0xff] %v2387_v3  ;;  %2452 = vst [vmem:[%s5255_s28 + $0x78] sm:$0xff] %v2388_v10  ;;  %v2341_v4 = vpop.permute.xlu0 %2340  ;;  %v5863_v3 = vld [vmem:[#allocation22_spill] sm:$0xff] }
 0x3c8   : > { %v2256_v8 = vpop.permute.xlu1 %2255  ;;  %v2423_v33 = vmul.f32 %v2341_v4, %v5003_v34  ;;  %v2424_v63 = vmul.f32 %v2341_v4, %v5855_v50 }
 0x3c9   : > { %v2389_v30 = vmul.f32 %v2256_v8, %v5850_v60  ;;  %v2390_v6 = vmul.f32 %v2256_v8, %v5851_v47 }
 0x3ca   : > { %2487 = vst [vmem:[%s5255_s28 + $0x190] sm:$0xff] %v2423_v33  ;;  %2488 = vst [vmem:[%s5255_s28 + $0x198] sm:$0xff] %v2424_v63 }
 0x3cb   : > { %2453 = vst [vmem:[%s5255_s28 + $0x80] sm:$0xff] %v2389_v30  ;;  %2454 = vst [vmem:[%s5255_s28 + $0x88] sm:$0xff] %v2390_v6  ;;  %v2271_v26 = vpop.permute.xlu0 %2270 }
 0x3cc   : > { %v2336_v42 = vpop.permute.xlu1 %2335  ;;  %v2395_v11 = vmul.f32 %v2271_v26, %v5023_v55  ;;  %v2396_v37 = vmul.f32 %v2271_v26, %v5028_v18  ;;  %v5858_v55 = vld [vmem:[#allocation53_spill] sm:$0xff] }
 0x3cd   : > { %v2421_v39 = vmul.f32 %v2336_v42, %v5853_v31  ;;  %v2422_v56 = vmul.f32 %v2336_v42, %v5854_v22 }
 0x3ce   : > { %2459 = vst [vmem:[%s5255_s28 + $0xb0] sm:$0xff] %v2395_v11  ;;  %2460 = vst [vmem:[%s5255_s28 + $0xb8] sm:$0xff] %v2396_v37 }
 0x3cf   : > { %2485 = vst [vmem:[%s5255_s28 + $0x180] sm:$0xff] %v2421_v39  ;;  %2486 = vst [vmem:[%s5255_s28 + $0x188] sm:$0xff] %v2422_v56  ;;  %v2351_v46 = vpop.permute.xlu0 %2350 }
 0x3d0   : > { %v2266_v21 = vpop.permute.xlu1 %2265  ;;  %v2427_v51 = vmul.f32 %v2351_v46, %v5045_v19  ;;  %v2428_v12 = vmul.f32 %v2351_v46, %v5858_v55 }
 0x3d1   : > { %v2393_v62 = vmul.f32 %v2266_v21, %v5011_v28  ;;  %v2394_v44 = vmul.f32 %v2266_v21, %v5856_v5  ;;  %v5857_v28 = vld [vmem:[#allocation62_spill] sm:$0xff] }
 0x3d2   : > { %2491 = vst [vmem:[%s5255_s28 + $0x1b0] sm:$0xff] %v2427_v51  ;;  %2492 = vst [vmem:[%s5255_s28 + $0x1b8] sm:$0xff] %v2428_v12 }
 0x3d3   : > { %2457 = vst [vmem:[%s5255_s28 + $0xa0] sm:$0xff] %v2393_v62  ;;  %2458 = vst [vmem:[%s5255_s28 + $0xa8] sm:$0xff] %v2394_v44  ;;  %v2281_v38 = vpop.permute.xlu0 %2280 }
 0x3d4   : > { %v2346_v34 = vpop.permute.xlu1 %2345  ;;  %v2399_v19 = vmul.f32 %v2281_v38, %v5067_v16  ;;  %v2400_v7 = vmul.f32 %v2281_v38, %v5070_v29  ;;  %v5860_v16 = vld [vmem:[#allocation61_spill] sm:$0xff] }
 0x3d5   : > { %v2425_v53 = vmul.f32 %v2346_v34, %v5035_v43  ;;  %v2426_v40 = vmul.f32 %v2346_v34, %v5857_v28 }
 0x3d6   : > { %2463 = vst [vmem:[%s5255_s28 + $0xd0] sm:$0xff] %v2399_v19  ;;  %2464 = vst [vmem:[%s5255_s28 + $0xd8] sm:$0xff] %v2400_v7 }
 0x3d7   : > { %2489 = vst [vmem:[%s5255_s28 + $0x1a0] sm:$0xff] %v2425_v53  ;;  %2490 = vst [vmem:[%s5255_s28 + $0x1a8] sm:$0xff] %v2426_v40 }
 0x3d8   : > { %v2276_v18 = vpop.permute.xlu1 %2275 }
 0x3d9   : > { %v2397_v15 = vmul.f32 %v2276_v18, %v5059_v2  ;;  %v2398_v43 = vmul.f32 %v2276_v18, %v5062_v61  ;;  %v2361_v61 = vpop.permute.xlu0 %2360 }
 0x3da   : > { %v2431_v54 = vmul.f32 %v2361_v61, %v5859_v41  ;;  %v2432_v29 = vmul.f32 %v2361_v61, %v5860_v16 }
 0x3db   : > { %2461 = vst [vmem:[%s5255_s28 + $0xc0] sm:$0xff] %v2397_v15  ;;  %2462 = vst [vmem:[%s5255_s28 + $0xc8] sm:$0xff] %v2398_v43 }
 0x3dc   : > { %v2356_v17 = vpop.permute.xlu1 %2355  ;;  %2495 = vst [vmem:[%s5255_s28 + $0x1d0] sm:$0xff] %v2431_v54  ;;  %2496 = vst [vmem:[%s5255_s28 + $0x1d8] sm:$0xff] %v2432_v29 }
 0x3dd   : > { %v2429_v35 = vmul.f32 %v2356_v17, %v5075_v25  ;;  %v2430_v2 = vmul.f32 %v2356_v17, %v5078_v1  ;;  %v2291_v1 = vpop.permute.xlu0 %2290 }
 0x3de   : > { %v2403_v58 = vmul.f32 %v2291_v1, %v5099_v45  ;;  %v2404_v14 = vmul.f32 %v2291_v1, %v5862_v32 }
 0x3df   : > { %2493 = vst [vmem:[%s5255_s28 + $0x1c0] sm:$0xff] %v2429_v35  ;;  %2494 = vst [vmem:[%s5255_s28 + $0x1c8] sm:$0xff] %v2430_v2 }
 0x3e0   : > { %v2286_v48 = vpop.permute.xlu1 %2285  ;;  %2467 = vst [vmem:[%s5255_s28 + $0xf0] sm:$0xff] %v2403_v58  ;;  %2468 = vst [vmem:[%s5255_s28 + $0xf8] sm:$0xff] %v2404_v14 }
 0x3e1   : > { %v2401_v20 = vmul.f32 %v2286_v48, %v5091_v0  ;;  %v2402_v25 = vmul.f32 %v2286_v48, %v5861_v13 }
 0x3e3   : > { %2465 = vst [vmem:[%s5255_s28 + $0xe0] sm:$0xff] %v2401_v20  ;;  %2466 = vst [vmem:[%s5255_s28 + $0xe8] sm:$0xff] %v2402_v25 }
 0x3e4   : > { %v2366_v0 = vpop.permute.xlu1 %2365  ;;  %v2371_v10 = vpop.permute.xlu0 %2370 }
 0x3e5   : > { %v2433_v52 = vmul.f32 %v2366_v0, %v5107_v23  ;;  %v2434_v57 = vmul.f32 %v2366_v0, %v5863_v3  ;;  %v2435_v45 = vmul.f32 %v2371_v10, %v5115_v36  ;;  %v2436_v8 = vmul.f32 %v2371_v10, %v5118_v9 }
 0x3e7   : > { %2497 = vst [vmem:[%s5255_s28 + $0x1e0] sm:$0xff] %v2433_v52  ;;  %2498 = vst [vmem:[%s5255_s28 + $0x1e8] sm:$0xff] %v2434_v57 }
 0x3e8   : > { %2499 = vst [vmem:[%s5255_s28 + $0x1f0] sm:$0xff] %v2435_v45  ;;  %2500 = vst [vmem:[%s5255_s28 + $0x1f8] sm:$0xff] %v2436_v8 }
 0x3e9   : > { %3508 = shalt.err (!%p3505_p6)
}
 0x3ea   : > { %s3509_s24 = scalar_lea.hbm %s5389_s12, 8192  ;;  %s3513_s6 = scalar_lea.hbm %s5450_s4, 65536 }
 0x3eb   : > { %p3510_p7 = scmp.ne.s32.totalorder %s5389_s12, %s3509_s24  ;;  %p3514_p13 = scmp.lt.s32.totalorder %s5389_s12, %s5450_s4 }
 0x3ec   : > { %p3515_p1 = scmp.lt.s32.totalorder %s3513_s6, %s3509_s24 }
 0x3ed   : > { %p3511_p9 = pnand %p3510_p7, %p3677_p3 }
 0x3ee   : > { %p3516_p10 = por %p3515_p1, %p3514_p13 }
 0x3ef   : > { %p3512_p11 = pneg %p3511_p9 }
 0x3f1   : > { %p3517_p12 = pnand %p3516_p10, %p3512_p11 }
 0x3f3   : > { %3520 = shalt.err (!%p3517_p12)
}
 0x3f4   : > { %s3598_s19 = smov 256   ;;  %s3599_s11 = smov 16  }
 0x3f5   : > { %3000 = dma.vmem_to_hbm [thread:$0]  (%p3677_p3), %s5382_s10, 8192, %s5389_s12, %s5395_s13, %s3598_s19, %s3598_s19, %s3599_s11  }
 0x3f6 PF: > { %p3012_p0 = scmp.ge.s32.totalorder %s3591_s22, 2  ;;  %s2532_s8 = sand.u32 1, %s3563_s15  }
 0x3f7   : > { %s2533_s14 = scalar_lea.sflag [#allocation4], %s2532_s8 }
 0x3f8   : > { %p3007_p2 = pnand %p3012_p0, %p3686_p8 }
 0x3fa   : > { %p3008_p4 = pneg %p3007_p2 }
 0x3fc   : > { %3558 = dma.done.wait (%p3008_p4), %s2533_s14, 8192  }
 0x3fd   : > { %3560 = vsyncadd (%p3008_p4), %s2533_s14, 4294959104  ;;  %s18_s22 = sadd.s32 1, %s3591_s22   ;;  %s5864_s15 = smov %s3567_s16 }
 0x3fe   : > { %p15_p5 = scmp.ge.s32.totalorder %s18_s22, 10   ;;  %s5865_s16 = smov %s3571_s17 }
 0x3ff   : > { %s5866_s17 = smov %s3704_s9  ;;  %s5867_s18 = smov %s3583_s20 }
 0x400   : > { %s5868_s19 = smov %s3587_s21  ;;  %s5869_s20 = smov %s5872_s25 }
 0x401   : > { %s5870_s21 = smov %s5876_s26  ;;  %17 = sbr.rel (!%p15_p5) target bundleno = 6 (0x6), region = 79 }
 0x406   :  { %2538 = vsyncpa [#allocation3], 1 }
 0x407   :  { %2540 = vsyncpa [#allocation3 + $0x1], 1 }
 0x408   :  { %2541 = vsyncpa [#allocation4], 1 }
 0x409   :  { %2543 = vsyncpa [#allocation4 + $0x1], 1 }

</bundles_post_ra>
